<compile_context>
chip_gen: v7x
topology: tpu7x:2x2x1
jax: 0.10.0
libtpu: 0.0.40
codegen_flags: <defaults>
</compile_context>

<pallas_src>
import math

import jax
import jax.numpy as jnp
from jax import lax
from jax.experimental import pallas as pl
from jax.experimental.pallas import tpu as pltpu

NUM_GROUPS = 32
EPS = 1e-6
LANE = 128


def _round_up(x, m):
    return (x + m - 1) // m * m


def _device_kind():
    try:
        return jax.devices()[0].device_kind.lower()
    except Exception:
        return ""


def _vmem_capacity_bytes():
    try:
        cap = getattr(pltpu.get_tpu_info(), "vmem_capacity_bytes", None)
        if cap:
            return int(cap)
    except Exception:
        pass
    kind = _device_kind()
    return (64 << 20) if ("v7" in kind or "7x" in kind) else (128 << 20)


def _prefer_tq256():
    # 128x128-MXU generations (<= v5) prefer 128-row query tiles; v6e/v7x
    # (2x256x256 MXU) fill the systolic array with 256-row tiles.
    kind = _device_kind()
    return not any(v in kind for v in ("v2", "v3", "v4", "v5"))


def _pick_tq(n, prefer_256):
    cands = (256, 128, 64, 32, 16) if prefer_256 else (128, 256, 64, 32, 16)
    for cand in cands:          # multiples of 16 only (bf16 sublane packing)
        if n % cand == 0:
            return cand
    return n


def _vmem_estimate(n, cp, tq):
    bf16, f32 = 2, 4
    return int(
        2 * n * cp * f32              # full-x block (double-buffered)
        + 2 * tq * cp * f32           # per-tile x block
        + 2 * tq * cp * f32           # output tile
        + 2 * cp * cp * f32           # gmat
        + 2 * cp * cp * bf16          # w_q
        + 2 * cp * 2 * cp * bf16      # w_kv
        + 2 * cp * cp * bf16          # w_p
        + 2 * 4 * cp * f32            # biases
        + 2 * n * cp * bf16           # resident k / v scratch (bf16)
        + 8 * cp * f32                # stats scratch
        + 2 * tq * n * f32            # logits + p temporaries
        + tq * 2 * cp * f32           # per-chunk kv f32 temporary
        + 6 * tq * cp * f32)          # misc per-tile temporaries


def _spatial_attn_kernel(x_ref, xt_ref, gmat_ref, wq_ref, bq_ref,
                         wkv_ref, bkv_ref, wp_ref, bp_ref,
                         o_ref, k_ref, v_ref, stats_ref):
    qi = pl.program_id(1)
    n = x_ref.shape[0]
    cp = x_ref.shape[1]
    tq = o_ref.shape[0]
    nk = n // tq

    # ---- once per batch element: GroupNorm stats + chunked k|v projection ---
    @pl.when(qi == 0)
    def _():
        inv_n = 1.0 / float(n)

        # chunked channel moments: never materializes a full f32 copy of x
        def stats_body(i, carry):
            s, s2 = carry
            row = pl.multiple_of(i * tq, tq)
            xc = x_ref[pl.ds(row, tq), :]                       # (tq, Cp) f32
            s = s + jnp.sum(xc, axis=0, keepdims=True)
            s2 = s2 + jnp.sum(xc * xc, axis=0, keepdims=True)
            return s, s2

        zero = jnp.zeros((1, cp), jnp.float32)
        s, s2 = lax.fori_loop(0, nk, stats_body, (zero, zero))
        moments = jnp.concatenate([s, s2], axis=0) * inv_n      # (2, Cp)
        # pool channel moments within each group with ONE stacked matmul:
        # gmat[i, j] = 1/cg if channels i, j share a group else 0.
        pooled = jnp.dot(moments, gmat_ref[...],
                         preferred_element_type=jnp.float32)    # (2, Cp)
        g_mean = pooled[0:1, :]
        g_var = jnp.maximum(pooled[1:2, :] - g_mean * g_mean, 0.0)
        inv_std = lax.rsqrt(g_var + EPS)
        stats_ref[...] = jnp.concatenate([g_mean, inv_std], axis=0)

        # chunked fused k|v projection directly into the bf16 scratches
        def proj_body(i, carry):
            row = pl.multiple_of(i * tq, tq)
            xc = x_ref[pl.ds(row, tq), :]                       # (tq, Cp) f32
            xhat = ((xc - g_mean) * inv_std).astype(jnp.bfloat16)
            kv = jnp.dot(xhat, wkv_ref[...],
                         preferred_element_type=jnp.float32) + bkv_ref[...]
            kv = kv.astype(jnp.bfloat16)                        # (tq, 2Cp)
            k_ref[pl.ds(row, tq), :] = kv[:, :cp]
            v_ref[pl.ds(row, tq), :] = kv[:, cp:]
            return carry

        lax.fori_loop(0, nk, proj_body, 0)

    # ---- per query tile ------------------------------------------------------
    x_t = xt_ref[...]                                           # (tq, Cp) f32
    stats = stats_ref[...]
    g_mean = stats[0:1, :]
    inv_std = stats[1:2, :]
    xhat_t = ((x_t - g_mean) * inv_std).astype(jnp.bfloat16)

    # lazy q projection (affine + C**-0.5 scale already folded into wq/bq)
    q_t = jnp.dot(xhat_t, wq_ref[...],
                  preferred_element_type=jnp.float32) + bq_ref[...]
    q_t = q_t.astype(jnp.bfloat16)                              # (tq, Cp)

    # q @ k^T: contract last dims of both operands (no explicit k transpose)
    logits = lax.dot_general(q_t, k_ref[...], (((1,), (1,)), ((), ())),
                             preferred_element_type=jnp.float32)  # (tq, N)
    m = jnp.max(logits, axis=-1, keepdims=True)
    p = jnp.exp(logits - m)
    l = jnp.sum(p, axis=-1, keepdims=True)
    out = jnp.dot(p.astype(jnp.bfloat16), v_ref[...],
                  preferred_element_type=jnp.float32)           # (tq, Cp) f32
    out = out * pl.reciprocal(l, approx=True)                   # deferred norm

    h2 = jnp.dot(out.astype(jnp.bfloat16), wp_ref[...],
                 preferred_element_type=jnp.float32) + bp_ref[...]
    o_ref[...] = x_t + h2                                       # residual


def _prep_params(params, C, Cp):
    f32 = jnp.float32
    gamma = params["gamma"].astype(f32)
    beta = params["beta"].astype(f32)
    attn_scale = float(C) ** (-0.5)

    def fold(w, b, extra_scale=1.0):
        # conv weight is (C_out, C_in); kernel computes xhat @ W, so transpose,
        # then fold the GroupNorm affine (and optionally the attention scale).
        w_t = w.astype(f32).T                                   # (C_in, C_out)
        w_f = gamma[:, None] * w_t * extra_scale
        b_f = (b.astype(f32) + beta @ w_t) * extra_scale
        return w_f, b_f

    wq_f, bq_f = fold(params["wq"], params["bq"], extra_scale=attn_scale)
    wk_f, bk_f = fold(params["wk"], params["bk"])
    wv_f, bv_f = fold(params["wv"], params["bv"])

    def pad_w(w):
        if Cp == C:
            return w
        return jnp.zeros((Cp, Cp), f32).at[:C, :C].set(w)

    def pad_b(b):
        if Cp == C:
            return b
        return jnp.zeros((Cp,), f32).at[:C].set(b)

    w_q = pad_w(wq_f).astype(jnp.bfloat16)                      # (Cp, Cp)
    b_q = pad_b(bq_f)[None, :]                                  # (1, Cp) f32
    w_kv = jnp.concatenate([pad_w(wk_f), pad_w(wv_f)],
                           axis=1).astype(jnp.bfloat16)         # (Cp, 2Cp)
    b_kv = jnp.concatenate([pad_b(bk_f), pad_b(bv_f)])[None, :]  # (1, 2Cp)

    wp_t = params["wp"].astype(f32).T                           # no affine fold
    w_p = pad_w(wp_t).astype(jnp.bfloat16)                      # (Cp, Cp)
    b_p = pad_b(params["bp"].astype(f32))[None, :]              # (1, Cp)

    cg = C // NUM_GROUPS
    gid = jnp.arange(C) // cg
    gmat = (gid[:, None] == gid[None, :]).astype(f32) / float(cg)
    gmat = pad_w(gmat)                                          # (Cp, Cp)
    return gmat, w_q, b_q, w_kv, b_kv, w_p, b_p


def spatial_self_attention(x_nchw, params):
    """x_nchw: (B, C, H, W). Returns (B, C, H, W) f32."""
    B, C, H, W = x_nchw.shape
    assert C % NUM_GROUPS == 0, "GroupNorm(32) requires C divisible by 32"
    N = H * W
    Cp = _round_up(C, LANE)          # lane-dense channel dim inside the kernel

    vmem_cap = _vmem_capacity_bytes()
    budget = vmem_cap * 3 // 4       # leave headroom for Mosaic scratch/sems
    tq = _pick_tq(N, _prefer_tq256())
    # back off the query tile rather than asking for more VMEM than the chip has
    while (tq > 16 and tq % 2 == 0 and N % (tq // 2) == 0
           and _vmem_estimate(N, Cp, tq) > budget):
        tq //= 2
    assert N % tq == 0
    n_qt = N // tq
    est = _vmem_estimate(N, Cp, tq)
    vmem_limit = int(min(budget, max(32 << 20, (3 * est) // 2)))

    gmat, w_q, b_q, w_kv, b_kv, w_p, b_p = _prep_params(params, C, Cp)

    # (B, C, H, W) -> (B, N, Cp) lane-dense layout.
    # TODO(synk): an NHWC caller could supply (B, N, C) directly and skip this
    # full HBM round-trip transpose (and the matching one on the way out).
    x = jnp.transpose(x_nchw.reshape(B, C, N), (0, 2, 1)).astype(jnp.float32)
    if Cp != C:
        x = jnp.pad(x, ((0, 0), (0, 0), (0, Cp - C)))

    out = pl.pallas_call(
        _spatial_attn_kernel,
        out_shape=jax.ShapeDtypeStruct((B, N, Cp), jnp.float32),
        grid_spec=pltpu.PrefetchScalarGridSpec(
            num_scalar_prefetch=0,
            grid=(B, n_qt),
            in_specs=[
                # full per-batch x block: GroupNorm stats + k|v projection
                pl.BlockSpec((pl.Squeezed(), N, Cp), lambda b, qi: (b, 0, 0)),
                # per-tile x block: residual read + lazy q projection
                pl.BlockSpec((pl.Squeezed(), tq, Cp), lambda b, qi: (b, qi, 0)),
                pl.BlockSpec((Cp, Cp), lambda b, qi: (0, 0)),        # gmat
                pl.BlockSpec((Cp, Cp), lambda b, qi: (0, 0)),        # w_q
                pl.BlockSpec((1, Cp), lambda b, qi: (0, 0)),         # b_q
                pl.BlockSpec((Cp, 2 * Cp), lambda b, qi: (0, 0)),    # w_kv
                pl.BlockSpec((1, 2 * Cp), lambda b, qi: (0, 0)),     # b_kv
                pl.BlockSpec((Cp, Cp), lambda b, qi: (0, 0)),        # w_p
                pl.BlockSpec((1, Cp), lambda b, qi: (0, 0)),         # b_p
            ],
            out_specs=pl.BlockSpec((pl.Squeezed(), tq, Cp),
                                   lambda b, qi: (b, qi, 0)),
            scratch_shapes=[
                pltpu.VMEM((N, Cp), jnp.bfloat16),   # k (whole-buffer reads)
                pltpu.VMEM((N, Cp), jnp.bfloat16),   # v (whole-buffer reads)
                pltpu.VMEM((2, Cp), jnp.float32),    # [group mean; inv_std]
            ],
        ),
        compiler_params=pltpu.CompilerParams(
            dimension_semantics=("parallel", "arbitrary"),
            vmem_limit_bytes=vmem_limit,
        ),
    )(x, x, gmat, w_q, b_q, w_kv, b_kv, w_p, b_p)

    out = out[:, :, :C]
    return jnp.transpose(out, (0, 2, 1)).reshape(B, C, H, W)


# ----------------------------- pure-JAX reference -----------------------------
def reference(x, params):
    B, C, H, W = x.shape
    cg = C // NUM_GROUPS
    xr = x.reshape(B, NUM_GROUPS, cg, H, W)
    mean = xr.mean(axis=(2, 3, 4), keepdims=True)
    var = xr.var(axis=(2, 3, 4), keepdims=True)
    xn = (xr - mean) / jnp.sqrt(var + EPS)
    xn = xn.reshape(B, C, H, W)
    xn = xn * params["gamma"][None, :, None, None] + params["beta"][None, :, None, None]

    def conv1x1(t, w, b):
        return jnp.einsum("bchw,oc->bohw", t, w) + b[None, :, None, None]

    q = conv1x1(xn, params["wq"], params["bq"])
    k = conv1x1(xn, params["wk"], params["bk"])
    v = conv1x1(xn, params["wv"], params["bv"])
    q = q.reshape(B, C, H * W).transpose(0, 2, 1)
    k = k.reshape(B, C, H * W)
    w_ = jnp.einsum("bij,bjk->bik", q, k) * (float(C) ** -0.5)
    w_ = jax.nn.softmax(w_, axis=2)
    v = v.reshape(B, C, H * W)
    h_ = jnp.einsum("bij,bjk->bik", v, w_.transpose(0, 2, 1))
    h_ = h_.reshape(B, C, H, W)
    h_ = conv1x1(h_, params["wp"], params["bp"])
    return x + h_


def init_params(key, C):
    ks = jax.random.split(key, 10)
    scale = 1.0 / math.sqrt(C)
    return {
        # non-trivial affine so the gamma/beta weight-folding is exercised
        "gamma": 1.0 + 0.1 * jax.random.normal(ks[8], (C,), jnp.float32),
        "beta": 0.05 * jax.random.normal(ks[9], (C,), jnp.float32),
        "wq": jax.random.normal(ks[0], (C, C), jnp.float32) * scale,
        "bq": jax.random.normal(ks[1], (C,), jnp.float32) * 0.01,
        "wk": jax.random.normal(ks[2], (C, C), jnp.float32) * scale,
        "bk": jax.random.normal(ks[3], (C,), jnp.float32) * 0.01,
        "wv": jax.random.normal(ks[4], (C, C), jnp.float32) * scale,
        "bv": jax.random.normal(ks[5], (C,), jnp.float32) * 0.01,
        "wp": jax.random.normal(ks[6], (C, C), jnp.float32) * scale,
        "bp": jax.random.normal(ks[7], (C,), jnp.float32) * 0.01,
    }


if __name__ == "__main__":
    key = jax.random.PRNGKey(0)

    # case 1: C=64 (lane padding), square spatial grid
    # case 2: C=96, rectangular grid -> forces multi-tile qi loop + chunk loop
    for case_i, (B, C, H, W) in enumerate([(2, 64, 16, 16), (1, 96, 8, 24)]):
        kx, kp, key = jax.random.split(key, 3)
        x = jax.random.normal(kx, (B, C, H, W), jnp.float32)
        params = init_params(kp, C)

        out = jax.block_until_ready(spatial_self_attention(x, params))
        ref = jax.block_until_ready(reference(x, params))

        assert out.shape == x.shape
        # bf16 MXU operands (f32 accumulation) + approx reciprocal -> relaxed tol
        err = float(jnp.max(jnp.abs(out - ref)))
        assert jnp.allclose(out, ref, atol=5e-2, rtol=5e-2), (case_i, err)

    print("KERNEL_OK")
</pallas_src>

<mosaic_0001>
module attributes {stable_mosaic.version = 11 : i64} {
  func.func @_spatial_attn_kernel(%arg0: i32, %arg1: i32, %arg2: memref<1x256x128xf32, #tpu.memory_space<vmem>>, %arg3: memref<1x256x128xf32, #tpu.memory_space<vmem>>, %arg4: memref<128x128xf32, #tpu.memory_space<vmem>>, %arg5: memref<128x128xbf16, #tpu.memory_space<vmem>>, %arg6: memref<1x128xf32, #tpu.memory_space<vmem>>, %arg7: memref<128x256xbf16, #tpu.memory_space<vmem>>, %arg8: memref<1x256xf32, #tpu.memory_space<vmem>>, %arg9: memref<128x128xbf16, #tpu.memory_space<vmem>>, %arg10: memref<1x128xf32, #tpu.memory_space<vmem>>, %arg11: memref<1x256x128xf32, #tpu.memory_space<vmem>>, %arg12: memref<256x128xbf16, #tpu.memory_space<vmem>>, %arg13: memref<256x128xbf16, #tpu.memory_space<vmem>>, %arg14: memref<2x128xf32, #tpu.memory_space<vmem>>) attributes {dimension_semantics = [#tpu.dimension_semantics<parallel>, #tpu.dimension_semantics<arbitrary>], iteration_bounds = array<i64: 2, 1>, scalar_prefetch = 0 : i64, scratch_operands = 3 : i64, tpu.core_type = #tpu.core_type<tc>, window_params = [{transform_indices = @transform_0, window_bounds = array<i64: 1, 256, 128>}, {transform_indices = @transform_1, window_bounds = array<i64: 1, 256, 128>}, {pipeline_mode = #tpu.pipeline_mode<synchronous>, transform_indices = @transform_2, window_bounds = array<i64: 128, 128>}, {pipeline_mode = #tpu.pipeline_mode<synchronous>, transform_indices = @transform_3, window_bounds = array<i64: 128, 128>}, {pipeline_mode = #tpu.pipeline_mode<synchronous>, transform_indices = @transform_4, window_bounds = array<i64: 1, 128>}, {pipeline_mode = #tpu.pipeline_mode<synchronous>, transform_indices = @transform_5, window_bounds = array<i64: 128, 256>}, {pipeline_mode = #tpu.pipeline_mode<synchronous>, transform_indices = @transform_6, window_bounds = array<i64: 1, 256>}, {pipeline_mode = #tpu.pipeline_mode<synchronous>, transform_indices = @transform_7, window_bounds = array<i64: 128, 128>}, {pipeline_mode = #tpu.pipeline_mode<synchronous>, transform_indices = @transform_8, window_bounds = array<i64: 1, 128>}, {transform_indices = @transform_9, window_bounds = array<i64: 1, 256, 128>}]} {
    %c0_i32 = arith.constant 0 : i32
    %0 = arith.cmpi eq, %arg1, %c0_i32 : i32
    %1 = arith.extui %0 : i1 to i32
    %c0_i32_0 = arith.constant 0 : i32
    %2 = arith.cmpi ne, %1, %c0_i32_0 : i32
    scf.if %2 {
      %cst_25 = arith.constant 0.000000e+00 : f32
      %44 = vector.broadcast %cst_25 : f32 to vector<1x128xf32>
      %c0_i32_26 = arith.constant 0 : i32
      %c256_i32 = arith.constant 256 : i32
      %45 = arith.muli %c0_i32_26, %c256_i32 : i32
      %46 = tpu.assume_multiple %45, 256 : i32
      %c0_27 = arith.constant 0 : index
      %47 = arith.index_cast %46 : i32 to index
      %c0_28 = arith.constant 0 : index
      %48 = vector.load %arg2[%c0_27, %47, %c0_28] : memref<1x256x128xf32, #tpu.memory_space<vmem>>, vector<1x256x128xf32>
      %49 = vector.shape_cast %48 : vector<1x256x128xf32> to vector<256x128xf32>
      %cst_29 = arith.constant dense<0.000000e+00> : vector<128xf32>
      %50 = vector.multi_reduction <add>, %49, %cst_29 [0] : vector<256x128xf32> to vector<128xf32>
      %51 = vector.shape_cast %50 : vector<128xf32> to vector<1x128xf32>
      %52 = arith.addf %44, %51 : vector<1x128xf32>
      %53 = arith.mulf %49, %49 : vector<256x128xf32>
      %cst_30 = arith.constant dense<0.000000e+00> : vector<128xf32>
      %54 = vector.multi_reduction <add>, %53, %cst_30 [0] : vector<256x128xf32> to vector<128xf32>
      %55 = vector.shape_cast %54 : vector<128xf32> to vector<1x128xf32>
      %56 = arith.addf %44, %55 : vector<1x128xf32>
      %c1_i32 = arith.constant 1 : i32
      %57 = tpu.concatenate %52, %56 in 0 : vector<1x128xf32>, vector<1x128xf32> -> vector<2x128xf32>
      %cst_31 = arith.constant 3.906250e-03 : f32
      %58 = vector.broadcast %cst_31 : f32 to vector<2x128xf32>
      %59 = arith.mulf %57, %58 : vector<2x128xf32>
      %c0_32 = arith.constant 0 : index
      %c0_33 = arith.constant 0 : index
      %60 = vector.load %arg4[%c0_32, %c0_33] : memref<128x128xf32, #tpu.memory_space<vmem>>, vector<128x128xf32>
      %cst_34 = arith.constant dense<0.000000e+00> : vector<2x128xf32>
      %61 = tpu.matmul %59, %60, %cst_34 {dimension_numbers = #tpu.dot_dimension_numbers<[1], [0], [0], [1], [0, 0, 1, 1], [], []>} : vector<2x128xf32>, vector<128x128xf32>, vector<2x128xf32> -> vector<2x128xf32>
      %62 = vector.extract_strided_slice %61 {offsets = [0, 0], sizes = [1, 128], strides = [1, 1]} : vector<2x128xf32> to vector<1x128xf32>
      %63 = vector.extract_strided_slice %61 {offsets = [1, 0], sizes = [1, 128], strides = [1, 1]} : vector<2x128xf32> to vector<1x128xf32>
      %64 = arith.mulf %62, %62 : vector<1x128xf32>
      %65 = arith.subf %63, %64 : vector<1x128xf32>
      %cst_35 = arith.constant 0.000000e+00 : f32
      %66 = vector.broadcast %cst_35 : f32 to vector<1x128xf32>
      %67 = arith.maximumf %65, %66 : vector<1x128xf32>
      %cst_36 = arith.constant 9.99999997E-7 : f32
      %68 = vector.broadcast %cst_36 : f32 to vector<1x128xf32>
      %69 = arith.addf %67, %68 : vector<1x128xf32>
      %70 = math.rsqrt %69 : vector<1x128xf32>
      %71 = tpu.concatenate %62, %70 in 0 : vector<1x128xf32>, vector<1x128xf32> -> vector<2x128xf32>
      %c0_37 = arith.constant 0 : index
      %c0_38 = arith.constant 0 : index
      %72 = vector.load %arg14[%c0_37, %c0_38] : memref<2x128xf32, #tpu.memory_space<vmem>>, vector<2x128xf32>
      tpu.vector_store %arg14[%c0_37, %c0_38], %71 {strides = array<i32>} : memref<2x128xf32, #tpu.memory_space<vmem>>, vector<2x128xf32>,
      %c0_i32_39 = arith.constant 0 : i32
      %c256_i32_40 = arith.constant 256 : i32
      %73 = arith.muli %c0_i32_39, %c256_i32_40 : i32
      %74 = tpu.assume_multiple %73, 256 : i32
      %c0_41 = arith.constant 0 : index
      %75 = arith.index_cast %74 : i32 to index
      %c0_42 = arith.constant 0 : index
      %76 = vector.load %arg2[%c0_41, %75, %c0_42] : memref<1x256x128xf32, #tpu.memory_space<vmem>>, vector<1x256x128xf32>
      %77 = vector.shape_cast %76 : vector<1x256x128xf32> to vector<256x128xf32>
      %78 = vector.broadcast %62 : vector<1x128xf32> to vector<256x128xf32>
      %79 = arith.subf %77, %78 : vector<256x128xf32>
      %80 = vector.broadcast %70 : vector<1x128xf32> to vector<256x128xf32>
      %81 = arith.mulf %79, %80 : vector<256x128xf32>
      %82 = arith.truncf %81 : vector<256x128xf32> to vector<256x128xbf16>
      %c0_43 = arith.constant 0 : index
      %c0_44 = arith.constant 0 : index
      %83 = vector.load %arg7[%c0_43, %c0_44] : memref<128x256xbf16, #tpu.memory_space<vmem>>, vector<128x256xbf16>
      %cst_45 = arith.constant dense<0.000000e+00> : vector<256x256xf32>
      %84 = tpu.matmul %82, %83, %cst_45 {dimension_numbers = #tpu.dot_dimension_numbers<[1], [0], [0], [1], [0, 0, 1, 1], [], []>} : vector<256x128xbf16>, vector<128x256xbf16>, vector<256x256xf32> -> vector<256x256xf32>
      %c0_46 = arith.constant 0 : index
      %c0_47 = arith.constant 0 : index
      %85 = vector.load %arg8[%c0_46, %c0_47] : memref<1x256xf32, #tpu.memory_space<vmem>>, vector<1x256xf32>
      %86 = vector.broadcast %85 : vector<1x256xf32> to vector<256x256xf32>
      %87 = arith.addf %84, %86 : vector<256x256xf32>
      %88 = arith.truncf %87 : vector<256x256xf32> to vector<256x256xbf16>
      %89 = vector.extract_strided_slice %88 {offsets = [0, 0], sizes = [256, 128], strides = [1, 1]} : vector<256x256xbf16> to vector<256x128xbf16>
      %90 = arith.index_cast %74 : i32 to index
      %c0_48 = arith.constant 0 : index
      %91 = vector.load %arg12[%90, %c0_48] : memref<256x128xbf16, #tpu.memory_space<vmem>>, vector<256x128xbf16>
      tpu.vector_store %arg12[%90, %c0_48], %89 {strides = array<i32>} : memref<256x128xbf16, #tpu.memory_space<vmem>>, vector<256x128xbf16>,
      %92 = vector.extract_strided_slice %88 {offsets = [0, 128], sizes = [256, 128], strides = [1, 1]} : vector<256x256xbf16> to vector<256x128xbf16>
      %93 = arith.index_cast %74 : i32 to index
      %c0_49 = arith.constant 0 : index
      %94 = vector.load %arg13[%93, %c0_49] : memref<256x128xbf16, #tpu.memory_space<vmem>>, vector<256x128xbf16>
      tpu.vector_store %arg13[%93, %c0_49], %92 {strides = array<i32>} : memref<256x128xbf16, #tpu.memory_space<vmem>>, vector<256x128xbf16>,
      %c1_i32_50 = arith.constant 1 : i32
    } else {
    }
    %c0 = arith.constant 0 : index
    %c0_1 = arith.constant 0 : index
    %c0_2 = arith.constant 0 : index
    %3 = vector.load %arg3[%c0, %c0_1, %c0_2] : memref<1x256x128xf32, #tpu.memory_space<vmem>>, vector<1x256x128xf32>
    %4 = vector.shape_cast %3 : vector<1x256x128xf32> to vector<256x128xf32>
    %c0_3 = arith.constant 0 : index
    %c0_4 = arith.constant 0 : index
    %5 = vector.load %arg14[%c0_3, %c0_4] : memref<2x128xf32, #tpu.memory_space<vmem>>, vector<2x128xf32>
    %6 = vector.extract_strided_slice %5 {offsets = [0, 0], sizes = [1, 128], strides = [1, 1]} : vector<2x128xf32> to vector<1x128xf32>
    %7 = vector.extract_strided_slice %5 {offsets = [1, 0], sizes = [1, 128], strides = [1, 1]} : vector<2x128xf32> to vector<1x128xf32>
    %8 = vector.broadcast %6 : vector<1x128xf32> to vector<256x128xf32>
    %9 = arith.subf %4, %8 : vector<256x128xf32>
    %10 = vector.broadcast %7 : vector<1x128xf32> to vector<256x128xf32>
    %11 = arith.mulf %9, %10 : vector<256x128xf32>
    %12 = arith.truncf %11 : vector<256x128xf32> to vector<256x128xbf16>
    %c0_5 = arith.constant 0 : index
    %c0_6 = arith.constant 0 : index
    %13 = vector.load %arg5[%c0_5, %c0_6] : memref<128x128xbf16, #tpu.memory_space<vmem>>, vector<128x128xbf16>
    %cst = arith.constant dense<0.000000e+00> : vector<256x128xf32>
    %14 = tpu.matmul %12, %13, %cst {dimension_numbers = #tpu.dot_dimension_numbers<[1], [0], [0], [1], [0, 0, 1, 1], [], []>} : vector<256x128xbf16>, vector<128x128xbf16>, vector<256x128xf32> -> vector<256x128xf32>
    %c0_7 = arith.constant 0 : index
    %c0_8 = arith.constant 0 : index
    %15 = vector.load %arg6[%c0_7, %c0_8] : memref<1x128xf32, #tpu.memory_space<vmem>>, vector<1x128xf32>
    %16 = vector.broadcast %15 : vector<1x128xf32> to vector<256x128xf32>
    %17 = arith.addf %14, %16 : vector<256x128xf32>
    %18 = arith.truncf %17 : vector<256x128xf32> to vector<256x128xbf16>
    %c0_9 = arith.constant 0 : index
    %c0_10 = arith.constant 0 : index
    %19 = vector.load %arg12[%c0_9, %c0_10] : memref<256x128xbf16, #tpu.memory_space<vmem>>, vector<256x128xbf16>
    %cst_11 = arith.constant dense<0.000000e+00> : vector<256x256xf32>
    %20 = tpu.matmul %18, %19, %cst_11 {dimension_numbers = #tpu.dot_dimension_numbers<[1], [1], [0], [0], [0, 0, 1, 0], [], []>} : vector<256x128xbf16>, vector<256x128xbf16>, vector<256x256xf32> -> vector<256x256xf32>
    %cst_12 = arith.constant dense<0xFF800000> : vector<256xf32>
    %21 = vector.multi_reduction <maximumf>, %20, %cst_12 [1] : vector<256x256xf32> to vector<256xf32>
    %22 = vector.shape_cast %21 : vector<256xf32> to vector<256x1xf32>
    %23 = vector.broadcast %22 : vector<256x1xf32> to vector<256x256xf32>
    %24 = arith.subf %20, %23 : vector<256x256xf32>
    %25 = math.exp %24 : vector<256x256xf32>
    %cst_13 = arith.constant dense<0.000000e+00> : vector<256xf32>
    %26 = vector.multi_reduction <add>, %25, %cst_13 [1] : vector<256x256xf32> to vector<256xf32>
    %27 = vector.shape_cast %26 : vector<256xf32> to vector<256x1xf32>
    %28 = arith.truncf %25 : vector<256x256xf32> to vector<256x256xbf16>
    %c0_14 = arith.constant 0 : index
    %c0_15 = arith.constant 0 : index
    %29 = vector.load %arg13[%c0_14, %c0_15] : memref<256x128xbf16, #tpu.memory_space<vmem>>, vector<256x128xbf16>
    %cst_16 = arith.constant dense<0.000000e+00> : vector<256x128xf32>
    %30 = tpu.matmul %28, %29, %cst_16 {dimension_numbers = #tpu.dot_dimension_numbers<[1], [0], [0], [1], [0, 0, 1, 1], [], []>} : vector<256x256xbf16>, vector<256x128xbf16>, vector<256x128xf32> -> vector<256x128xf32>
    %31 = tpu.reciprocal %27 {approx = true} : vector<256x1xf32> -> vector<256x1xf32>
    %32 = vector.broadcast %31 : vector<256x1xf32> to vector<256x128xf32>
    %33 = arith.mulf %30, %32 : vector<256x128xf32>
    %34 = arith.truncf %33 : vector<256x128xf32> to vector<256x128xbf16>
    %c0_17 = arith.constant 0 : index
    %c0_18 = arith.constant 0 : index
    %35 = vector.load %arg9[%c0_17, %c0_18] : memref<128x128xbf16, #tpu.memory_space<vmem>>, vector<128x128xbf16>
    %cst_19 = arith.constant dense<0.000000e+00> : vector<256x128xf32>
    %36 = tpu.matmul %34, %35, %cst_19 {dimension_numbers = #tpu.dot_dimension_numbers<[1], [0], [0], [1], [0, 0, 1, 1], [], []>} : vector<256x128xbf16>, vector<128x128xbf16>, vector<256x128xf32> -> vector<256x128xf32>
    %c0_20 = arith.constant 0 : index
    %c0_21 = arith.constant 0 : index
    %37 = vector.load %arg10[%c0_20, %c0_21] : memref<1x128xf32, #tpu.memory_space<vmem>>, vector<1x128xf32>
    %38 = vector.broadcast %37 : vector<1x128xf32> to vector<256x128xf32>
    %39 = arith.addf %36, %38 : vector<256x128xf32>
    %40 = arith.addf %4, %39 : vector<256x128xf32>
    %c0_22 = arith.constant 0 : index
    %c0_23 = arith.constant 0 : index
    %c0_24 = arith.constant 0 : index
    %41 = vector.load %arg11[%c0_22, %c0_23, %c0_24] : memref<1x256x128xf32, #tpu.memory_space<vmem>>, vector<1x256x128xf32>
    %42 = vector.shape_cast %41 : vector<1x256x128xf32> to vector<256x128xf32>
    %43 = vector.shape_cast %40 : vector<256x128xf32> to vector<1x256x128xf32>
    tpu.vector_store %arg11[%c0_22, %c0_23, %c0_24], %43 {strides = array<i32>} : memref<1x256x128xf32, #tpu.memory_space<vmem>>, vector<1x256x128xf32>,
    return
  }
  func.func @transform_0(%arg0: i32, %arg1: i32) -> (i32, i32, i32) {
    %c0_i32 = arith.constant 0 : i32
    %c0_i32_0 = arith.constant 0 : i32
    %c0_i32_1 = arith.constant 0 : i32
    return %arg0, %c0_i32, %c0_i32_0 : i32, i32, i32
  }
  func.func @transform_1(%arg0: i32, %arg1: i32) -> (i32, i32, i32) {
    %c0_i32 = arith.constant 0 : i32
    %c0_i32_0 = arith.constant 0 : i32
    return %arg0, %arg1, %c0_i32 : i32, i32, i32
  }
  func.func @transform_2(%arg0: i32, %arg1: i32) -> (i32, i32) {
    %c0_i32 = arith.constant 0 : i32
    %c0_i32_0 = arith.constant 0 : i32
    %c0_i32_1 = arith.constant 0 : i32
    return %c0_i32, %c0_i32_0 : i32, i32
  }
  func.func @transform_3(%arg0: i32, %arg1: i32) -> (i32, i32) {
    %c0_i32 = arith.constant 0 : i32
    %c0_i32_0 = arith.constant 0 : i32
    %c0_i32_1 = arith.constant 0 : i32
    return %c0_i32, %c0_i32_0 : i32, i32
  }
  func.func @transform_4(%arg0: i32, %arg1: i32) -> (i32, i32) {
    %c0_i32 = arith.constant 0 : i32
    %c0_i32_0 = arith.constant 0 : i32
    %c0_i32_1 = arith.constant 0 : i32
    return %c0_i32, %c0_i32_0 : i32, i32
  }
  func.func @transform_5(%arg0: i32, %arg1: i32) -> (i32, i32) {
    %c0_i32 = arith.constant 0 : i32
    %c0_i32_0 = arith.constant 0 : i32
    %c0_i32_1 = arith.constant 0 : i32
    return %c0_i32, %c0_i32_0 : i32, i32
  }
  func.func @transform_6(%arg0: i32, %arg1: i32) -> (i32, i32) {
    %c0_i32 = arith.constant 0 : i32
    %c0_i32_0 = arith.constant 0 : i32
    %c0_i32_1 = arith.constant 0 : i32
    return %c0_i32, %c0_i32_0 : i32, i32
  }
  func.func @transform_7(%arg0: i32, %arg1: i32) -> (i32, i32) {
    %c0_i32 = arith.constant 0 : i32
    %c0_i32_0 = arith.constant 0 : i32
    %c0_i32_1 = arith.constant 0 : i32
    return %c0_i32, %c0_i32_0 : i32, i32
  }
  func.func @transform_8(%arg0: i32, %arg1: i32) -> (i32, i32) {
    %c0_i32 = arith.constant 0 : i32
    %c0_i32_0 = arith.constant 0 : i32
    %c0_i32_1 = arith.constant 0 : i32
    return %c0_i32, %c0_i32_0 : i32, i32
  }
  func.func @transform_9(%arg0: i32, %arg1: i32) -> (i32, i32, i32) {
    %c0_i32 = arith.constant 0 : i32
    %c0_i32_0 = arith.constant 0 : i32
    return %arg0, %arg1, %c0_i32 : i32, i32, i32
  }
}

</mosaic_0001>

<bundles_post_ra>
// kernel: tpu_custom_call.1
= control target key start
LH: loop header
LB: loop body
LE: loop exit
PB: predicated region body
PF: predicated region fallthrough
CT: control target
= control target key end

     0   :  { %s5640_s0 = inlined_call_operand.hbm [shape: f32[2,256,128], index: 0, kind: input, shape index: {}]   ;;  %s5641_s1 = inlined_call_operand.hbm [shape: f32[2,256,128], index: 1, kind: input, shape index: {}]   ;;  %s5642_s2 = inlined_call_operand.hbm [shape: f32[128,128], index: 2, kind: input, shape index: {}]   ;;  %s5643_s3 = inlined_call_operand.hbm [shape: bf16[128,128], index: 3, kind: input, shape index: {}]   ;;  %s5644_s4 = inlined_call_operand.vmem [shape: f32[1,128], index: 4, kind: input, shape index: {}]   ;;  %s5645_s5 = inlined_call_operand.hbm [shape: bf16[128,256], index: 5, kind: input, shape index: {}]   ;;  %s5646_s6 = inlined_call_operand.vmem [shape: f32[1,256], index: 6, kind: input, shape index: {}]   ;;  %s5647_s7 = inlined_call_operand.hbm [shape: bf16[128,128], index: 7, kind: input, shape index: {}]   ;;  %s5648_s8 = inlined_call_operand.vmem [shape: f32[1,128], index: 8, kind: input, shape index: {}]   ;;  %s5649_s9 = inlined_call_operand.hbm [shape: f32[2,256,128], index: 9, kind: output, shape index: {}]  }
   0x1   :  { %5678 = sst [smem:[#allocation41_spill]] %s5642_s2 }
   0x2   :  { %5679 = sst [smem:[#allocation42_spill]] %s5643_s3 }
   0x3   :  { %5680 = sst [smem:[#allocation43_spill]] %s5645_s5 }
   0x4   :  { %5681 = sst [smem:[#allocation44_spill]] %s5647_s7 }
   0x5   :  { %5682 = sst [smem:[#allocation45_spill]] %s5649_s9 }
   0x6   :  { %14 = vsyncpa [#allocation6], 0 }
   0x7   :  { %16 = vsyncpa [#allocation6 + $0x1], 0 }
   0x8   :  { %17 = vsyncpa [#allocation9], 0 }
   0x9   :  { %19 = vsyncpa [#allocation9 + $0x1], 0 }
   0xa   :  { %20 = vsyncpa [#allocation12], 0 }
   0xb   :  { %21 = vsyncpa [#allocation15], 0 }
   0xc   :  { %22 = vsyncpa [#allocation7], 0 }
   0xd   :  { %24 = vsyncpa [#allocation7 + $0x1], 0  ;;  %s4092_s30 = smov 0   ;;  %s4094_s10 = smov 0  }
   0xe   :  { %s4096_s11 = smov 0   ;;  %s4098_s12 = smov 0  }
   0xf   :  { %s4100_s13 = smov 0   ;;  %s4102_s14 = smov 0  }
  0x10 LB: > { %5683 = sst [smem:[#allocation23_spill]] %s4003_s30  ;;  %s4123_s15 = sadd.s32 4294967295, %s4023_s14   ;;  %s4023_s14 = sphi %s4102_s14, %s30_s14   ;;  %s4019_s13 = sphi %s4100_s13, %s5764_s13   ;;  %s4015_s12 = sphi %s4098_s12, %s5768_s12   ;;  %s4011_s11 = sphi %s4096_s11, %s5767_s11   ;;  %s4007_s10 = sphi %s4094_s10, %s5766_s10   ;;  %s4003_s30 = sphi %s4092_s30, %s5765_s30  }
  0x11   : > { %5684 = sst [smem:[#allocation24_spill]] %s4015_s12  ;;  %s2910_s16 = sadd.s32 4294967294, %s4023_s14  }
  0x12   : > { %5685 = sst [smem:[#allocation25_spill]] %s4019_s13  ;;  %p62_p0 = scmp.ne.s32.totalorder %s4007_s10, %s4003_s30 }
  0x13   : > { %p5650_p1 = scmp.eq.s32.totalorder %s4123_s15, 0  ;;  %p269_p3 = scmp.eq.s32.totalorder %s2910_s16, 1 }
  0x14   : > { %p2911_p5 = scmp.ge.s32.totalorder %s4023_s14, 1  ;;  %p276_p7 = scmp.lt.s32.totalorder %s4023_s14, 3 }
  0x15   : > { %p4132_p4 = por %p5650_p1, %p62_p0  ;;  %p4137_p6 = por %p269_p3, %p62_p0 }
  0x16   : > { %p4142_p8 = pnand %p2911_p5, %p276_p7  ;;  %s4025_s20 = smov [#allocation10]  }
  0x17   : > { %s5686_s17 = scalar_select %p4132_p4, 1, 0 }
  0x18   : > { %s5687_s18 = scalar_select %p4137_p6, 1, 0 }
  0x19   : > { %s5689_s19 = scalar_select %p4142_p8, 1, 0 }
  0x1a   : > { %5688 = sst [smem:[#allocation26_spill]] %s5687_s18  ;;  %s288_s21 = sshll.u32 %s4025_s20, 4  ;;  %s4146_s21 = int_to_ptr.vmem [resolvable:$true] %s288_s21 }
  0x1b   : > { %p3391_p9 = pneg %p4142_p8  ;;  %s4026_s23 = smov [#allocation11]  }
  0x1c   : > { %s301_s24 = sshll.u32 %s4026_s23, 4  ;;  %s5691_s2 = sld [smem:[#allocation41_spill]]  ;;  %s4157_s24 = int_to_ptr.vmem [resolvable:$true] %s301_s24 }
  0x1d   : > { %p4153_p11 = pnand %p3391_p9, %p5650_p1 }
  0x1f   : > { %p4167_p13 = pneg %p4153_p11 }
  0x22   : > { %s3753_s27 = scalar_lea.hbm %s5691_s2, 2048 }
  0x23   : > { %p3754_p12 = scmp.ne.s32.totalorder %s5691_s2, %s3753_s27  ;;  %p3760_p5 = scmp.lt.u32.totalorder %s3753_s27, %s5691_s2 }
  0x25   : > { %p3756_p0 = pnand %p4167_p13, %p3754_p12 }
  0x27   : > { %p3757_p3 = pneg %p3756_p0 }
  0x29   : > { %p3762_p7 = pnand %p3760_p5, %p3757_p3 }
  0x2b   : > { %3765 = shalt.err (!%p3762_p7)
}
  0x2c   : > { %s3766_s25 = scalar_lea.vmem %s4146_s21, 2048  ;;  %p3774_p2 = scmp.lt.s32.totalorder %s4146_s21, %s4146_s21 }
  0x2d   : > { %p3767_p9 = scmp.ne.s32.totalorder %s4146_s21, %s3766_s25  ;;  %p3775_p6 = scmp.lt.s32.totalorder %s3766_s25, %s3766_s25 }
  0x2f   : > { %p3769_p10 = pnand %p3767_p9, %p4167_p13  ;;  %p3776_p12 = por %p3775_p6, %p3774_p2 }
  0x31   : > { %p3770_p1 = pneg %p3769_p10 }
  0x33   : > { %p3777_p0 = pnand %p3776_p12, %p3770_p1 }
  0x35   : > { %3780 = shalt.err (!%p3777_p0)
}
  0x36   : > { %s5654_s26 = smov 128   ;;  %s5656_s27 = smov 8  }
  0x37   : > { %3394 = dma.hbm_to_vmem [thread:$0]  (!%p4153_p11), %s5691_s2, 2048, %s4146_s21, [#allocation9], %s5654_s26, %s5654_s26, %s5656_s27  }
  0x38   : > { %s5693_s3 = sld [smem:[#allocation42_spill]] }
  0x3e   : > { %s3781_s25 = scalar_lea.hbm %s5693_s3, 1024 }
  0x3f   : > { %p3782_p1 = scmp.ne.s32.totalorder %s5693_s3, %s3781_s25  ;;  %p3788_p10 = scmp.lt.u32.totalorder %s3781_s25, %s5693_s3 }
  0x41   : > { %p3784_p2 = pnand %p3782_p1, %p4167_p13 }
  0x43   : > { %p3785_p6 = pneg %p3784_p2 }
  0x45   : > { %p3790_p3 = pnand %p3788_p10, %p3785_p6 }
  0x47   : > { %3793 = shalt.err (!%p3790_p3)
}
  0x48   : > { %s3794_s21 = scalar_lea.vmem %s4157_s24, 1024  ;;  %p3802_p12 = scmp.lt.s32.totalorder %s4157_s24, %s4157_s24 }
  0x49   : > { %p3795_p5 = scmp.ne.s32.totalorder %s4157_s24, %s3794_s21  ;;  %p3803_p0 = scmp.lt.s32.totalorder %s3794_s21, %s3794_s21 }
  0x4b   : > { %p3797_p7 = pnand %p3795_p5, %p4167_p13  ;;  %p3804_p1 = por %p3803_p0, %p3802_p12 }
  0x4d   : > { %p3798_p9 = pneg %p3797_p7 }
  0x4f   : > { %p3805_p2 = pnand %p3804_p1, %p3798_p9 }
  0x51   : > { %3808 = shalt.err (!%p3805_p2)
}
  0x52   : > { %s5660_s30 = smov 64   ;;  %s4030_s9 = smov 4  }
  0x53   : > { %3397 = dma.hbm_to_vmem [thread:$0]  (!%p4153_p11), %s5693_s3, 1024, %s4157_s24, [#allocation12], %s5660_s30, %s5660_s30, %s4030_s9  }
  0x54   : > { %s4031_s28 = smov [#allocation13]   ;;  %s4032_s20 = smov [#allocation14]  }
  0x55   : > { %s317_s29 = sshll.u32 %s4031_s28, 4  ;;  %s333_s23 = sshll.u32 %s4032_s20, 4  ;;  %s318_s29 = int_to_ptr.vmem [resolvable:$true] %s317_s29  ;;  %s4217_s23 = int_to_ptr.vmem [resolvable:$true] %s333_s23 }
  0x56   : > { %s5694_s5 = sld [smem:[#allocation43_spill]] }
  0x5c   : > { %s3809_s26 = scalar_lea.hbm %s5694_s5, 2048 }
  0x5d   : > { %p3810_p6 = scmp.ne.s32.totalorder %s5694_s5, %s3809_s26  ;;  %p3816_p5 = scmp.lt.u32.totalorder %s3809_s26, %s5694_s5 }
  0x5f   : > { %p3812_p10 = pnand %p3810_p6, %p4167_p13 }
  0x61   : > { %p3813_p3 = pneg %p3812_p10 }
  0x63   : > { %p3818_p7 = pnand %p3816_p5, %p3813_p3 }
  0x65   : > { %3821 = shalt.err (!%p3818_p7)
}
  0x66   : > { %s3822_s18 = scalar_lea.vmem %s318_s29, 2048  ;;  %p3830_p1 = scmp.lt.s32.totalorder %s318_s29, %s318_s29 }
  0x67   : > { %p3823_p9 = scmp.ne.s32.totalorder %s318_s29, %s3822_s18  ;;  %p3831_p2 = scmp.lt.s32.totalorder %s3822_s18, %s3822_s18 }
  0x69   : > { %p3825_p12 = pnand %p3823_p9, %p4167_p13  ;;  %p3832_p4 = por %p3831_p2, %p3830_p1 }
  0x6b   : > { %p3826_p0 = pneg %p3825_p12 }
  0x6d   : > { %p3833_p8 = pnand %p3832_p4, %p3826_p0 }
  0x6f   : > { %3836 = shalt.err (!%p3833_p8)
}
  0x70   : > { %s5695_s2 = smov 8   ;;  %s5696_s27 = smov 128  }
  0x71   : > { %3400 = dma.hbm_to_vmem [thread:$0]  (!%p4153_p11), %s5694_s5, 2048, %s318_s29, [#allocation12], %s5696_s27, %s5696_s27, %s5695_s2  }
  0x72   : > { %s5697_s7 = sld [smem:[#allocation44_spill]] }
  0x78   : > { %s3837_s21 = scalar_lea.hbm %s5697_s7, 1024 }
  0x79   : > { %p3838_p6 = scmp.ne.s32.totalorder %s5697_s7, %s3837_s21  ;;  %p3844_p10 = scmp.lt.u32.totalorder %s3837_s21, %s5697_s7 }
  0x7b   : > { %p3840_p4 = pnand %p3838_p6, %p4167_p13 }
  0x7d   : > { %p3841_p8 = pneg %p3840_p4 }
  0x7f   : > { %p3846_p3 = pnand %p3844_p10, %p3841_p8 }
  0x81   : > { %3849 = shalt.err (!%p3846_p3)
}
  0x82   : > { %s3850_s29 = scalar_lea.vmem %s4217_s23, 1024  ;;  %p3858_p12 = scmp.lt.s32.totalorder %s4217_s23, %s4217_s23 }
  0x83   : > { %p3851_p5 = scmp.ne.s32.totalorder %s4217_s23, %s3850_s29  ;;  %p3859_p0 = scmp.lt.s32.totalorder %s3850_s29, %s3850_s29 }
  0x85   : > { %p3853_p7 = pnand %p3851_p5, %p4167_p13  ;;  %p3860_p1 = por %p3859_p0, %p3858_p12 }
  0x87   : > { %p3854_p9 = pneg %p3853_p7 }
  0x89   : > { %p3861_p2 = pnand %p3860_p1, %p3854_p9 }
  0x8b   : > { %3864 = shalt.err (!%p3861_p2)
}
  0x8c   : > { %s5698_s30 = smov 64   ;;  %s42_s22 = sadd.s32 1, %s4019_s13 }
  0x8d   : > { %3403 = dma.hbm_to_vmem [thread:$0]  (!%p4153_p11), %s5697_s7, 1024, %s4217_s23, [#allocation15], %s5698_s30, %s5698_s30, %s4030_s9  }
  0x8e   : > { %s49_s16 = sadd.s32 1, %s4011_s11  ;;  %p44_p13 = scmp.ge.s32.totalorder %s42_s22, 2 }
  0x8f   : > { %p56_p6 = scmp.ne.s32.totalorder %s4011_s11, %s4007_s10  ;;  %p57_p4 = scmp.eq.s32.totalorder %s4023_s14, 0 }
  0x90   : > { %p3419_p8 = scmp.lt.s32.totalorder %s4023_s14, 2  ;;  %s5770_s22 = smov (%p44_p13, %s42_s22), 0 }
  0x91   : > { %5699 = sst [smem:[#allocation27_spill]] %s5770_s22  ;;  %p58_p10 = por %p57_p4, %p56_p6 }
  0x92   : > { %p5700_p3 = scmp.eq.s32.totalorder %s4123_s15, 1  ;;  %s46_s25 = ssub.s32 %s4019_s13, %s5770_s22 }
  0x93   : > { %s350_s21 = sand.u32 1, %s4011_s11   ;;  %p47_p7 = scmp.eq.s32.totalorder %s46_s25, 0 }
  0x94   : > { %p4276_p5 = por %p5700_p3, %p56_p6  ;;  %s4283_s9 = sshll.u32 %s350_s21, 8 }
  0x95   : > { %s2970_s23 = sshll.u32 %s4019_s13, 12  ;;  %s354_s30 = scalar_lea.vmem [#allocation5], %s4283_s9 }
  0x96   : > { %s4287_s12 = scalar_select %p47_p7, %s4011_s11, %s49_s16  }
  0x97   : > { %s4292_s29 = scalar_lea.hbm %s5640_s0, %s2970_s23  ;;  %s361_s28 = sshll.u32 %s354_s30, 4  ;;  %s4301_s28 = int_to_ptr.vmem [resolvable:$true] %s361_s28 }
  0x98   : > { %p4297_p11 = pnand %p3419_p8, %p58_p10  ;;  %s4306_s24 = scalar_lea.hbm %s5641_s1, %s2970_s23 }
  0x99   : > { %s4308_s18 = scalar_lea.sflag [#allocation6], %s350_s21  ;;  %s3865_s3 = scalar_lea.hbm %s4292_s29, 4096 }
  0x9a   : > { %p3866_p9 = scmp.ne.s32.totalorder %s4292_s29, %s3865_s3  ;;  %p3867_p12 = pneg %p4297_p11 }
  0x9b   : > { %s3870_s7 = scalar_lea.hbm %s5640_s0, 8192  ;;  %p3871_p2 = scmp.lt.u32.totalorder %s4292_s29, %s5640_s0 }
  0x9c   : > { %p3868_p0 = pnand %p3867_p12, %p3866_p9  ;;  %p3872_p13 = scmp.lt.u32.totalorder %s3870_s7, %s3865_s3 }
  0x9d   : > { %p3874_p4 = scmp.lt.u32.totalorder %s3865_s3, %s4292_s29 }
  0x9e   : > { %p3869_p1 = pneg %p3868_p0  ;;  %p3873_p6 = por %p3872_p13, %p3871_p2 }
  0xa0   : > { %p3875_p8 = por %p3874_p4, %p3873_p6 }
  0xa2   : > { %p3876_p10 = pnand %p3875_p8, %p3869_p1 }
  0xa4   : > { %3879 = shalt.err (!%p3876_p10)
}
  0xa5   : > { %s3880_s21 = scalar_lea.vmem %s4301_s28, 4096  ;;  %s4033_s5 = smov [#allocation5]  }
  0xa6   : > { %p3881_p3 = scmp.ne.s32.totalorder %s4301_s28, %s3880_s21  ;;  %s3885_s23 = sshll.u32 %s4033_s5, 4  ;;  %s3886_s23 = int_to_ptr.vmem [resolvable:$false] %s3885_s23 }
  0xa7   : > { %s3887_s13 = scalar_lea.vmem %s3886_s23, 8192  ;;  %p3888_p0 = scmp.lt.s32.totalorder %s4301_s28, %s3886_s23 }
  0xa8   : > { %p3883_p7 = pnand %p3881_p3, %p3867_p12  ;;  %p3889_p2 = scmp.lt.s32.totalorder %s3887_s13, %s3880_s21 }
  0xaa   : > { %p3884_p9 = pneg %p3883_p7  ;;  %p3890_p13 = por %p3889_p2, %p3888_p0 }
  0xac   : > { %p3891_p6 = pnand %p3890_p13, %p3884_p9 }
  0xae   : > { %3894 = shalt.err (!%p3891_p6)
}
  0xaf   : > { %3407 = dma.hbm_to_vmem [thread:$0]  (!%p4297_p11), %s4292_s29, 4096, %s4301_s28, %s4308_s18, %s5696_s27, %s5696_s27, %s5695_s2  }
  0xb0   : > { %s375_s3 = scalar_lea.vmem [#allocation8], %s4283_s9  ;;  %s371_s22 = sand.u32 1, %s4023_s14  }
  0xb1   : > { %s384_s7 = sshll.u32 %s375_s3, 4  ;;  %s4343_s16 = scalar_lea.sflag [#allocation9], %s371_s22  ;;  %s4341_s7 = int_to_ptr.vmem [resolvable:$true] %s384_s7 }
  0xb2   : > { %s3895_s25 = scalar_lea.hbm %s4306_s24, 4096  ;;  %s3900_s5 = scalar_lea.hbm %s5641_s1, 8192 }
  0xb3   : > { %p3896_p1 = scmp.ne.s32.totalorder %s4306_s24, %s3895_s25  ;;  %p3901_p10 = scmp.lt.u32.totalorder %s4306_s24, %s5641_s1 }
  0xb4   : > { %p3902_p3 = scmp.lt.u32.totalorder %s3900_s5, %s3895_s25  ;;  %p3904_p9 = scmp.lt.u32.totalorder %s3895_s25, %s4306_s24 }
  0xb5   : > { %p3898_p4 = pnand %p3896_p1, %p3867_p12 }
  0xb6   : > { %p3903_p7 = por %p3902_p3, %p3901_p10 }
  0xb7   : > { %p3899_p8 = pneg %p3898_p4 }
  0xb8   : > { %p3905_p0 = por %p3904_p9, %p3903_p7 }
  0xba   : > { %p3906_p2 = pnand %p3905_p0, %p3899_p8 }
  0xbc   : > { %3909 = shalt.err (!%p3906_p2)
}
  0xbd   : > { %s3910_s9 = scalar_lea.vmem %s4341_s7, 4096  ;;  %s4034_s29 = smov [#allocation8]  }
  0xbe   : > { %p3911_p13 = scmp.ne.s32.totalorder %s4341_s7, %s3910_s9  ;;  %s3915_s28 = sshll.u32 %s4034_s29, 4  ;;  %s3916_s28 = int_to_ptr.vmem [resolvable:$false] %s3915_s28 }
  0xbf   : > { %s3917_s18 = scalar_lea.vmem %s3916_s28, 8192  ;;  %p3918_p4 = scmp.lt.s32.totalorder %s4341_s7, %s3916_s28 }
  0xc0   : > { %p3913_p6 = pnand %p3911_p13, %p3867_p12  ;;  %p3919_p10 = scmp.lt.s32.totalorder %s3917_s18, %s3910_s9 }
  0xc2   : > { %p3914_p1 = pneg %p3913_p6  ;;  %p3920_p3 = por %p3919_p10, %p3918_p4 }
  0xc4   : > { %p3921_p7 = pnand %p3920_p3, %p3914_p1 }
  0xc6   : > { %3924 = shalt.err (!%p3921_p7)
}
  0xc7   : > { %3410 = dma.hbm_to_vmem [thread:$0]  (!%p4297_p11), %s4306_s24, 4096, %s4341_s7, %s4343_s16, %s5696_s27, %s5696_s27, %s5695_s2  }
  0xc8   : > { %p5703_p12 = scmp.ne.s32.totalorder %s5689_s19, 0 }
  0xca   : > { %396 = sbr.rel (%p5703_p12) target bundleno = 1849 (0x739), region = 56 }
  0xd1   : > { %s4375_s3 = sand.u32 1, %s4007_s10   ;;  %p5704_p8 = scmp.ne.s32.totalorder %s5686_s17, 0 }
  0xd2   : > { %s4378_s22 = sshll.u32 %s4375_s3, 8  ;;  %s399_s26 = scalar_lea.sflag [#allocation6], %s4375_s3 }
  0xd3   : > { %s4382_s25 = scalar_lea.vmem [#allocation5], %s4378_s22 }
  0xd4   : > { %3978 = dma.done.wait (%p5704_p8), %s399_s26, 4096  }
  0xd5   : > { %3980 = vsyncadd (%p5704_p8), %s399_s26, 4294963200  ;;  %s407_s19 = sand.u32 1, %s4123_s15   ;;  %s4390_s27 = scalar_lea.vmem [#allocation8], %s4378_s22 }
  0xd6   : > { %s408_s2 = scalar_lea.sflag [#allocation9], %s407_s19 }
  0xd7   : > { %3982 = dma.done.wait (%p5704_p8), %s408_s2, 4096  }
  0xd8   : > { %3984 = vsyncadd (%p5704_p8), %s408_s2, 4294963200  ;;  %p5705_p11 = scmp.eq.s32.totalorder %s4123_s15, 0 }
  0xda   : > { %3986 = dma.done.wait (%p5705_p11), [#allocation9], 2048   ;;  %p5706_p9 = pmov %p5705_p11 }
  0xdc   : > { %3988 = vsyncadd (%p5706_p9), [#allocation9], 4294965248  ;;  %p5707_p0 = pmov %p5706_p9 }
  0xde   : > { %3990 = dma.done.wait (%p5707_p0), [#allocation12], 3072   ;;  %p5708_p2 = pmov %p5707_p0 }
  0xdf   : > { %p5709_p13 = pmov %p5707_p0 }
  0xe0   : > { %3992 = vsyncadd (%p5708_p2), [#allocation12], 4294964224 }
  0xe1   : > { %3994 = dma.done.wait (%p5709_p13), [#allocation15], 1024   ;;  %p5710_p6 = pmov %p5707_p0 }
  0xe2   : > { %v4035_v0 = vmov 0.0|0.0   ;;  %vm4036_vm0 = vmmov 0   ;;  %v4037_v1 = vmov 0.0   ;;  %v617_v2 = vld [vmem:[#allocation10] sm:$0xff]  ;;  %v618_v3 = vld [vmem:[#allocation10 + $0x8] sm:$0xff]  ;;  %v619_v4 = vld [vmem:[#allocation10 + $0x10] sm:$0xff] }
  0xe3   : > { %3996 = vsyncadd (%p5710_p6), [#allocation15], 4294966272  ;;  %3329 = vmatprep.subr.bf16.mxu0 %v4035_v0  ;;  %3230 = vmatprep.mubr.msk.f32.mxu0 %vm4036_vm0, %v4037_v1  ;;  %v3330_v5 = vpack.c.bf16 %v618_v3, %v617_v2  ;;  %v620_v6 = vld [vmem:[#allocation10 + $0x18] sm:$0xff]  ;;  %v621_v8 = vld [vmem:[#allocation10 + $0x20] sm:$0xff]  ;;  %vm614_vm1 = vcmask 1040384   ;;  %s5492_s21 = scalar_lea.vmem [#allocation16], %s4378_s22 }
  0xe4   : > { %v3333_v7 = vpack.c.bf16 %v620_v6, %v619_v4  ;;  %v622_v9 = vld [vmem:[#allocation10 + $0x28] sm:$0xff]  ;;  %v4411_v10 = vld [vmem:[%s4382_s25] sm:$0xff]  ;;  %v4417_v12 = vld [vmem:[%s4382_s25 + $0x10] sm:$0xff]  ;;  %s5757_s5 = sld [smem:[#allocation24_spill]]  ;;  %s2761_s13 = sshll.u32 %s5492_s21, 4  ;;  %s5587_s13 = int_to_ptr.vmem [resolvable:$true] %s2761_s13 }
  0xe5   : > { %3331 = vmatpush3.bf16.msra.mxu0 %v3330_v5  ;;  %v4414_v11 = vld [vmem:[%s4382_s25 + $0x8] sm:$0xff]  ;;  %v4420_v13 = vld [vmem:[%s4382_s25 + $0x18] sm:$0xff]  ;;  %v544_v15 = vmul.f32 %v4411_v10, %v4411_v10  ;;  %v3336_v17 = vpack.c.bf16 %v622_v9, %v621_v8  ;;  %v546_v18 = vmul.f32 %v4417_v12, %v4417_v12  ;;  %v623_v19 = vld [vmem:[#allocation10 + $0x30] sm:$0xff]  ;;  %s5758_s28 = sld [smem:[#allocation45_spill]]  ;;  %s2746_s22 = scalar_lea.sflag [#allocation7], %s4375_s3 }
  0xe6   : > { %3332 = vmatprep.subr.bf16.mxu0 %v4035_v0  ;;  %v506_v14 = vadd.f32 %v4414_v11, %v4411_v10  ;;  %v545_v16 = vmul.f32 %v4414_v11, %v4414_v11  ;;  %v624_v20 = vld [vmem:[#allocation10 + $0x38] sm:$0xff]  ;;  %v4432_v21 = vld [vmem:[%s4382_s25 + $0x20] sm:$0xff]  ;;  %v547_v23 = vmul.f32 %v4420_v13, %v4420_v13  ;;  %v4438_v25 = vld [vmem:[%s4382_s25 + $0x28] sm:$0xff]  ;;  %s3925_s26 = scalar_lea.vmem %s5587_s13, 4096 }
  0xe7   : > { %v3339_v27 = vpack.c.bf16 %v624_v20, %v623_v19  ;;  %v548_v28 = vmul.f32 %v4432_v21, %v4432_v21  ;;  %v625_v30 = vld [vmem:[#allocation10 + $0x40] sm:$0xff]  ;;  %v626_v31 = vld [vmem:[#allocation10 + $0x48] sm:$0xff]  ;;  %v4445_v32 = vld [vmem:[%s4382_s25 + $0x30] sm:$0xff]  ;;  %v549_v34 = vmul.f32 %v4438_v25, %v4438_v25  ;;  %p3926_p1 = scmp.ne.s32.totalorder %s5587_s13, %s3925_s26 }
  0xe8   : > { %v507_v22 = vadd.f32 %v506_v14, %v4417_v12  ;;  %v576_v24 = vadd.f32 %v545_v16, %v544_v15  ;;  %v4451_v36 = vld [vmem:[%s4382_s25 + $0x38] sm:$0xff]  ;;  %v3342_v38 = vpack.c.bf16 %v626_v31, %v625_v30  ;;  %v627_v39 = vld [vmem:[#allocation10 + $0x50] sm:$0xff]  ;;  %v4455_v41 = vld [vmem:[%s4382_s25 + $0x40] sm:$0xff]  ;;  %v550_v42 = vmul.f32 %v4445_v32, %v4445_v32 }
  0xe9   : > { %3334 = vmatpush3.bf16.msra.mxu0 %v3333_v7  ;;  %v628_v40 = vld [vmem:[#allocation10 + $0x58] sm:$0xff]  ;;  %v4461_v44 = vld [vmem:[%s4382_s25 + $0x48] sm:$0xff]  ;;  %v551_v47 = vmul.f32 %v4451_v36, %v4451_v36  ;;  %v629_v50 = vld [vmem:[#allocation10 + $0x60] sm:$0xff]  ;;  %v552_v55 = vmul.f32 %v4455_v41, %v4455_v41  ;;  %p3927_p4 = pnand %p3926_p1, %p4276_p5 }
  0xea   : > { %3335 = vmatprep.subr.bf16.mxu0 %v4035_v0  ;;  %v508_v26 = vadd.f32 %v507_v22, %v4420_v13  ;;  %v577_v29 = vadd.f32 %v576_v24, %v546_v18  ;;  %v3487_v46 = vld [vmem:[#allocation13 + $0x4] ss:$8 sps:$4 sm:$0xff]   ;;  %v3489_v49 = vld [vmem:[#allocation13] ss:$8 sps:$4 sm:$0xff]   ;;  %v4467_v52 = vld [vmem:[%s4382_s25 + $0x50] sm:$0xff]  ;;  %v3345_v54 = vpack.c.bf16 %v628_v40, %v627_v39  ;;  %v553_v59 = vmul.f32 %v4461_v44, %v4461_v44  ;;  %s2972_s23 = sshll.u32 %s5757_s5, 12 }
  0xeb   : > { %v630_v51 = vld [vmem:[#allocation10 + $0x68] sm:$0xff]  ;;  %941 = vmatprep.subr.bf16.mxu1 %v3487_v46  ;;  %v4474_v57 = vld [vmem:[%s4382_s25 + $0x58] sm:$0xff]  ;;  %v631_v61 = vld [vmem:[#allocation10 + $0x70] sm:$0xff]  ;;  %v554_v3 = vmul.f32 %v4467_v52, %v4467_v52  ;;  %s5585_s18 = scalar_lea.hbm %s5758_s28, %s2972_s23  ;;  %p3928_p10 = pneg %p3927_p4 }
  0xec   : > { %v509_v33 = vadd.f32 %v508_v26, %v4432_v21  ;;  %v578_v35 = vadd.f32 %v577_v29, %v547_v23  ;;  %942 = vmatpush1.bf16.msra.mxu1 %v3489_v49  ;;  %v632_v62 = vld [vmem:[#allocation10 + $0x78] sm:$0xff]  ;;  %v4480_v63 = vld [vmem:[%s4382_s25 + $0x60] sm:$0xff]  ;;  %v3348_v2 = vpack.c.bf16 %v630_v51, %v629_v50  ;;  %v4487_v5 = vld [vmem:[%s4382_s25 + $0x68] sm:$0xff]  ;;  %v555_v7 = vmul.f32 %v4474_v57, %v4474_v57 }
  0xed   : > { %3337 = vmatpush3.bf16.msra.mxu0 %v3336_v17  ;;  %v4493_v9 = vld [vmem:[%s4382_s25 + $0x70] sm:$0xff]  ;;  %v3351_v15 = vpack.c.bf16 %v632_v62, %v631_v61  ;;  %v556_v16 = vmul.f32 %v4480_v63, %v4480_v63  ;;  %v4500_v18 = vld [vmem:[%s4382_s25 + $0x78] sm:$0xff]  ;;  %v557_v20 = vmul.f32 %v4487_v5, %v4487_v5  ;;  %v4515_v30 = vld [vmem:[%s4382_s25 + $0x88] sm:$0xff] }
  0xee   : > { %3338 = vmatprep.subr.bf16.mxu0 %v4035_v0  ;;  %v510_v37 = vadd.f32 %v509_v33, %v4438_v25  ;;  %v579_v43 = vadd.f32 %v578_v35, %v548_v28  ;;  %v558_v24 = vmul.f32 %v4493_v9, %v4493_v9  ;;  %v559_v28 = vmul.f32 %v4500_v18, %v4500_v18  ;;  %v4521_v35 = vld [vmem:[%s4382_s25 + $0x90] sm:$0xff]  ;;  %v4527_v40 = vld [vmem:[%s4382_s25 + $0x98] sm:$0xff]  ;;  %v4533_v46 = vld [vmem:[%s4382_s25 + $0xa0] sm:$0xff] }
  0xef   : > { %v4539_v50 = vld [vmem:[%s4382_s25 + $0xa8] sm:$0xff] }
  0xf0   : > { %v511_v45 = vadd.f32 %v510_v37, %v4445_v32  ;;  %v580_v48 = vadd.f32 %v579_v43, %v549_v34  ;;  %v562_v43 = vmul.f32 %v4521_v35, %v4521_v35 }
  0xf1   : > { %3340 = vmatpush3.bf16.msra.mxu0 %v3339_v27  ;;  %v4509_v27 = vld [vmem:[%s4382_s25 + $0x80] sm:$0xff] }
  0xf2   : > { %3341 = vmatprep.subr.bf16.mxu0 %v4035_v0  ;;  %v512_v53 = vadd.f32 %v511_v45, %v4451_v36  ;;  %v581_v56 = vadd.f32 %v580_v48, %v550_v42  ;;  %v560_v33 = vmul.f32 %v4509_v27, %v4509_v27  ;;  %v563_v48 = vmul.f32 %v4527_v40, %v4527_v40 }
  0xf4   : > { %v513_v58 = vadd.f32 %v512_v53, %v4455_v41  ;;  %v582_v60 = vadd.f32 %v581_v56, %v551_v47  ;;  %v564_v53 = vmul.f32 %v4533_v46, %v4533_v46 }
  0xf5   : > { %3343 = vmatpush3.bf16.msra.mxu0 %v3342_v38  ;;  %v561_v38 = vmul.f32 %v4515_v30, %v4515_v30 }
  0xf6   : > { %3344 = vmatprep.subr.bf16.mxu0 %v4035_v0  ;;  %v514_v1 = vadd.f32 %v513_v58, %v4461_v44  ;;  %v583_v4 = vadd.f32 %v582_v60, %v552_v55  ;;  %v4545_v55 = vld [vmem:[%s4382_s25 + $0xb0] sm:$0xff]  ;;  %v565_v58 = vmul.f32 %v4539_v50, %v4539_v50  ;;  %v4551_v60 = vld [vmem:[%s4382_s25 + $0xb8] sm:$0xff] }
  0xf7   : > { %v566_v62 = vmul.f32 %v4545_v55, %v4545_v55 }
  0xf8   : > { %v515_v6 = vadd.f32 %v514_v1, %v4467_v52  ;;  %v584_v8 = vadd.f32 %v583_v4, %v553_v59  ;;  %v567_v4 = vmul.f32 %v4551_v60, %v4551_v60 }
  0xf9   : > { %3346 = vmatpush3.bf16.msra.mxu0 %v3345_v54 }
  0xfa   : > { %3347 = vmatprep.subr.bf16.mxu0 %v4035_v0  ;;  %v516_v14 = vadd.f32 %v515_v6, %v4474_v57  ;;  %v585_v17 = vadd.f32 %v584_v8, %v554_v3 }
  0xfc   : > { %v517_v19 = vadd.f32 %v516_v14, %v4480_v63  ;;  %v586_v22 = vadd.f32 %v585_v17, %v555_v7  ;;  %v4563_v7 = vld [vmem:[%s4382_s25 + $0xc8] sm:$0xff] }
  0xfd   : > { %3349 = vmatpush3.bf16.msra.mxu0 %v3348_v2  ;;  %v4557_v2 = vld [vmem:[%s4382_s25 + $0xc0] sm:$0xff] }
  0xfe   : > { %3350 = vmatprep.subr.bf16.mxu0 %v4035_v0  ;;  %v518_v23 = vadd.f32 %v517_v19, %v4487_v5  ;;  %v587_v26 = vadd.f32 %v586_v22, %v556_v16  ;;  %v568_v14 = vmul.f32 %v4557_v2, %v4557_v2  ;;  %v4569_v16 = vld [vmem:[%s4382_s25 + $0xd0] sm:$0xff]  ;;  %v569_v19 = vmul.f32 %v4563_v7, %v4563_v7  ;;  %v4575_v22 = vld [vmem:[%s4382_s25 + $0xd8] sm:$0xff] }
 0x100   : > { %v519_v0 = vadd.f32 %v518_v23, %v4493_v9  ;;  %v588_v29 = vadd.f32 %v587_v26, %v557_v20 }
 0x101   : > { %3352 = vmatpush3.bf16.msra.mxu0 %v3351_v15 }
 0x102   : > { %v520_v31 = vadd.f32 %v519_v0, %v4500_v18  ;;  %v589_v34 = vadd.f32 %v588_v29, %v558_v24  ;;  %v570_v24 = vmul.f32 %v4569_v16, %v4569_v16  ;;  %v4581_v0 = vld [vmem:[%s4382_s25 + $0xe0] sm:$0xff]  ;;  %v571_v29 = vmul.f32 %v4575_v22, %v4575_v22 }
 0x104   : > { %v521_v37 = vadd.f32 %v520_v31, %v4509_v27  ;;  %v590_v39 = vadd.f32 %v589_v34, %v559_v28 }
 0x106   : > { %v522_v42 = vadd.f32 %v521_v37, %v4515_v30  ;;  %v591_v45 = vadd.f32 %v590_v39, %v560_v33  ;;  %v4587_v33 = vld [vmem:[%s4382_s25 + $0xe8] sm:$0xff]  ;;  %v572_v37 = vmul.f32 %v4581_v0, %v4581_v0  ;;  %v4593_v39 = vld [vmem:[%s4382_s25 + $0xf0] sm:$0xff] }
 0x108   : > { %v523_v47 = vadd.f32 %v522_v42, %v4521_v35  ;;  %v592_v49 = vadd.f32 %v591_v45, %v561_v38 }
 0x10a   : > { %v524_v51 = vadd.f32 %v523_v47, %v4527_v40  ;;  %v593_v54 = vadd.f32 %v592_v49, %v562_v43  ;;  %v573_v43 = vmul.f32 %v4587_v33, %v4587_v33  ;;  %v4599_v47 = vld [vmem:[%s4382_s25 + $0xf8] sm:$0xff]  ;;  %v574_v49 = vmul.f32 %v4593_v39, %v4593_v39  ;;  %s4039_s25 = smov [#allocation16]  }
 0x10b   : > { %s3929_s19 = sshll.u32 %s4039_s25, 4  ;;  %s3930_s19 = int_to_ptr.vmem [resolvable:$false] %s3929_s19 }
 0x10c   : > { %v525_v56 = vadd.f32 %v524_v51, %v4533_v46  ;;  %v594_v59 = vadd.f32 %v593_v54, %v563_v48  ;;  %v575_v54 = vmul.f32 %v4599_v47, %v4599_v47  ;;  %s3931_s2 = scalar_lea.vmem %s3930_s19, 8192  ;;  %p3932_p3 = scmp.lt.s32.totalorder %s5587_s13, %s3930_s19 }
 0x10d   : > { %p3933_p7 = scmp.lt.s32.totalorder %s3931_s2, %s3925_s26 }
 0x10e   : > { %v526_v61 = vadd.f32 %v525_v56, %v4539_v50  ;;  %v595_v1 = vadd.f32 %v594_v59, %v564_v53 }
 0x10f   : > { %p3934_p12 = por %p3933_p7, %p3932_p3 }
 0x110   : > { %v527_v3 = vadd.f32 %v526_v61, %v4545_v55  ;;  %v596_v6 = vadd.f32 %v595_v1, %v565_v58 }
 0x111   : > { %p3935_p8 = pnand %p3934_p12, %p3928_p10 }
 0x112   : > { %v528_v8 = vadd.f32 %v527_v3, %v4551_v60  ;;  %v597_v15 = vadd.f32 %v596_v6, %v566_v62 }
 0x114   : > { %v529_v17 = vadd.f32 %v528_v8, %v4557_v2  ;;  %v598_v20 = vadd.f32 %v597_v15, %v567_v4 }
 0x116   : > { %v530_v23 = vadd.f32 %v529_v17, %v4563_v7  ;;  %v599_v26 = vadd.f32 %v598_v20, %v568_v14 }
 0x118   : > { %v531_v28 = vadd.f32 %v530_v23, %v4569_v16  ;;  %v600_v31 = vadd.f32 %v599_v26, %v569_v19 }
 0x11a   : > { %v532_v34 = vadd.f32 %v531_v28, %v4575_v22  ;;  %v601_v38 = vadd.f32 %v600_v31, %v570_v24  ;;  %v3490_v28 = vld [vmem:[#allocation13 + $0x14] ss:$8 sps:$4 sm:$0xff]   ;;  %v3493_v31 = vld [vmem:[#allocation13 + $0x24] ss:$8 sps:$4 sm:$0xff]  }
 0x11b   : > { %943 = vmatprep.subr.bf16.mxu1 %v3490_v28 }
 0x11c   : > { %v533_v42 = vadd.f32 %v532_v34, %v4581_v0  ;;  %v602_v45 = vadd.f32 %v601_v38, %v571_v29  ;;  %v3492_v29 = vld [vmem:[#allocation13 + $0x10] ss:$8 sps:$4 sm:$0xff]   ;;  %v3495_v34 = vld [vmem:[#allocation13 + $0x20] ss:$8 sps:$4 sm:$0xff]  }
 0x11d   : > { %944 = vmatpush1.bf16.msra.mxu1 %v3492_v29  ;;  %v3498_v38 = vld [vmem:[#allocation11] sm:$0xff]  }
 0x11e   : > { %v534_v48 = vadd.f32 %v533_v42, %v4587_v33  ;;  %v603_v51 = vadd.f32 %v602_v45, %v572_v37  ;;  %945 = vmatprep.subr.bf16.mxu1 %v3493_v31  ;;  %v3496_v37 = vld [vmem:[#allocation13 + $0x34] ss:$8 sps:$4 sm:$0xff]   ;;  %v3499_v42 = vld [vmem:[#allocation13 + $0x30] ss:$8 sps:$4 sm:$0xff]   ;;  %3233 = vmatprep.subr.bf16.mxu0 %v3498_v38  ;;  %v3502_v45 = vld [vmem:[#allocation11 + $0x8] sm:$0xff]  }
 0x120   : > { %v535_v53 = vadd.f32 %v534_v48, %v4593_v39  ;;  %v604_v56 = vadd.f32 %v603_v51, %v573_v43  ;;  %v3500_v43 = vld [vmem:[#allocation13 + $0x44] ss:$8 sps:$4 sm:$0xff]   ;;  %v3503_v48 = vld [vmem:[#allocation13 + $0x40] ss:$8 sps:$4 sm:$0xff]   ;;  %v3506_v51 = vld [vmem:[#allocation11 + $0x10] sm:$0xff]  }
 0x121   : > { %946 = vmatpush1.bf16.msra.mxu1 %v3495_v34 }
 0x122   : > { %v536_v58 = vadd.f32 %v535_v53, %v4599_v47  ;;  %v605_v59 = vadd.f32 %v604_v56, %v574_v49  ;;  %947 = vmatprep.subr.bf16.mxu1 %v3496_v37  ;;  %v3504_v49 = vld [vmem:[#allocation13 + $0x54] ss:$8 sps:$4 sm:$0xff]   ;;  %v3507_v53 = vld [vmem:[#allocation13 + $0x50] ss:$8 sps:$4 sm:$0xff]  }
 0x123   : > { %v3510_v56 = vld [vmem:[#allocation11 + $0x18] sm:$0xff]  }
 0x124   : > { %v537_v61 = vrot.slane %v536_v58, 4  ;;  %v606_v62 = vadd.f32 %v605_v59, %v575_v54  ;;  %v3508_v54 = vld [vmem:[#allocation13 + $0x64] ss:$8 sps:$4 sm:$0xff]   ;;  %v3512_v59 = vld [vmem:[#allocation13 + $0x74] ss:$8 sps:$4 sm:$0xff]  }
 0x125   : > { %948 = vmatpush1.bf16.msra.mxu1 %v3499_v42 }
 0x126   : > { %v538_v1 = vadd.f32 %v537_v61, %v536_v58  ;;  %v607_v3 = vrot.slane %v606_v62, 4  ;;  %949 = vmatprep.subr.bf16.mxu1 %v3500_v43  ;;  %v3511_v58 = vld [vmem:[#allocation13 + $0x60] ss:$8 sps:$4 sm:$0xff]  }
 0x127   : > { %v3514_v61 = vld [vmem:[#allocation11 + $0x20] sm:$0xff]  }
 0x128   : > { %v539_v4 = vrot.slane %v538_v1, 2  ;;  %v608_v6 = vadd.f32 %v607_v3, %v606_v62  ;;  %v3515_v62 = vld [vmem:[#allocation13 + $0x70] ss:$8 sps:$4 sm:$0xff]   ;;  %v4038_v3 = vmov 0  }
 0x129   : > { %950 = vmatpush1.bf16.msra.mxu1 %v3503_v48  ;;  %973 = vmatprep.mubr.bf16.mxu1 %v4038_v3 }
 0x12a   : > { %v540_v8 = vadd.f32 %v539_v4, %v538_v1  ;;  %v609_v14 = vrot.slane %v608_v6, 2  ;;  %951 = vmatprep.subr.bf16.mxu1 %v3504_v49  ;;  %v3516_v1 = vld [vmem:[#allocation11 + $0x28] sm:$0xff]   ;;  %v3517_v4 = vld [vmem:[#allocation11 + $0x30] sm:$0xff]  }
 0x12c   : > { %v541_v15 = vrot.slane %v540_v8, 1  ;;  %v610_v17 = vadd.f32 %v609_v14, %v608_v6  ;;  %v3518_v6 = vld [vmem:[#allocation11 + $0x38] sm:$0xff]  }
 0x12d   : > { %952 = vmatpush1.bf16.msra.mxu1 %v3507_v53 }
 0x12e   : > { %v542_v19 = vadd.f32 %v541_v15, %v540_v8  ;;  %v611_v20 = vrot.slane %v610_v17, 1  ;;  %953 = vmatprep.subr.bf16.mxu1 %v3508_v54 }
 0x130   : > { %v612_v23 = vadd.f32 %v611_v20, %v610_v17  ;;  %v745_v20 = vlaneseq }
 0x131   : > { %954 = vmatpush1.bf16.msra.mxu1 %v3511_v58  ;;  %v1199_v58 = vld [vmem:[%s4390_s27 + $0x8] sm:$0xff] }
 0x132   : > { %v615_v24 = vsel %vm614_vm1, %v542_v19, %v612_v23  ;;  %955 = vmatprep.subr.bf16.mxu1 %v3512_v59 }
 0x133   : > { %v616_v26 = vmul.f32 0.00390625, %v615_v24 }
 0x135   : > { %3231 = vmatmul.mubr.f32.vlgmr.msra.gmra.mrb[0].mxu0 %v616_v26  ;;  %956 = vmatpush1.bf16.msra.mxu1 %v3515_v62  ;;  %v746_v26 = vshrl.u32 %v745_v20, 7  ;;  %v1201_v62 = vld [vmem:[%s4390_s27 + $0x18] sm:$0xff] }
 0x136   : > { %3234 = vmatpush3.bf16.msra.mxu0 %v3498_v38 }
 0x137   : > { %3235 = vmatprep.subr.bf16.mxu0 %v3502_v45  ;;  %v4610_v28 = vsub.s32 0, %v746_v26  ;;  %v4615_v31 = vsub.s32 1, %v746_v26 }
 0x13a   : > { %3236 = vmatpush3.bf16.msra.mxu0 %v3502_v45 }
 0x13b   : > { %3237 = vmatprep.subr.bf16.mxu0 %v3506_v51 }
 0x13e   : > { %3238 = vmatpush3.bf16.msra.mxu0 %v3506_v51 }
 0x13f   : > { %3239 = vmatprep.subr.bf16.mxu0 %v3510_v56 }
 0x142   : > { %3240 = vmatpush3.bf16.msra.mxu0 %v3510_v56 }
 0x143   : > { %3241 = vmatprep.subr.bf16.mxu0 %v3514_v61 }
 0x146   : > { %3242 = vmatpush3.bf16.msra.mxu0 %v3514_v61  ;;  %v1200_v61 = vld [vmem:[%s4390_s27 + $0x10] sm:$0xff] }
 0x147   : > { %3243 = vmatprep.subr.bf16.mxu0 %v3516_v1 }
 0x14a   : > { %3244 = vmatpush3.bf16.msra.mxu0 %v3516_v1 }
 0x14b   : > { %3245 = vmatprep.subr.bf16.mxu0 %v3517_v4 }
 0x14e   : > { %3246 = vmatpush3.bf16.msra.mxu0 %v3517_v4 }
 0x14f   : > { %3247 = vmatprep.subr.bf16.mxu0 %v3518_v6 }
 0x152   : > { %3248 = vmatpush3.bf16.msra.mxu0 %v3518_v6 }
 0x208   : > { %v699_v8 = vpop.f32.mrb[0].mxu0 }
 0x209   : > { %v703_v14 = vmul.f32 %v699_v8, %v699_v8  ;;  %v3232_v15 = vpop.f32.mrb[1].mxu0  ;;  %v4613_v29 = vrot.slane %v699_v8, %v4610_v28 }
 0x20a   : > { %v1203_v15 = vld [vmem:[%s4390_s27 + $0x28] sm:$0xff] }
 0x20b   : > { %v705_v17 = vrot.slane %v703_v14, 7  ;;  %v749_v42 = vsub.f32 %v4411_v10, %v4613_v29  ;;  %v750_v43 = vsub.f32 %v4414_v11, %v4613_v29  ;;  %v751_v51 = vsub.f32 %v4417_v12, %v4613_v29 }
 0x20c   : > { %v752_v53 = vsub.f32 %v4420_v13, %v4613_v29  ;;  %v765_v10 = vsub.f32 %v4509_v27, %v4613_v29  ;;  %v766_v11 = vsub.f32 %v4515_v30, %v4613_v29  ;;  %v767_v54 = vsub.f32 %v4521_v35, %v4613_v29  ;;  %v1198_v35 = vld [vmem:[%s4390_s27] sm:$0xff] }
 0x20d   : > { %v707_v19 = vsub.f32 %v699_v8, %v705_v17  ;;  %v768_v56 = vsub.f32 %v4527_v40, %v4613_v29  ;;  %v769_v12 = vsub.f32 %v4533_v46, %v4613_v29  ;;  %v770_v13 = vsub.f32 %v4539_v50, %v4613_v29 }
 0x20e   : > { %v771_v27 = vsub.f32 %v4545_v55, %v4613_v29  ;;  %v772_v46 = vsub.f32 %v4551_v60, %v4613_v29  ;;  %v1202_v60 = vld [vmem:[%s4390_s27 + $0x20] sm:$0xff] }
 0x20f   : > { %v708_v23 = vmax.f32 %v707_v19, 0.0 }
 0x211   : > { %v709_v24 = vadd.f32 1e-06, %v708_v23 }
 0x213   : > { %3527 = vrsqrt.f32 %v709_v24 }
 0x21d   : > { %v3528_v34 = vpop.eup %3527 }
 0x21e   : > { %v711_v37 = vsel %vm614_vm1, %v699_v8, %v3528_v34  ;;  %v4619_v38 = vrot.slane %v3528_v34, %v4615_v31 }
 0x21f   : > { %712 = vst [vmem:[#allocation4] sm:$0x3] %v711_v37 }
 0x220   : > { %v785_v45 = vmul.f32 %v4619_v38, %v749_v42  ;;  %v786_v48 = vmul.f32 %v4619_v38, %v750_v43  ;;  %v787_v30 = vmul.f32 %v4619_v38, %v751_v51  ;;  %v4650_v59 = vmul.f32 %v4619_v38, %v765_v10 }
 0x221   : > { %v4653_v40 = vmul.f32 %v4619_v38, %v766_v11  ;;  %v788_v55 = vmul.f32 %v4619_v38, %v752_v53  ;;  %v4661_v1 = vmul.f32 %v4619_v38, %v767_v54  ;;  %v4664_v4 = vmul.f32 %v4619_v38, %v768_v56  ;;  %v1204_v11 = vld [vmem:[%s4390_s27 + $0x30] sm:$0xff]  ;;  %v1205_v54 = vld [vmem:[%s4390_s27 + $0x38] sm:$0xff] }
 0x222   : > { %v817_v49 = vpack.c.bf16 %v786_v48, %v785_v45  ;;  %v4667_v6 = vmul.f32 %v4619_v38, %v769_v12  ;;  %v4682_v20 = vmul.f32 %v4619_v38, %v770_v13  ;;  %v4685_v23 = vmul.f32 %v4619_v38, %v771_v27 }
 0x223   : > { %v825_v17 = vpack.c.bf16 %v4653_v40, %v4650_v59  ;;  %v826_v19 = vpack.c.bf16 %v4664_v4, %v4661_v1  ;;  %v4688_v24 = vmul.f32 %v4619_v38, %v772_v46  ;;  %v818_v43 = vpack.c.bf16 %v788_v55, %v787_v30  ;;  %v1206_v30 = vld [vmem:[%s4390_s27 + $0x40] sm:$0xff]  ;;  %v849_v59 = vld [vmem:[%s5646_s6] sm:$0x3] }
 0x224   : > { %974 = vmatmul.mubr.bf16.vlgmr.msra.gmra.mrb[0].mxu1 %v817_v49  ;;  %v753_v13 = vsub.f32 %v4432_v21, %v4613_v29  ;;  %v754_v27 = vsub.f32 %v4438_v25, %v4613_v29  ;;  %v4910_v40 = vrot.slane %v849_v59, %v4610_v28  ;;  %v4913_v4 = vrot.slane %v849_v59, %v4615_v31 }
 0x225   : > { %983 = vmatprep.mubr.bf16.mxu1 %v4038_v3 }
 0x226   : > { %v1230_v50 = vld [vmem:[#allocation4] sm:$0x3]  ;;  %v790_v55 = vmul.f32 %v4619_v38, %v754_v27 }
 0x227   : > { %v4670_v8 = vrot.slane %v1230_v50, %v4610_v28  ;;  %v4673_v14 = vrot.slane %v1230_v50, %v4615_v31  ;;  %v789_v50 = vmul.f32 %v4619_v38, %v753_v13 }
 0x229   : > { %v1235_v26 = vsub.f32 %v1198_v35, %v4670_v8  ;;  %v1236_v34 = vsub.f32 %v1199_v58, %v4670_v8  ;;  %v1237_v37 = vsub.f32 %v1200_v61, %v4670_v8  ;;  %v1238_v42 = vsub.f32 %v1201_v62, %v4670_v8  ;;  %v1207_v35 = vld [vmem:[%s4390_s27 + $0x48] sm:$0xff] }
 0x22a   : > { %v1239_v45 = vsub.f32 %v1202_v60, %v4670_v8  ;;  %v1240_v48 = vsub.f32 %v1203_v15, %v4670_v8  ;;  %v1241_v61 = vsub.f32 %v1204_v11, %v4670_v8  ;;  %v1242_v62 = vsub.f32 %v1205_v54, %v4670_v8 }
 0x22b   : > { %v1271_v49 = vmul.f32 %v4673_v14, %v1235_v26  ;;  %v1272_v51 = vmul.f32 %v4673_v14, %v1236_v34  ;;  %v1273_v53 = vmul.f32 %v4673_v14, %v1237_v37  ;;  %v1274_v10 = vmul.f32 %v4673_v14, %v1238_v42  ;;  %v1208_v37 = vld [vmem:[%s4390_s27 + $0x50] sm:$0xff]  ;;  %v1209_v42 = vld [vmem:[%s4390_s27 + $0x58] sm:$0xff] }
 0x22c   : > { %984 = vmatmul.mubr.bf16.gmra.mrb[4].mxu1 %v818_v43  ;;  %v1275_v56 = vmul.f32 %v4673_v14, %v1239_v45  ;;  %v1276_v12 = vmul.f32 %v4673_v14, %v1240_v48  ;;  %v1243_v25 = vsub.f32 %v1206_v30, %v4670_v8  ;;  %v1244_v60 = vsub.f32 %v1207_v35, %v4670_v8 }
 0x22d   : > { %v1303_v58 = vpack.c.bf16 %v1272_v51, %v1271_v49  ;;  %v1304_v46 = vpack.c.bf16 %v1274_v10, %v1273_v53  ;;  %993 = vmatprep.mubr.bf16.mxu1 %v4038_v3  ;;  %v819_v15 = vpack.c.bf16 %v790_v55, %v789_v50  ;;  %v1277_v26 = vmul.f32 %v4673_v14, %v1241_v61  ;;  %v1210_v51 = vld [vmem:[%s4390_s27 + $0x60] sm:$0xff]  ;;  %v1211_v53 = vld [vmem:[%s4390_s27 + $0x68] sm:$0xff]  ;;  %v1213_v61 = vld [vmem:[%s4390_s27 + $0x78] sm:$0xff] }
 0x22e   : > { %v1305_v21 = vpack.c.bf16 %v1276_v12, %v1275_v56  ;;  %v1278_v34 = vmul.f32 %v4673_v14, %v1242_v62  ;;  %v1279_v43 = vmul.f32 %v4673_v14, %v1243_v25  ;;  %v1280_v45 = vmul.f32 %v4673_v14, %v1244_v60  ;;  %v1214_v62 = vld [vmem:[%s4390_s27 + $0x80] sm:$0xff] }
 0x22f   : > { %3249 = vmatprep.mubr.bf16.mxu0 %v1303_v58  ;;  %v755_v48 = vsub.f32 %v4445_v32, %v4613_v29  ;;  %v756_v49 = vsub.f32 %v4451_v36, %v4613_v29  ;;  %v1245_v10 = vsub.f32 %v1208_v37, %v4670_v8  ;;  %v1246_v11 = vsub.f32 %v1209_v42, %v4670_v8 }
 0x230   : > { %3250 = vmatmul.mubr.bf16.vlgmr.msra.gmra.mrb[4].mxu0 %v1304_v46  ;;  %v1306_v54 = vpack.c.bf16 %v1278_v34, %v1277_v26  ;;  %v757_v32 = vsub.f32 %v4455_v41, %v4613_v29  ;;  %v1307_v36 = vpack.c.bf16 %v1280_v45, %v1279_v43  ;;  %v1247_v13 = vsub.f32 %v1210_v51, %v4670_v8  ;;  %v1215_v34 = vld [vmem:[%s4390_s27 + $0x88] sm:$0xff] }
 0x231   : > { %3253 = vmatprep.mubr.bf16.mxu0 %v1305_v21  ;;  %v791_v56 = vmul.f32 %v4619_v38, %v755_v48  ;;  %v792_v12 = vmul.f32 %v4619_v38, %v756_v49  ;;  %v1248_v27 = vsub.f32 %v1211_v53, %v4670_v8  ;;  %v758_v30 = vsub.f32 %v4461_v44, %v4613_v29  ;;  %v1212_v44 = vld [vmem:[%s4390_s27 + $0x70] sm:$0xff] }
 0x232   : > { %v773_v35 = vsub.f32 %v4557_v2, %v4613_v29  ;;  %v774_v58 = vsub.f32 %v4563_v7, %v4613_v29  ;;  %v775_v46 = vsub.f32 %v4569_v16, %v4613_v29  ;;  %v776_v41 = vsub.f32 %v4575_v22, %v4613_v29 }
 0x233   : > { %v1281_v50 = vmul.f32 %v4673_v14, %v1245_v10  ;;  %v1282_v55 = vmul.f32 %v4673_v14, %v1246_v11  ;;  %v777_v2 = vsub.f32 %v4581_v0, %v4613_v29  ;;  %v778_v7 = vsub.f32 %v4587_v33, %v4613_v29 }
 0x234   : > { %994 = vmatmul.mubr.bf16.gmra.mrb[8].mxu1 %v819_v15  ;;  %v820_v21 = vpack.c.bf16 %v792_v12, %v791_v56  ;;  %v793_v16 = vmul.f32 %v4619_v38, %v757_v32  ;;  %v779_v22 = vsub.f32 %v4593_v39, %v4613_v29  ;;  %v780_v25 = vsub.f32 %v4599_v47, %v4613_v29 }
 0x235   : > { %1003 = vmatprep.mubr.bf16.mxu1 %v4038_v3  ;;  %v1283_v60 = vmul.f32 %v4673_v14, %v1247_v13  ;;  %v1284_v15 = vmul.f32 %v4673_v14, %v1248_v27  ;;  %v794_v26 = vmul.f32 %v4619_v38, %v758_v30  ;;  %v827_v0 = vpack.c.bf16 %v4682_v20, %v4667_v6 }
 0x236   : > { %v1249_v33 = vsub.f32 %v1212_v44, %v4670_v8  ;;  %v1250_v37 = vsub.f32 %v1213_v61, %v4670_v8  ;;  %v1251_v39 = vsub.f32 %v1214_v62, %v4670_v8  ;;  %v828_v47 = vpack.c.bf16 %v4688_v24, %v4685_v23  ;;  %v1218_v61 = vld [vmem:[%s4390_s27 + $0xa0] sm:$0xff]  ;;  %v1219_v62 = vld [vmem:[%s4390_s27 + $0xa8] sm:$0xff] }
 0x237   : > { %v1308_v42 = vpack.c.bf16 %v1282_v55, %v1281_v50  ;;  %v4775_v43 = vmul.f32 %v4619_v38, %v773_v35  ;;  %v4778_v45 = vmul.f32 %v4619_v38, %v774_v58  ;;  %v4781_v48 = vmul.f32 %v4619_v38, %v775_v46  ;;  %v1216_v50 = vld [vmem:[%s4390_s27 + $0x90] sm:$0xff]  ;;  %v1217_v55 = vld [vmem:[%s4390_s27 + $0x98] sm:$0xff] }
 0x238   : > { %3254 = vmatmul.mubr.bf16.gmra.mrb[8].mxu0 %v1306_v54  ;;  %v1252_v49 = vsub.f32 %v1215_v34, %v4670_v8  ;;  %v4785_v51 = vmul.f32 %v4619_v38, %v776_v41  ;;  %v4788_v53 = vmul.f32 %v4619_v38, %v777_v2  ;;  %v4791_v10 = vmul.f32 %v4619_v38, %v778_v7 }
 0x239   : > { %3257 = vmatprep.mubr.bf16.mxu0 %v1307_v36  ;;  %v1309_v11 = vpack.c.bf16 %v1284_v15, %v1283_v60  ;;  %v829_v54 = vpack.c.bf16 %v4778_v45, %v4775_v43  ;;  %v4796_v56 = vmul.f32 %v4619_v38, %v779_v22  ;;  %v4799_v12 = vmul.f32 %v4619_v38, %v780_v25  ;;  %v4937_v43 = vld [vmem:[%s5644_s4] ss:$0 sm:$0xff] }
 0x23a   : > { %v830_v32 = vpack.c.bf16 %v4785_v51, %v4781_v48  ;;  %v831_v36 = vpack.c.bf16 %v4791_v10, %v4788_v53  ;;  %v821_v27 = vpack.c.bf16 %v794_v26, %v793_v16  ;;  %v1285_v30 = vmul.f32 %v4673_v14, %v1249_v33 }
 0x23b   : > { %v832_v13 = vpack.c.bf16 %v4799_v12, %v4796_v56  ;;  %v1286_v35 = vmul.f32 %v4673_v14, %v1250_v37  ;;  %v1287_v58 = vmul.f32 %v4673_v14, %v1251_v39  ;;  %v1288_v46 = vmul.f32 %v4673_v14, %v1252_v49  ;;  %v1220_v39 = vld [vmem:[%s4390_s27 + $0xb0] sm:$0xff] }
 0x23c   : > { %1004 = vmatmul.mubr.bf16.gmra.mrb[12].mxu1 %v820_v21  ;;  %v759_v41 = vsub.f32 %v4467_v52, %v4613_v29  ;;  %v760_v44 = vsub.f32 %v4474_v57, %v4613_v29  ;;  %v1253_v16 = vsub.f32 %v1216_v50, %v4670_v8  ;;  %v1254_v52 = vsub.f32 %v1217_v55, %v4670_v8 }
 0x23d   : > { %1013 = vmatprep.mubr.bf16.mxu1 %v4038_v3  ;;  %v1310_v7 = vpack.c.bf16 %v1286_v35, %v1285_v30  ;;  %v1311_v22 = vpack.c.bf16 %v1288_v46, %v1287_v58  ;;  %v1255_v57 = vsub.f32 %v1218_v61, %v4670_v8  ;;  %v1256_v25 = vsub.f32 %v1219_v62, %v4670_v8 }
 0x23e   : > { %v795_v2 = vmul.f32 %v4619_v38, %v759_v41  ;;  %v796_v21 = vmul.f32 %v4619_v38, %v760_v44  ;;  %v1289_v15 = vmul.f32 %v4673_v14, %v1253_v16  ;;  %v1290_v26 = vmul.f32 %v4673_v14, %v1254_v52  ;;  %v1225_v16 = vld [vmem:[%s4390_s27 + $0xd8] sm:$0xff] }
 0x23f   : > { %v1291_v34 = vmul.f32 %v4673_v14, %v1255_v57  ;;  %v1292_v33 = vmul.f32 %v4673_v14, %v1256_v25  ;;  %v761_v37 = vsub.f32 %v4480_v63, %v4613_v29  ;;  %v762_v49 = vsub.f32 %v4487_v5, %v4613_v29  ;;  %v1227_v57 = vld [vmem:[%s4390_s27 + $0xe8] sm:$0xff] }
 0x240   : > { %3258 = vmatmul.mubr.bf16.gmra.mrb[12].mxu0 %v1308_v42  ;;  %v822_v60 = vpack.c.bf16 %v796_v21, %v795_v2  ;;  %v1221_v42 = vld [vmem:[%s4390_s27 + $0xb8] sm:$0xff]  ;;  %v1312_v35 = vpack.c.bf16 %v1290_v26, %v1289_v15  ;;  %v1257_v46 = vsub.f32 %v1220_v39, %v4670_v8  ;;  %v1224_v21 = vld [vmem:[%s4390_s27 + $0xd0] sm:$0xff]  ;;  %v764_v52 = vsub.f32 %v4500_v18, %v4613_v29 }
 0x241   : > { %3261 = vmatprep.mubr.bf16.mxu0 %v1309_v11  ;;  %v1222_v11 = vld [vmem:[%s4390_s27 + $0xc0] sm:$0xff]  ;;  %v797_v30 = vmul.f32 %v4619_v38, %v761_v37  ;;  %v798_v58 = vmul.f32 %v4619_v38, %v762_v49  ;;  %v1258_v63 = vsub.f32 %v1221_v42, %v4670_v8  ;;  %v1313_v41 = vpack.c.bf16 %v1292_v33, %v1291_v34  ;;  %v1228_v49 = vld [vmem:[%s4390_s27 + $0xf0] sm:$0xff] }
 0x242   : > { %v1259_v5 = vsub.f32 %v1222_v11, %v4670_v8  ;;  %v1293_v44 = vmul.f32 %v4673_v14, %v1257_v46  ;;  %v800_v15 = vmul.f32 %v4619_v38, %v764_v52  ;;  %v1261_v26 = vsub.f32 %v1224_v21, %v4670_v8  ;;  %v1229_v11 = vld [vmem:[%s4390_s27 + $0xf8] sm:$0xff] }
 0x243   : > { %v823_v55 = vpack.c.bf16 %v798_v58, %v797_v30  ;;  %v1294_v61 = vmul.f32 %v4673_v14, %v1258_v63  ;;  %v1264_v18 = vsub.f32 %v1227_v57, %v4670_v8  ;;  %v1265_v30 = vsub.f32 %v1228_v49, %v4670_v8 }
 0x244   : > { %1014 = vmatmul.mubr.bf16.gmra.mrb[16].mxu1 %v821_v27  ;;  %v1223_v27 = vld [vmem:[%s4390_s27 + $0xc8] sm:$0xff]  ;;  %v1295_v62 = vmul.f32 %v4673_v14, %v1259_v5  ;;  %v1297_v37 = vmul.f32 %v4673_v14, %v1261_v26 }
 0x245   : > { %1023 = vmatprep.mubr.bf16.mxu1 %v4038_v3  ;;  %v1260_v50 = vsub.f32 %v1223_v27, %v4670_v8  ;;  %v1301_v46 = vmul.f32 %v4673_v14, %v1265_v30 }
 0x247   : > { %v1296_v2 = vmul.f32 %v4673_v14, %v1260_v50 }
 0x248   : > { %3262 = vmatmul.mubr.bf16.gmra.mrb[16].mxu0 %v1310_v7  ;;  %v763_v7 = vsub.f32 %v4493_v9, %v4613_v29  ;;  %v1262_v9 = vsub.f32 %v1225_v16, %v4670_v8 }
 0x249   : > { %3265 = vmatprep.mubr.bf16.mxu0 %v1311_v22  ;;  %v1226_v22 = vld [vmem:[%s4390_s27 + $0xe0] sm:$0xff]  ;;  %v1315_v34 = vpack.c.bf16 %v1296_v2, %v1295_v62 }
 0x24a   : > { %v799_v25 = vmul.f32 %v4619_v38, %v763_v7  ;;  %v1263_v33 = vsub.f32 %v1226_v22, %v4670_v8  ;;  %v1298_v39 = vmul.f32 %v4673_v14, %v1262_v9  ;;  %v1300_v38 = vmul.f32 %v4673_v14, %v1264_v18 }
 0x24c   : > { %1024 = vmatmul.mubr.bf16.gmra.mrb[20].mxu1 %v822_v60  ;;  %v1314_v60 = vpack.c.bf16 %v1294_v61, %v1293_v44  ;;  %v824_v29 = vpack.c.bf16 %v800_v15, %v799_v25  ;;  %v1299_v42 = vmul.f32 %v4673_v14, %v1263_v33  ;;  %v1316_v27 = vpack.c.bf16 %v1298_v39, %v1297_v37 }
 0x24d   : > { %1033 = vmatprep.mubr.bf16.mxu1 %v4038_v3 }
 0x24e   : > { %v1317_v58 = vpack.c.bf16 %v1300_v38, %v1299_v42 }
 0x250   : > { %3266 = vmatmul.mubr.bf16.gmra.mrb[20].mxu0 %v1312_v35  ;;  %v1266_v35 = vsub.f32 %v1229_v11, %v4670_v8 }
 0x251   : > { %3269 = vmatprep.mubr.bf16.mxu0 %v1313_v41 }
 0x252   : > { %v1302_v63 = vmul.f32 %v4673_v14, %v1266_v35 }
 0x254   : > { %1034 = vmatmul.mubr.bf16.gmra.mrb[24].mxu1 %v823_v55  ;;  %v1318_v41 = vpack.c.bf16 %v1302_v63, %v1301_v46 }
 0x255   : > { %1043 = vmatprep.mubr.bf16.mxu1 %v4038_v3 }
 0x258   : > { %3270 = vmatmul.mubr.bf16.gmra.mrb[24].mxu0 %v1314_v60 }
 0x259   : > { %3273 = vmatprep.mubr.bf16.mxu0 %v1315_v34 }
 0x25c   : > { %1044 = vmatmul.mubr.bf16.gmra.mrb[28].mxu1 %v824_v29 }
 0x25d   : > { %1053 = vmatprep.mubr.bf16.mxu1 %v4038_v3 }
 0x260   : > { %3274 = vmatmul.mubr.bf16.gmra.mrb[28].mxu0 %v1316_v27 }
 0x261   : > { %3277 = vmatprep.mubr.bf16.mxu0 %v1317_v58 }
 0x264   : > { %1054 = vmatmul.mubr.bf16.gmra.mrb[32].mxu1 %v825_v17 }
 0x265   : > { %1063 = vmatprep.mubr.bf16.mxu1 %v4038_v3 }
 0x268   : > { %3278 = vmatmul.mubr.bf16.gmra.mrb[32].mxu0 %v1318_v41 }
 0x26c   : > { %1064 = vmatmul.mubr.bf16.gmra.mrb[36].mxu1 %v826_v19 }
 0x26d   : > { %1073 = vmatprep.mubr.bf16.mxu1 %v4038_v3 }
 0x274   : > { %1074 = vmatmul.mubr.bf16.gmra.mrb[40].mxu1 %v827_v0 }
 0x275   : > { %1083 = vmatprep.mubr.bf16.mxu1 %v4038_v3 }
 0x27c   : > { %1084 = vmatmul.mubr.bf16.gmra.mrb[44].mxu1 %v828_v47 }
 0x27d   : > { %1093 = vmatprep.mubr.bf16.mxu1 %v4038_v3 }
 0x284   : > { %1094 = vmatmul.mubr.bf16.gmra.mrb[48].mxu1 %v829_v54 }
 0x285   : > { %1103 = vmatprep.mubr.bf16.mxu1 %v4038_v3 }
 0x28c   : > { %1104 = vmatmul.mubr.bf16.gmra.mrb[52].mxu1 %v830_v32 }
 0x28d   : > { %1113 = vmatprep.mubr.bf16.mxu1 %v4038_v3 }
 0x294   : > { %1114 = vmatmul.mubr.bf16.gmra.mrb[56].mxu1 %v831_v36 }
 0x295   : > { %1123 = vmatprep.mubr.bf16.mxu1 %v4038_v3 }
 0x29c   : > { %1124 = vmatmul.mubr.bf16.gmra.mrb[60].mxu1 %v832_v13 }
 0x2f7   : > { %v975_v1 = vpop.f32.mrb[0].mxu1 }
 0x2f8   : > { %v4916_v6 = vadd.f32 %v975_v1, %v4910_v40  ;;  %v977_v8 = vpop.f32.mrb[1].mxu1 }
 0x2f9   : > { %v979_v3 = vpop.f32.mrb[2].mxu1  ;;  %v4922_v19 = vadd.f32 %v977_v8, %v4913_v4 }
 0x2fa   : > { %v4919_v14 = vadd.f32 %v979_v3, %v4910_v40  ;;  %v981_v17 = vpop.f32.mrb[3].mxu1 }
 0x2fb   : > { %v4925_v20 = vadd.f32 %v981_v17, %v4913_v4 }
 0x2ff   : > { %v985_v23 = vpop.f32.mrb[4].mxu1 }
 0x300   : > { %v4932_v24 = vadd.f32 %v985_v23, %v4910_v40  ;;  %v987_v0 = vpop.f32.mrb[5].mxu1 }
 0x301   : > { %v989_v47 = vpop.f32.mrb[6].mxu1  ;;  %v4943_v51 = vadd.f32 %v987_v0, %v4913_v4 }
 0x302   : > { %v4940_v45 = vadd.f32 %v989_v47, %v4910_v40  ;;  %v991_v48 = vpop.f32.mrb[7].mxu1 }
 0x303   : > { %v4946_v53 = vadd.f32 %v991_v48, %v4913_v4  ;;  %v3251_v10 = vpop.f32.mrb[4].mxu0 }
 0x304   : > { %v1433_v56 = vadd.f32 %v3251_v10, %v4937_v43  ;;  %v1424_v12 = vpop.f32.mrb[5].mxu0 }
 0x305   : > { %v3252_v36 = vpop.f32.mrb[6].mxu0  ;;  %v1425_v50 = vadd.f32 %v4937_v43, %v1424_v12 }
 0x306   : > { %v1436_v13 = vadd.f32 %v3252_v36, %v4937_v43  ;;  %v1427_v5 = vpop.f32.mrb[7].mxu0 }
 0x307   : > { %v1428_v55 = vadd.f32 %v4937_v43, %v1427_v5  ;;  %v995_v44 = vpop.f32.mrb[8].mxu1 }
 0x308   : > { %v4956_v61 = vpack.c.bf16 %v1436_v13, %v1433_v56  ;;  %v4959_v62 = vadd.f32 %v995_v44, %v4910_v40  ;;  %v997_v2 = vpop.f32.mrb[9].mxu1 }
 0x309   : > { %v4961_v7 = vpack.c.bf16 %v1428_v55, %v1425_v50  ;;  %v999_v21 = vpop.f32.mrb[10].mxu1  ;;  %v4967_v22 = vadd.f32 %v997_v2, %v4913_v4 }
 0x30a   : > { %v4964_v16 = vadd.f32 %v999_v21, %v4910_v40  ;;  %v1001_v52 = vpop.f32.mrb[11].mxu1 }
 0x30b   : > { %v4970_v57 = vadd.f32 %v1001_v52, %v4913_v4  ;;  %v3255_v25 = vpop.f32.mrb[8].mxu0  ;;  %3030 = vmatprep.mubr.bf16.mxu0 %v4961_v7 }
 0x30c   : > { %v1449_v15 = vadd.f32 %v3255_v25, %v4937_v43  ;;  %v1440_v26 = vpop.f32.mrb[9].mxu0 }
 0x30d   : > { %v1441_v34 = vadd.f32 %v4937_v43, %v1440_v26  ;;  %v3256_v33 = vpop.f32.mrb[10].mxu0 }
 0x30e   : > { %v1452_v18 = vadd.f32 %v3256_v33, %v4937_v43  ;;  %v1443_v29 = vpop.f32.mrb[11].mxu0 }
 0x30f   : > { %v1444_v37 = vadd.f32 %v4937_v43, %v1443_v29  ;;  %v1005_v39 = vpop.f32.mrb[12].mxu1 }
 0x310   : > { %v4981_v42 = vpack.c.bf16 %v1452_v18, %v1449_v15  ;;  %v4984_v38 = vadd.f32 %v1005_v39, %v4910_v40  ;;  %v1007_v49 = vpop.f32.mrb[13].mxu1 }
 0x311   : > { %v4986_v11 = vpack.c.bf16 %v1444_v37, %v1441_v34  ;;  %v1009_v27 = vpop.f32.mrb[14].mxu1  ;;  %v4992_v58 = vadd.f32 %v1007_v49, %v4913_v4 }
 0x312   : > { %v4989_v30 = vadd.f32 %v1009_v27, %v4910_v40  ;;  %v1011_v35 = vpop.f32.mrb[15].mxu1 }
 0x313   : > { %v4995_v46 = vadd.f32 %v1011_v35, %v4913_v4  ;;  %v3259_v63 = vpop.f32.mrb[12].mxu0 }
 0x314   : > { %v1465_v59 = vadd.f32 %v3259_v63, %v4937_v43  ;;  %v1456_v1 = vpop.f32.mrb[13].mxu0 }
 0x315   : > { %v1457_v3 = vadd.f32 %v4937_v43, %v1456_v1  ;;  %v3260_v17 = vpop.f32.mrb[14].mxu0 }
 0x316   : > { %v1468_v23 = vadd.f32 %v3260_v17, %v4937_v43  ;;  %v1459_v0 = vpop.f32.mrb[15].mxu0 }
 0x317   : > { %v1460_v47 = vadd.f32 %v4937_v43, %v1459_v0  ;;  %v1015_v48 = vpop.f32.mrb[16].mxu1 }
 0x318   : > { %v5005_v10 = vpack.c.bf16 %v1468_v23, %v1465_v59  ;;  %v5008_v56 = vadd.f32 %v1015_v48, %v4910_v40  ;;  %v1017_v12 = vpop.f32.mrb[17].mxu1 }
 0x319   : > { %v5010_v36 = vpack.c.bf16 %v1460_v47, %v1457_v3  ;;  %v1019_v13 = vpop.f32.mrb[18].mxu1  ;;  %v5016_v55 = vadd.f32 %v1017_v12, %v4913_v4 }
 0x31a   : > { %v5013_v5 = vadd.f32 %v1019_v13, %v4910_v40  ;;  %v1021_v50 = vpop.f32.mrb[19].mxu1 }
 0x31b   : > { %v5019_v44 = vadd.f32 %v1021_v50, %v4913_v4  ;;  %v3263_v2 = vpop.f32.mrb[16].mxu0 }
 0x31c   : > { %v1481_v52 = vadd.f32 %v3263_v2, %v4937_v43  ;;  %v1472_v25 = vpop.f32.mrb[17].mxu0 }
 0x31d   : > { %v1473_v26 = vadd.f32 %v4937_v43, %v1472_v25  ;;  %v3264_v34 = vpop.f32.mrb[18].mxu0 }
 0x31e   : > { %v1484_v33 = vadd.f32 %v3264_v34, %v4937_v43  ;;  %v1475_v18 = vpop.f32.mrb[19].mxu0 }
 0x31f   : > { %v1476_v29 = vadd.f32 %v4937_v43, %v1475_v18  ;;  %v1025_v37 = vpop.f32.mrb[20].mxu1 }
 0x320   : > { %v5029_v39 = vpack.c.bf16 %v1484_v33, %v1481_v52  ;;  %v5032_v49 = vadd.f32 %v1025_v37, %v4910_v40  ;;  %v1027_v27 = vpop.f32.mrb[21].mxu1 }
 0x321   : > { %v5034_v35 = vpack.c.bf16 %v1476_v29, %v1473_v26  ;;  %v1029_v63 = vpop.f32.mrb[22].mxu1  ;;  %v5040_v3 = vadd.f32 %v1027_v27, %v4913_v4 }
 0x322   : > { %v5037_v59 = vadd.f32 %v1029_v63, %v4910_v40  ;;  %v1031_v1 = vpop.f32.mrb[23].mxu1 }
 0x323   : > { %v5043_v17 = vadd.f32 %v1031_v1, %v4913_v4  ;;  %v3267_v23 = vpop.f32.mrb[20].mxu0 }
 0x324   : > { %v1497_v47 = vadd.f32 %v3267_v23, %v4937_v43  ;;  %v1488_v48 = vpop.f32.mrb[21].mxu0 }
 0x325   : > { %v1489_v13 = vadd.f32 %v4937_v43, %v1488_v48  ;;  %v3268_v50 = vpop.f32.mrb[22].mxu0 }
 0x326   : > { %v1500_v2 = vadd.f32 %v3268_v50, %v4937_v43  ;;  %v1491_v52 = vpop.f32.mrb[23].mxu0 }
 0x327   : > { %v1492_v25 = vadd.f32 %v4937_v43, %v1491_v52  ;;  %v1035_v26 = vpop.f32.mrb[24].mxu1 }
 0x328   : > { %v5053_v34 = vpack.c.bf16 %v1500_v2, %v1497_v47  ;;  %v5056_v33 = vadd.f32 %v1035_v26, %v4910_v40  ;;  %v1037_v18 = vpop.f32.mrb[25].mxu1 }
 0x329   : > { %v5058_v29 = vpack.c.bf16 %v1492_v25, %v1489_v13  ;;  %v1039_v37 = vpop.f32.mrb[26].mxu1  ;;  %v5064_v1 = vadd.f32 %v1037_v18, %v4913_v4 }
 0x32a   : > { %v5061_v27 = vadd.f32 %v1039_v37, %v4910_v40  ;;  %v1041_v63 = vpop.f32.mrb[27].mxu1 }
 0x32b   : > { %v5067_v23 = vadd.f32 %v1041_v63, %v4913_v4  ;;  %v3271_v48 = vpop.f32.mrb[24].mxu0 }
 0x32c   : > { %v1513_v50 = vadd.f32 %v3271_v48, %v4937_v43  ;;  %v1504_v2 = vpop.f32.mrb[25].mxu0 }
 0x32d   : > { %v1505_v52 = vadd.f32 %v4937_v43, %v1504_v2  ;;  %v3272_v25 = vpop.f32.mrb[26].mxu0 }
 0x32e   : > { %v1516_v26 = vadd.f32 %v3272_v25, %v4937_v43  ;;  %v1507_v18 = vpop.f32.mrb[27].mxu0 }
 0x32f   : > { %v1508_v37 = vadd.f32 %v4937_v43, %v1507_v18  ;;  %v1045_v63 = vpop.f32.mrb[28].mxu1 }
 0x330   : > { %v5077_v12 = vpack.c.bf16 %v1516_v26, %v1513_v50  ;;  %v5080_v0 = vadd.f32 %v1045_v63, %v4910_v40  ;;  %v1047_v47 = vpop.f32.mrb[29].mxu1 }
 0x331   : > { %v5082_v48 = vpack.c.bf16 %v1508_v37, %v1505_v52  ;;  %v1049_v15 = vpop.f32.mrb[30].mxu1  ;;  %v5088_v21 = vadd.f32 %v1047_v47, %v4913_v4 }
 0x332   : > { %5711 = vst [vmem:[#allocation28_spill] sm:$0xff] %v5077_v12  ;;  %v5085_v13 = vadd.f32 %v1049_v15, %v4910_v40  ;;  %v1051_v2 = vpop.f32.mrb[31].mxu1 }
 0x333   : > { %v5091_v25 = vadd.f32 %v1051_v2, %v4913_v4  ;;  %v3275_v18 = vpop.f32.mrb[28].mxu0 }
 0x334   : > { %v1529_v26 = vadd.f32 %v3275_v18, %v4937_v43  ;;  %v1520_v63 = vpop.f32.mrb[29].mxu0 }
 0x335   : > { %v1521_v15 = vadd.f32 %v4937_v43, %v1520_v63  ;;  %v3276_v37 = vpop.f32.mrb[30].mxu0 }
 0x336   : > { %v1532_v8 = vadd.f32 %v3276_v37, %v4937_v43  ;;  %v1523_v47 = vpop.f32.mrb[31].mxu0 }
 0x337   : > { %v1524_v41 = vadd.f32 %v4937_v43, %v1523_v47  ;;  %v1055_v2 = vpop.f32.mrb[32].mxu1 }
 0x338   : > { %v5101_v9 = vpack.c.bf16 %v1532_v8, %v1529_v26  ;;  %v1056_v60 = vadd.f32 %v1055_v2, %v4910_v40  ;;  %v1057_v50 = vpop.f32.mrb[33].mxu1 }
 0x339   : > { %v5104_v32 = vpack.c.bf16 %v1524_v41, %v1521_v15  ;;  %v1059_v18 = vpop.f32.mrb[34].mxu1  ;;  %v1058_v63 = vadd.f32 %v1057_v50, %v4913_v4  ;;  %v5713_v50 = vpack.c.bf16 %v4919_v14, %v4916_v6 }
 0x33a   : > { %5712 = vst [vmem:[#allocation29_spill] sm:$0xff] %v5101_v9  ;;  %v1060_v54 = vadd.f32 %v1059_v18, %v4910_v40  ;;  %v1061_v52 = vpop.f32.mrb[35].mxu1 }
 0x33b   : > { %v1062_v31 = vadd.f32 %v1061_v52, %v4913_v4  ;;  %v3279_v37 = vpop.f32.mrb[32].mxu0 }
 0x33c   : > { %v1150_v28 = vpack.c.bf16 %v1060_v54, %v1056_v60  ;;  %v1545_v47 = vadd.f32 %v3279_v37, %v4937_v43  ;;  %v1536_v12 = vpop.f32.mrb[33].mxu0 }
 0x33d   : > { %v1151_v8 = vpack.c.bf16 %v1062_v31, %v1058_v63  ;;  %v1537_v26 = vadd.f32 %v4937_v43, %v1536_v12  ;;  %v3280_v2 = vpop.f32.mrb[34].mxu0  ;;  %v5714_v12 = vpack.c.bf16 %v4925_v20, %v4922_v19 }
 0x33e   : > { %v1548_v41 = vadd.f32 %v3280_v2, %v4937_v43  ;;  %v1539_v15 = vpop.f32.mrb[35].mxu0  ;;  %3014 = vmatprep.subr.bf16.mxu0 %v1150_v28 }
 0x33f   : > { %v1540_v18 = vadd.f32 %v4937_v43, %v1539_v15  ;;  %v1065_v9 = vpop.f32.mrb[36].mxu1  ;;  %3015 = vmatpush3.bf16.xpose.msra.mxu0 %v5713_v50  ;;  %3062 = vmatprep.subr.bf16.mxu1 %v1151_v8 }
 0x340   : > { %v5116_v54 = vpack.c.bf16 %v1548_v41, %v1545_v47  ;;  %v1066_v60 = vadd.f32 %v1065_v9, %v4910_v40  ;;  %v1067_v31 = vpop.f32.mrb[37].mxu1  ;;  %3063 = vmatpush3.bf16.msra.mxu1 %v5714_v12  ;;  %v5715_v9 = vpack.c.bf16 %v4940_v45, %v4932_v24  ;;  %v5717_v45 = vpack.c.bf16 %v4964_v16, %v4959_v62 }
 0x341   : > { %v5122_v52 = vpack.c.bf16 %v1540_v18, %v1537_v26  ;;  %v1069_v28 = vpop.f32.mrb[38].mxu1  ;;  %v1068_v37 = vadd.f32 %v1067_v31, %v4913_v4  ;;  %v5716_v26 = vpack.c.bf16 %v4946_v53, %v4943_v51  ;;  %v5718_v12 = vpack.c.bf16 %v4970_v57, %v4967_v22 }
 0x342   : > { %v1070_v43 = vadd.f32 %v1069_v28, %v4910_v40  ;;  %v1071_v63 = vpop.f32.mrb[39].mxu1  ;;  %v5719_v16 = vpack.c.bf16 %v4989_v30, %v4984_v38  ;;  %v5721_v30 = vpack.c.bf16 %v5013_v5, %v5008_v56  ;;  %v5723_v5 = vpack.c.bf16 %v5037_v59, %v5032_v49 }
 0x343   : > { %v1072_v6 = vadd.f32 %v1071_v63, %v4913_v4  ;;  %v5725_v59 = vpack.c.bf16 %v5061_v27, %v5056_v33  ;;  %v5727_v33 = vpack.c.bf16 %v5085_v13, %v5080_v0  ;;  %v5728_v27 = vpack.c.bf16 %v5091_v25, %v5088_v21 }
 0x344   : > { %v1152_v14 = vpack.c.bf16 %v1070_v43, %v1066_v60 }
 0x345   : > { %v1153_v47 = vpack.c.bf16 %v1072_v6, %v1068_v37 }
 0x346   : > { %3016 = vmatprep.subr.bf16.mxu0 %v1152_v14 }
 0x347   : > { %v1075_v8 = vpop.f32.mrb[40].mxu1  ;;  %3017 = vmatpush3.bf16.xpose.msra.mxu0 %v5715_v9  ;;  %3064 = vmatprep.subr.bf16.mxu1 %v1153_v47 }
 0x348   : > { %v1076_v19 = vadd.f32 %v1075_v8, %v4910_v40  ;;  %v1077_v20 = vpop.f32.mrb[41].mxu1  ;;  %3065 = vmatpush3.bf16.msra.mxu1 %v5716_v26  ;;  %v5720_v8 = vpack.c.bf16 %v4995_v46, %v4992_v58 }
 0x349   : > { %v1079_v2 = vpop.f32.mrb[42].mxu1  ;;  %v1078_v18 = vadd.f32 %v1077_v20, %v4913_v4 }
 0x34a   : > { %v1080_v41 = vadd.f32 %v1079_v2, %v4910_v40  ;;  %v1081_v15 = vpop.f32.mrb[43].mxu1 }
 0x34b   : > { %v1082_v50 = vadd.f32 %v1081_v15, %v4913_v4 }
 0x34c   : > { %v1154_v60 = vpack.c.bf16 %v1080_v41, %v1076_v19 }
 0x34d   : > { %v1155_v31 = vpack.c.bf16 %v1082_v50, %v1078_v18  ;;  %v5722_v18 = vpack.c.bf16 %v5019_v44, %v5016_v55 }
 0x34e   : > { %3018 = vmatprep.subr.bf16.mxu0 %v1154_v60 }
 0x34f   : > { %v1085_v24 = vpop.f32.mrb[44].mxu1  ;;  %3019 = vmatpush3.bf16.xpose.msra.mxu0 %v5717_v45  ;;  %3066 = vmatprep.subr.bf16.mxu1 %v1155_v31 }
 0x350   : > { %v1086_v51 = vadd.f32 %v1085_v24, %v4910_v40  ;;  %v1087_v53 = vpop.f32.mrb[45].mxu1  ;;  %3067 = vmatpush3.bf16.msra.mxu1 %v5718_v12  ;;  %v5724_v12 = vpack.c.bf16 %v5043_v17, %v5040_v3 }
 0x351   : > { %v1089_v28 = vpop.f32.mrb[46].mxu1  ;;  %v1088_v37 = vadd.f32 %v1087_v53, %v4913_v4 }
 0x352   : > { %v1090_v43 = vadd.f32 %v1089_v28, %v4910_v40  ;;  %v1091_v63 = vpop.f32.mrb[47].mxu1 }
 0x353   : > { %v1092_v6 = vadd.f32 %v1091_v63, %v4913_v4 }
 0x354   : > { %v1156_v14 = vpack.c.bf16 %v1090_v43, %v1086_v51 }
 0x355   : > { %v1157_v47 = vpack.c.bf16 %v1092_v6, %v1088_v37 }
 0x356   : > { %3020 = vmatprep.subr.bf16.mxu0 %v1156_v14 }
 0x357   : > { %v1095_v62 = vpop.f32.mrb[48].mxu1  ;;  %3021 = vmatpush3.bf16.xpose.msra.mxu0 %v5719_v16  ;;  %3068 = vmatprep.subr.bf16.mxu1 %v1157_v47 }
 0x358   : > { %v1096_v22 = vadd.f32 %v1095_v62, %v4910_v40  ;;  %v1097_v57 = vpop.f32.mrb[49].mxu1  ;;  %3069 = vmatpush3.bf16.msra.mxu1 %v5720_v8  ;;  %v5726_v62 = vpack.c.bf16 %v5067_v23, %v5064_v1 }
 0x359   : > { %v1099_v9 = vpop.f32.mrb[50].mxu1  ;;  %v1098_v26 = vadd.f32 %v1097_v57, %v4913_v4 }
 0x35a   : > { %v1100_v19 = vadd.f32 %v1099_v9, %v4910_v40  ;;  %v1101_v20 = vpop.f32.mrb[51].mxu1 }
 0x35b   : > { %v1102_v2 = vadd.f32 %v1101_v20, %v4913_v4 }
 0x35c   : > { %v1158_v41 = vpack.c.bf16 %v1100_v19, %v1096_v22 }
 0x35d   : > { %v1159_v15 = vpack.c.bf16 %v1102_v2, %v1098_v26 }
 0x35e   : > { %3022 = vmatprep.subr.bf16.mxu0 %v1158_v41 }
 0x35f   : > { %v1105_v38 = vpop.f32.mrb[52].mxu1  ;;  %3023 = vmatpush3.bf16.xpose.msra.mxu0 %v5721_v30  ;;  %3070 = vmatprep.subr.bf16.mxu1 %v1159_v15 }
 0x360   : > { %v1106_v58 = vadd.f32 %v1105_v38, %v4910_v40  ;;  %v1107_v46 = vpop.f32.mrb[53].mxu1  ;;  %3071 = vmatpush3.bf16.msra.mxu1 %v5722_v18 }
 0x361   : > { %v1109_v50 = vpop.f32.mrb[54].mxu1  ;;  %v1108_v24 = vadd.f32 %v1107_v46, %v4913_v4 }
 0x362   : > { %v1110_v60 = vadd.f32 %v1109_v50, %v4910_v40  ;;  %v1111_v31 = vpop.f32.mrb[55].mxu1 }
 0x363   : > { %v1112_v45 = vadd.f32 %v1111_v31, %v4913_v4 }
 0x364   : > { %v1160_v51 = vpack.c.bf16 %v1110_v60, %v1106_v58 }
 0x365   : > { %v1161_v53 = vpack.c.bf16 %v1112_v45, %v1108_v24 }
 0x366   : > { %3024 = vmatprep.subr.bf16.mxu0 %v1160_v51 }
 0x367   : > { %v1115_v56 = vpop.f32.mrb[56].mxu1  ;;  %3025 = vmatpush3.bf16.xpose.msra.mxu0 %v5723_v5  ;;  %3072 = vmatprep.subr.bf16.mxu1 %v1161_v53 }
 0x368   : > { %v1116_v55 = vadd.f32 %v1115_v56, %v4910_v40  ;;  %v1117_v44 = vpop.f32.mrb[57].mxu1  ;;  %3073 = vmatpush3.bf16.msra.mxu1 %v5724_v12 }
 0x369   : > { %v1119_v28 = vpop.f32.mrb[58].mxu1  ;;  %v1118_v37 = vadd.f32 %v1117_v44, %v4913_v4 }
 0x36a   : > { %v1120_v43 = vadd.f32 %v1119_v28, %v4910_v40  ;;  %v1121_v63 = vpop.f32.mrb[59].mxu1 }
 0x36b   : > { %v1122_v6 = vadd.f32 %v1121_v63, %v4913_v4 }
 0x36c   : > { %v1162_v14 = vpack.c.bf16 %v1120_v43, %v1116_v55 }
 0x36d   : > { %v1163_v47 = vpack.c.bf16 %v1122_v6, %v1118_v37 }
 0x36e   : > { %3026 = vmatprep.subr.bf16.mxu0 %v1162_v14 }
 0x36f   : > { %v1125_v49 = vpop.f32.mrb[60].mxu1  ;;  %3027 = vmatpush3.bf16.xpose.msra.mxu0 %v5725_v59  ;;  %3074 = vmatprep.subr.bf16.mxu1 %v1163_v47 }
 0x370   : > { %v1126_v3 = vadd.f32 %v1125_v49, %v4910_v40  ;;  %v1127_v17 = vpop.f32.mrb[61].mxu1  ;;  %3075 = vmatpush3.bf16.msra.mxu1 %v5726_v62 }
 0x371   : > { %v1129_v16 = vpop.f32.mrb[62].mxu1  ;;  %v1128_v8 = vadd.f32 %v1127_v17, %v4913_v4 }
 0x372   : > { %v1130_v22 = vadd.f32 %v1129_v16, %v4910_v40  ;;  %v1131_v57 = vpop.f32.mrb[63].mxu1  ;;  %v5729_v40 = vld [vmem:[#allocation28_spill] sm:$0xff] }
 0x373   : > { %v1132_v9 = vadd.f32 %v1131_v57, %v4913_v4  ;;  %v5730_v4 = vld [vmem:[#allocation29_spill] sm:$0xff] }
 0x374   : > { %v1164_v19 = vpack.c.bf16 %v1130_v22, %v1126_v3 }
 0x375   : > { %v1165_v20 = vpack.c.bf16 %v1132_v9, %v1128_v8 }
 0x376   : > { %3028 = vmatprep.subr.bf16.mxu0 %v1164_v19 }
 0x377   : > { %3029 = vmatpush3.bf16.xpose.msra.mxu0 %v5727_v33  ;;  %3076 = vmatprep.subr.bf16.mxu1 %v1165_v20 }
 0x378   : > { %3077 = vmatpush3.bf16.msra.mxu1 %v5728_v27 }
 0x37e   : > { %3031 = vmatmul.mubr.bf16.vlgmr.msra.gmra.mrb[36].mxu0 %v4961_v7 }
 0x37f   : > { %3032 = vmatprep.mubr.bf16.mxu0 %v4956_v61 }
 0x386   : > { %3033 = vmatmul.mubr.bf16.gmra.mrb[40].mxu0 %v4956_v61 }
 0x387   : > { %3034 = vmatprep.mubr.bf16.mxu0 %v4986_v11 }
 0x38e   : > { %3035 = vmatmul.mubr.bf16.gmra.mrb[44].mxu0 %v4986_v11 }
 0x38f   : > { %3036 = vmatprep.mubr.bf16.mxu0 %v4981_v42 }
 0x396   : > { %3037 = vmatmul.mubr.bf16.gmra.mrb[48].mxu0 %v4981_v42 }
 0x397   : > { %3038 = vmatprep.mubr.bf16.mxu0 %v5010_v36 }
 0x39e   : > { %3039 = vmatmul.mubr.bf16.gmra.mrb[52].mxu0 %v5010_v36 }
 0x39f   : > { %3040 = vmatprep.mubr.bf16.mxu0 %v5005_v10 }
 0x3a6   : > { %3041 = vmatmul.mubr.bf16.gmra.mrb[56].mxu0 %v5005_v10 }
 0x3a7   : > { %3042 = vmatprep.mubr.bf16.mxu0 %v5034_v35 }
 0x3ae   : > { %3043 = vmatmul.mubr.bf16.gmra.mrb[60].mxu0 %v5034_v35 }
 0x3af   : > { %3044 = vmatprep.mubr.bf16.mxu0 %v5029_v39 }
 0x3b6   : > { %3045 = vmatmul.mubr.bf16.gmra.mrb[64].mxu0 %v5029_v39 }
 0x3b7   : > { %3046 = vmatprep.mubr.bf16.mxu0 %v5058_v29 }
 0x3be   : > { %3047 = vmatmul.mubr.bf16.gmra.mrb[68].mxu0 %v5058_v29 }
 0x3bf   : > { %3048 = vmatprep.mubr.bf16.mxu0 %v5053_v34 }
 0x3c6   : > { %3049 = vmatmul.mubr.bf16.gmra.mrb[72].mxu0 %v5053_v34 }
 0x3c7   : > { %3050 = vmatprep.mubr.bf16.mxu0 %v5082_v48 }
 0x3ce   : > { %3051 = vmatmul.mubr.bf16.gmra.mrb[76].mxu0 %v5082_v48 }
 0x3cf   : > { %3052 = vmatprep.mubr.bf16.mxu0 %v5729_v40 }
 0x3d6   : > { %3053 = vmatmul.mubr.bf16.gmra.mrb[80].mxu0 %v5729_v40 }
 0x3d7   : > { %3054 = vmatprep.mubr.bf16.mxu0 %v5104_v32 }
 0x3de   : > { %3055 = vmatmul.mubr.bf16.gmra.mrb[84].mxu0 %v5104_v32 }
 0x3df   : > { %3056 = vmatprep.mubr.bf16.mxu0 %v5730_v4 }
 0x3e6   : > { %3057 = vmatmul.mubr.bf16.gmra.mrb[88].mxu0 %v5730_v4 }
 0x3e7   : > { %3058 = vmatprep.mubr.bf16.mxu0 %v5122_v52 }
 0x3ee   : > { %3059 = vmatmul.mubr.bf16.gmra.mrb[92].mxu0 %v5122_v52 }
 0x3ef   : > { %3060 = vmatprep.mubr.bf16.mxu0 %v5116_v54 }
 0x3f6   : > { %3061 = vmatmul.mubr.bf16.gmra.mrb[96].mxu0 %v5116_v54 }
 0x451   : > { %v5224_v61 = vpop.f32.mrb[36].mxu0 }
 0x452   : > { %v5226_v7 = vpop.f32.mrb[37].mxu0 }
 0x453   : > { %v5228_v42 = vpop.f32.mrb[38].mxu0  ;;  %v1776_v32 = vmax.f32 %v5224_v61, %v5226_v7 }
 0x454   : > { %v5232_v11 = vpop.f32.mrb[39].mxu0 }
 0x455   : > { %1777 = vmax.xlane.f32.xlu0 %v1776_v32  ;;  %v1779_v10 = vmax.f32 %v5228_v42, %v5232_v11 }
 0x459   : > { %1780 = vmax.xlane.f32.xlu0 %v1779_v10  ;;  %v5236_v36 = vpop.f32.mrb[40].mxu0 }
 0x45a   : > { %v5238_v21 = vpop.f32.mrb[41].mxu0 }
 0x45b   : > { %v5240_v39 = vpop.f32.mrb[42].mxu0  ;;  %v1782_v35 = vmax.f32 %v5236_v36, %v5238_v21 }
 0x45c   : > { %v5244_v0 = vpop.f32.mrb[43].mxu0 }
 0x45d   : > { %1783 = vmax.xlane.f32.xlu1 %v1782_v35  ;;  %v1785_v34 = vmax.f32 %v5240_v39, %v5244_v0 }
 0x461   : > { %1786 = vmax.xlane.f32.xlu1 %v1785_v34  ;;  %v5248_v29 = vpop.f32.mrb[44].mxu0 }
 0x462   : > { %v5250_v1 = vpop.f32.mrb[45].mxu0 }
 0x463   : > { %v5252_v23 = vpop.f32.mrb[46].mxu0  ;;  %v1788_v13 = vmax.f32 %v5248_v29, %v5250_v1 }
 0x464   : > { %v5256_v48 = vpop.f32.mrb[47].mxu0 }
 0x465   : > { %1789 = vmax.xlane.f32.xlu0 %v1788_v13  ;;  %v1791_v25 = vmax.f32 %v5252_v23, %v5256_v48 }
 0x467   : > { %1792 = vmax.xlane.f32.xlu1 %v1791_v25 }
 0x469   : > { %v5260_v54 = vpop.f32.mrb[48].mxu0 }
 0x46a   : > { %v5262_v52 = vpop.f32.mrb[49].mxu0 }
 0x46b   : > { %v5264_v26 = vpop.f32.mrb[50].mxu0  ;;  %v1794_v2 = vmax.f32 %v5260_v54, %v5262_v52 }
 0x46c   : > { %v5268_v41 = vpop.f32.mrb[51].mxu0 }
 0x46d   : > { %1795 = vmax.xlane.f32.xlu0 %v1794_v2  ;;  %v1797_v15 = vmax.f32 %v5264_v26, %v5268_v41 }
 0x46f   : > { %1798 = vmax.xlane.f32.xlu1 %v1797_v15 }
 0x471   : > { %v5272_v38 = vpop.f32.mrb[52].mxu0 }
 0x472   : > { %v5274_v30 = vpop.f32.mrb[53].mxu0 }
 0x473   : > { %v5276_v58 = vpop.f32.mrb[54].mxu0  ;;  %v1800_v46 = vmax.f32 %v5272_v38, %v5274_v30 }
 0x474   : > { %v5280_v18 = vpop.f32.mrb[55].mxu0 }
 0x475   : > { %1801 = vmax.xlane.f32.xlu0 %v1800_v46  ;;  %v1803_v50 = vmax.f32 %v5276_v58, %v5280_v18 }
 0x477   : > { %1804 = vmax.xlane.f32.xlu1 %v1803_v50 }
 0x479   : > { %v5284_v60 = vpop.f32.mrb[56].mxu0 }
 0x47a   : > { %v5286_v31 = vpop.f32.mrb[57].mxu0 }
 0x47b   : > { %v5288_v24 = vpop.f32.mrb[58].mxu0  ;;  %v1806_v45 = vmax.f32 %v5284_v60, %v5286_v31 }
 0x47c   : > { %v5292_v51 = vpop.f32.mrb[59].mxu0 }
 0x47d   : > { %1807 = vmax.xlane.f32.xlu0 %v1806_v45  ;;  %v1809_v53 = vmax.f32 %v5288_v24, %v5292_v51 }
 0x47f   : > { %1810 = vmax.xlane.f32.xlu1 %v1809_v53 }
 0x481   : > { %v5296_v56 = vpop.f32.mrb[60].mxu0 }
 0x482   : > { %v5298_v5 = vpop.f32.mrb[61].mxu0 }
 0x483   : > { %v5300_v55 = vpop.f32.mrb[62].mxu0  ;;  %v1812_v44 = vmax.f32 %v5296_v56, %v5298_v5 }
 0x484   : > { %v5304_v12 = vpop.f32.mrb[63].mxu0 }
 0x485   : > { %1813 = vmax.xlane.f32.xlu0 %v1812_v44  ;;  %v1815_v28 = vmax.f32 %v5300_v55, %v5304_v12 }
 0x487   : > { %1816 = vmax.xlane.f32.xlu1 %v1815_v28 }
 0x489   : > { %v5308_v43 = vpop.f32.mrb[64].mxu0 }
 0x48a   : > { %v5310_v63 = vpop.f32.mrb[65].mxu0 }
 0x48b   : > { %v5312_v37 = vpop.f32.mrb[66].mxu0  ;;  %v1818_v6 = vmax.f32 %v5308_v43, %v5310_v63 }
 0x48c   : > { %v5316_v14 = vpop.f32.mrb[67].mxu0 }
 0x48d   : > { %1819 = vmax.xlane.f32.xlu0 %v1818_v6  ;;  %v1821_v47 = vmax.f32 %v5312_v37, %v5316_v14 }
 0x48f   : > { %1822 = vmax.xlane.f32.xlu1 %v1821_v47 }
 0x491   : > { %v5320_v49 = vpop.f32.mrb[68].mxu0 }
 0x492   : > { %v5322_v59 = vpop.f32.mrb[69].mxu0 }
 0x493   : > { %v5324_v3 = vpop.f32.mrb[70].mxu0  ;;  %v1824_v17 = vmax.f32 %v5320_v49, %v5322_v59 }
 0x494   : > { %v5328_v62 = vpop.f32.mrb[71].mxu0 }
 0x495   : > { %1825 = vmax.xlane.f32.xlu0 %v1824_v17  ;;  %v1827_v16 = vmax.f32 %v5324_v3, %v5328_v62 }
 0x497   : > { %1828 = vmax.xlane.f32.xlu1 %v1827_v16 }
 0x499   : > { %v5332_v22 = vpop.f32.mrb[72].mxu0 }
 0x49a   : > { %v5334_v57 = vpop.f32.mrb[73].mxu0 }
 0x49b   : > { %v5336_v8 = vpop.f32.mrb[74].mxu0  ;;  %v1830_v9 = vmax.f32 %v5332_v22, %v5334_v57 }
 0x49c   : > { %v5340_v19 = vpop.f32.mrb[75].mxu0 }
 0x49d   : > { %1831 = vmax.xlane.f32.xlu0 %v1830_v9  ;;  %v1833_v20 = vmax.f32 %v5336_v8, %v5340_v19 }
 0x49f   : > { %1834 = vmax.xlane.f32.xlu1 %v1833_v20 }
 0x4a1   : > { %v5344_v33 = vpop.f32.mrb[76].mxu0 }
 0x4a2   : > { %v5346_v27 = vpop.f32.mrb[77].mxu0 }
 0x4a3   : > { %v5348_v40 = vpop.f32.mrb[78].mxu0  ;;  %v1836_v4 = vmax.f32 %v5344_v33, %v5346_v27 }
 0x4a4   : > { %v5352_v32 = vpop.f32.mrb[79].mxu0 }
 0x4a5   : > { %1837 = vmax.xlane.f32.xlu0 %v1836_v4  ;;  %v1839_v10 = vmax.f32 %v5348_v40, %v5352_v32 }
 0x4a7   : > { %1840 = vmax.xlane.f32.xlu1 %v1839_v10 }
 0x4a9   : > { %v5356_v35 = vpop.f32.mrb[80].mxu0 }
 0x4aa   : > { %v5358_v34 = vpop.f32.mrb[81].mxu0 }
 0x4ab   : > { %v5360_v13 = vpop.f32.mrb[82].mxu0  ;;  %v1842_v25 = vmax.f32 %v5356_v35, %v5358_v34 }
 0x4ac   : > { %v5364_v2 = vpop.f32.mrb[83].mxu0 }
 0x4ad   : > { %1843 = vmax.xlane.f32.xlu0 %v1842_v25  ;;  %v1845_v15 = vmax.f32 %v5360_v13, %v5364_v2 }
 0x4af   : > { %1846 = vmax.xlane.f32.xlu1 %v1845_v15 }
 0x4b1   : > { %v5368_v46 = vpop.f32.mrb[84].mxu0 }
 0x4b2   : > { %v5370_v50 = vpop.f32.mrb[85].mxu0 }
 0x4b3   : > { %v5372_v45 = vpop.f32.mrb[86].mxu0  ;;  %v1848_v53 = vmax.f32 %v5368_v46, %v5370_v50 }
 0x4b4   : > { %5731 = vst [vmem:[#allocation28_spill] sm:$0xff] %v5372_v45  ;;  %v5376_v44 = vpop.f32.mrb[87].mxu0 }
 0x4b5   : > { %5732 = vst [vmem:[#allocation29_spill] sm:$0xff] %v5376_v44  ;;  %1849 = vmax.xlane.f32.xlu0 %v1848_v53  ;;  %v1851_v28 = vmax.f32 %v5372_v45, %v5376_v44 }
 0x4b7   : > { %1852 = vmax.xlane.f32.xlu1 %v1851_v28 }
 0x4b9   : > { %v5380_v6 = vpop.f32.mrb[88].mxu0 }
 0x4ba   : > { %5733 = vst [vmem:[#allocation30_spill] sm:$0xff] %v5380_v6  ;;  %v5382_v47 = vpop.f32.mrb[89].mxu0 }
 0x4bb   : > { %5734 = vst [vmem:[#allocation31_spill] sm:$0xff] %v5382_v47  ;;  %v5384_v17 = vpop.f32.mrb[90].mxu0  ;;  %v1854_v16 = vmax.f32 %v5380_v6, %v5382_v47 }
 0x4bc   : > { %5735 = vst [vmem:[#allocation32_spill] sm:$0xff] %v5384_v17  ;;  %v5388_v9 = vpop.f32.mrb[91].mxu0 }
 0x4bd   : > { %5736 = vst [vmem:[#allocation33_spill] sm:$0xff] %v5388_v9  ;;  %1855 = vmax.xlane.f32.xlu0 %v1854_v16  ;;  %v1857_v20 = vmax.f32 %v5384_v17, %v5388_v9 }
 0x4bf   : > { %1858 = vmax.xlane.f32.xlu1 %v1857_v20 }
 0x4c1   : > { %v5392_v4 = vpop.f32.mrb[92].mxu0 }
 0x4c2   : > { %5737 = vst [vmem:[#allocation34_spill] sm:$0xff] %v5392_v4  ;;  %v5394_v10 = vpop.f32.mrb[93].mxu0 }
 0x4c3   : > { %5738 = vst [vmem:[#allocation35_spill] sm:$0xff] %v5394_v10  ;;  %v5396_v25 = vpop.f32.mrb[94].mxu0  ;;  %v1860_v15 = vmax.f32 %v5392_v4, %v5394_v10 }
 0x4c4   : > { %5739 = vst [vmem:[#allocation36_spill] sm:$0xff] %v5396_v25  ;;  %v5400_v53 = vpop.f32.mrb[95].mxu0 }
 0x4c5   : > { %5740 = vst [vmem:[#allocation37_spill] sm:$0xff] %v5400_v53  ;;  %1861 = vmax.xlane.f32.xlu0 %v1860_v15  ;;  %v1863_v28 = vmax.f32 %v5396_v25, %v5400_v53 }
 0x4c7   : > { %1864 = vmax.xlane.f32.xlu1 %v1863_v28 }
 0x4c9   : > { %v5404_v16 = vpop.f32.mrb[96].mxu0 }
 0x4ca   : > { %5741 = vst [vmem:[#allocation38_spill] sm:$0xff] %v5404_v16  ;;  %v5406_v9 = vpop.f32.mrb[97].mxu0 }
 0x4cb   : > { %5742 = vst [vmem:[#allocation39_spill] sm:$0xff] %v5406_v9  ;;  %v5408_v20 = vpop.f32.mrb[98].mxu0  ;;  %v1866_v17 = vmax.f32 %v5404_v16, %v5406_v9 }
 0x4cc   : > { %v5412_v47 = vpop.f32.mrb[99].mxu0 }
 0x4cd   : > { %5743 = vst [vmem:[#allocation40_spill] sm:$0xff] %v5412_v47  ;;  %1867 = vmax.xlane.f32.xlu0 %v1866_v17  ;;  %v1869_v10 = vmax.f32 %v5408_v20, %v5412_v47 }
 0x4cf   : > { %1870 = vmax.xlane.f32.xlu1 %v1869_v10 }
 0x4e2   : > { %v1778_v15 = vpop.xlane.xlu0 %1777 }
 0x4e3   : > { %v1872_v53 = vsub.f32 %v5224_v61, %v1778_v15  ;;  %v1873_v28 = vsub.f32 %v5226_v7, %v1778_v15 }
 0x4e5   : > { %v1936_v25 = vmul.f32 1.442695, %v1872_v53  ;;  %v1938_v4 = vmul.f32 1.442695, %v1873_v28 }
 0x4e6   : > { %v1781_v6 = vpop.xlane.xlu0 %1780 }
 0x4e7   : > { %3529 = vpow2.f32 %v1936_v25  ;;  %v1874_v44 = vsub.f32 %v5228_v42, %v1781_v6  ;;  %v1875_v9 = vsub.f32 %v5232_v11, %v1781_v6 }
 0x4e8   : > { %3531 = vpow2.f32 %v1938_v4 }
 0x4e9   : > { %v1940_v16 = vmul.f32 1.442695, %v1874_v44  ;;  %v1942_v17 = vmul.f32 1.442695, %v1875_v9 }
 0x4ea   : > { %v1784_v45 = vpop.xlane.xlu1 %1783 }
 0x4eb   : > { %3533 = vpow2.f32 %v1940_v16  ;;  %v1876_v10 = vsub.f32 %v5236_v36, %v1784_v45  ;;  %v1877_v47 = vsub.f32 %v5238_v21, %v1784_v45 }
 0x4ec   : > { %3535 = vpow2.f32 %v1942_v17 }
 0x4ed   : > { %v1944_v61 = vmul.f32 1.442695, %v1876_v10  ;;  %v1946_v7 = vmul.f32 1.442695, %v1877_v47 }
 0x4ee   : > { %v1787_v53 = vpop.xlane.xlu1 %1786 }
 0x4ef   : > { %3537 = vpow2.f32 %v1944_v61  ;;  %v1878_v25 = vsub.f32 %v5240_v39, %v1787_v53  ;;  %v1879_v42 = vsub.f32 %v5244_v0, %v1787_v53 }
 0x4f0   : > { %3539 = vpow2.f32 %v1946_v7 }
 0x4f1   : > { %v3530_v11 = vpop.eup %3529  ;;  %v1948_v6 = vmul.f32 1.442695, %v1878_v25  ;;  %v1950_v44 = vmul.f32 1.442695, %v1879_v42 }
 0x4f2   : > { %v3532_v9 = vpop.eup %3531  ;;  %v1790_v4 = vpop.xlane.xlu0 %1789 }
 0x4f3   : > { %3541 = vpow2.f32 %v1948_v6  ;;  %v1880_v36 = vsub.f32 %v5248_v29, %v1790_v4  ;;  %v1881_v21 = vsub.f32 %v5250_v1, %v1790_v4  ;;  %v2064_v45 = vadd.f32 %v3532_v9, %v3530_v11 }
 0x4f4   : > { %3543 = vpow2.f32 %v1950_v44  ;;  %v1793_v47 = vpop.xlane.xlu1 %1792 }
 0x4f5   : > { %v3534_v16 = vpop.eup %3533  ;;  %v1952_v15 = vmul.f32 1.442695, %v1880_v36  ;;  %v1954_v28 = vmul.f32 1.442695, %v1881_v21  ;;  %v1882_v39 = vsub.f32 %v5252_v23, %v1793_v47  ;;  %v1883_v0 = vsub.f32 %v5256_v48, %v1793_v47  ;;  %2065 = vadd.xlane.f32.xlu0 %v2064_v45 }
 0x4f6   : > { %v3536_v17 = vpop.eup %3535  ;;  %v2160_v10 = vpack.c.bf16 %v3534_v16, %v3530_v11 }
 0x4f7   : > { %3545 = vpow2.f32 %v1952_v15  ;;  %v1956_v61 = vmul.f32 1.442695, %v1882_v39  ;;  %v1958_v7 = vmul.f32 1.442695, %v1883_v0  ;;  %v2161_v53 = vpack.c.bf16 %v3536_v17, %v3532_v9 }
 0x4f8   : > { %3547 = vpow2.f32 %v1954_v28  ;;  %v2067_v29 = vadd.f32 %v3536_v17, %v3534_v16 }
 0x4f9   : > { %v3538_v1 = vpop.eup %3537  ;;  %3549 = vpow2.f32 %v1956_v61  ;;  %2240 = vmatprep.mubr.bf16.mxu1 %v2161_v53 }
 0x4fa   : > { %v3540_v25 = vpop.eup %3539  ;;  %3551 = vpow2.f32 %v1958_v7  ;;  %2068 = vadd.xlane.f32.xlu1 %v2067_v29  ;;  %2241 = vmatmul.mubr.bf16.vlgmr.msra.gmra.mrb[64].mxu1 %v2160_v10  ;;  %v1796_v42 = vpop.xlane.xlu0 %1795 }
 0x4fb   : > { %v1884_v23 = vsub.f32 %v5260_v54, %v1796_v42  ;;  %v1885_v48 = vsub.f32 %v5262_v52, %v1796_v42  ;;  %v2070_v6 = vadd.f32 %v3540_v25, %v3538_v1 }
 0x4fc   : > { %v1799_v11 = vpop.xlane.xlu1 %1798 }
 0x4fd   : > { %v3542_v44 = vpop.eup %3541  ;;  %v1960_v4 = vmul.f32 1.442695, %v1884_v23  ;;  %v1962_v36 = vmul.f32 1.442695, %v1885_v48  ;;  %v1886_v9 = vsub.f32 %v5264_v26, %v1799_v11  ;;  %v1887_v21 = vsub.f32 %v5268_v41, %v1799_v11  ;;  %2071 = vadd.xlane.f32.xlu0 %v2070_v6 }
 0x4fe   : > { %v3544_v45 = vpop.eup %3543  ;;  %v2162_v47 = vpack.c.bf16 %v3542_v44, %v3538_v1 }
 0x4ff   : > { %3553 = vpow2.f32 %v1960_v4  ;;  %v1964_v16 = vmul.f32 1.442695, %v1886_v9  ;;  %v1966_v15 = vmul.f32 1.442695, %v1887_v21  ;;  %v2163_v28 = vpack.c.bf16 %v3544_v45, %v3540_v25 }
 0x500   : > { %3555 = vpow2.f32 %v1962_v36  ;;  %v2073_v54 = vadd.f32 %v3544_v45, %v3542_v44 }
 0x501   : > { %v3546_v39 = vpop.eup %3545  ;;  %3557 = vpow2.f32 %v1964_v16  ;;  %2248 = vmatprep.mubr.bf16.mxu1 %v2163_v28 }
 0x502   : > { %v3548_v52 = vpop.eup %3547  ;;  %3559 = vpow2.f32 %v1966_v15  ;;  %2074 = vadd.xlane.f32.xlu1 %v2073_v54  ;;  %2249 = vmatmul.mubr.bf16.gmra.mrb[68].mxu1 %v2162_v47  ;;  %v1802_v0 = vpop.xlane.xlu0 %1801 }
 0x503   : > { %v3550_v26 = vpop.eup %3549  ;;  %v1888_v41 = vsub.f32 %v5272_v38, %v1802_v0  ;;  %v1889_v17 = vsub.f32 %v5274_v30, %v1802_v0  ;;  %v2076_v10 = vadd.f32 %v3548_v52, %v3546_v39 }
 0x504   : > { %v3552_v61 = vpop.eup %3551  ;;  %v1805_v7 = vpop.xlane.xlu1 %1804  ;;  %v2164_v53 = vpack.c.bf16 %v3550_v26, %v3546_v39 }
 0x505   : > { %v1968_v29 = vmul.f32 1.442695, %v1888_v41  ;;  %v1970_v1 = vmul.f32 1.442695, %v1889_v17  ;;  %v1890_v25 = vsub.f32 %v5276_v58, %v1805_v7  ;;  %v1891_v42 = vsub.f32 %v5280_v18, %v1805_v7  ;;  %2077 = vadd.xlane.f32.xlu0 %v2076_v10 }
 0x506   : > { %v2165_v23 = vpack.c.bf16 %v3552_v61, %v3548_v52  ;;  %v2079_v48 = vadd.f32 %v3552_v61, %v3550_v26 }
 0x507   : > { %3561 = vpow2.f32 %v1968_v29  ;;  %v1972_v6 = vmul.f32 1.442695, %v1890_v25  ;;  %v1974_v11 = vmul.f32 1.442695, %v1891_v42 }
 0x508   : > { %3563 = vpow2.f32 %v1970_v1  ;;  %2256 = vmatprep.mubr.bf16.mxu1 %v2165_v23  ;;  %2080 = vadd.xlane.f32.xlu1 %v2079_v48 }
 0x509   : > { %v3554_v38 = vpop.eup %3553  ;;  %3565 = vpow2.f32 %v1972_v6 }
 0x50a   : > { %v3556_v30 = vpop.eup %3555  ;;  %3567 = vpow2.f32 %v1974_v11  ;;  %2257 = vmatmul.mubr.bf16.gmra.mrb[72].mxu1 %v2164_v53  ;;  %v1808_v44 = vpop.xlane.xlu0 %1807 }
 0x50b   : > { %v3558_v4 = vpop.eup %3557  ;;  %v1892_v58 = vsub.f32 %v5284_v60, %v1808_v44  ;;  %v1893_v18 = vsub.f32 %v5286_v31, %v1808_v44  ;;  %v2082_v36 = vadd.f32 %v3556_v30, %v3554_v38 }
 0x50c   : > { %v3560_v9 = vpop.eup %3559  ;;  %v1811_v21 = vpop.xlane.xlu1 %1810  ;;  %v2166_v45 = vpack.c.bf16 %v3558_v4, %v3554_v38 }
 0x50d   : > { %v1976_v47 = vmul.f32 1.442695, %v1892_v58  ;;  %v1978_v16 = vmul.f32 1.442695, %v1893_v18  ;;  %v1894_v15 = vsub.f32 %v5288_v24, %v1811_v21  ;;  %v1895_v28 = vsub.f32 %v5292_v51, %v1811_v21  ;;  %2083 = vadd.xlane.f32.xlu0 %v2082_v36 }
 0x50e   : > { %v2167_v54 = vpack.c.bf16 %v3560_v9, %v3556_v30  ;;  %v2085_v39 = vadd.f32 %v3560_v9, %v3558_v4 }
 0x50f   : > { %3569 = vpow2.f32 %v1976_v47  ;;  %v1980_v52 = vmul.f32 1.442695, %v1894_v15  ;;  %v1982_v0 = vmul.f32 1.442695, %v1895_v28 }
 0x510   : > { %3571 = vpow2.f32 %v1978_v16  ;;  %2264 = vmatprep.mubr.bf16.mxu1 %v2167_v54  ;;  %2086 = vadd.xlane.f32.xlu1 %v2085_v39 }
 0x511   : > { %v3562_v60 = vpop.eup %3561  ;;  %3573 = vpow2.f32 %v1980_v52 }
 0x512   : > { %v3564_v31 = vpop.eup %3563  ;;  %3575 = vpow2.f32 %v1982_v0  ;;  %2265 = vmatmul.mubr.bf16.gmra.mrb[76].mxu1 %v2166_v45  ;;  %v1814_v26 = vpop.xlane.xlu0 %1813 }
 0x513   : > { %v3566_v41 = vpop.eup %3565  ;;  %v1896_v24 = vsub.f32 %v5296_v56, %v1814_v26  ;;  %v1897_v51 = vsub.f32 %v5298_v5, %v1814_v26  ;;  %v2088_v17 = vadd.f32 %v3564_v31, %v3562_v60 }
 0x514   : > { %v3568_v10 = vpop.eup %3567  ;;  %v1817_v61 = vpop.xlane.xlu1 %1816  ;;  %v2168_v7 = vpack.c.bf16 %v3566_v41, %v3562_v60 }
 0x515   : > { %v1984_v53 = vmul.f32 1.442695, %v1896_v24  ;;  %v1986_v29 = vmul.f32 1.442695, %v1897_v51  ;;  %v1898_v1 = vsub.f32 %v5300_v55, %v1817_v61  ;;  %v1899_v25 = vsub.f32 %v5304_v12, %v1817_v61  ;;  %2089 = vadd.xlane.f32.xlu0 %v2088_v17 }
 0x516   : > { %v2169_v42 = vpack.c.bf16 %v3568_v10, %v3564_v31  ;;  %v2091_v23 = vadd.f32 %v3568_v10, %v3566_v41  ;;  %v3519_v10 = vld [vmem:[#allocation14] sm:$0xff]  }
 0x517   : > { %3577 = vpow2.f32 %v1984_v53  ;;  %v1988_v48 = vmul.f32 1.442695, %v1898_v1  ;;  %v1990_v6 = vmul.f32 1.442695, %v1899_v25  ;;  %3281 = vmatprep.subr.bf16.mxu0 %v3519_v10  ;;  %3353 = vmatprep.subr.bf16.mxu1 %v3519_v10 }
 0x518   : > { %3579 = vpow2.f32 %v1986_v29  ;;  %2272 = vmatprep.mubr.bf16.mxu1 %v2169_v42  ;;  %2092 = vadd.xlane.f32.xlu1 %v2091_v23 }
 0x519   : > { %v3570_v56 = vpop.eup %3569  ;;  %3581 = vpow2.f32 %v1988_v48  ;;  %3282 = vmatpush3.bf16.msra.mxu0 %v3519_v10  ;;  %3361 = vmatpush3.bf16.msra.mxu1 %v3519_v10 }
 0x51a   : > { %v3572_v5 = vpop.eup %3571  ;;  %3583 = vpow2.f32 %v1990_v6  ;;  %2273 = vmatmul.mubr.bf16.gmra.mrb[80].mxu1 %v2168_v7  ;;  %v1820_v11 = vpop.xlane.xlu0 %1819 }
 0x51b   : > { %v3574_v38 = vpop.eup %3573  ;;  %v1900_v55 = vsub.f32 %v5308_v43, %v1820_v11  ;;  %v1901_v12 = vsub.f32 %v5310_v63, %v1820_v11  ;;  %v2094_v30 = vadd.f32 %v3572_v5, %v3570_v56 }
 0x51c   : > { %v3576_v44 = vpop.eup %3575  ;;  %v1823_v4 = vpop.xlane.xlu1 %1822  ;;  %v2170_v58 = vpack.c.bf16 %v3574_v38, %v3570_v56 }
 0x51d   : > { %v1992_v18 = vmul.f32 1.442695, %v1900_v55  ;;  %v1994_v36 = vmul.f32 1.442695, %v1901_v12  ;;  %v1902_v9 = vsub.f32 %v5312_v37, %v1823_v4  ;;  %v1903_v21 = vsub.f32 %v5316_v14, %v1823_v4  ;;  %2095 = vadd.xlane.f32.xlu0 %v2094_v30 }
 0x51e   : > { %v2171_v45 = vpack.c.bf16 %v3576_v44, %v3572_v5  ;;  %v2097_v47 = vadd.f32 %v3576_v44, %v3574_v38 }
 0x51f   : > { %3585 = vpow2.f32 %v1992_v18  ;;  %v1996_v16 = vmul.f32 1.442695, %v1902_v9  ;;  %v1998_v15 = vmul.f32 1.442695, %v1903_v21 }
 0x520   : > { %3587 = vpow2.f32 %v1994_v36  ;;  %2280 = vmatprep.mubr.bf16.mxu1 %v2171_v45  ;;  %2098 = vadd.xlane.f32.xlu1 %v2097_v47 }
 0x521   : > { %v3578_v43 = vpop.eup %3577  ;;  %3589 = vpow2.f32 %v1996_v16 }
 0x522   : > { %v3580_v63 = vpop.eup %3579  ;;  %3591 = vpow2.f32 %v1998_v15  ;;  %2281 = vmatmul.mubr.bf16.gmra.mrb[84].mxu1 %v2170_v58  ;;  %v1826_v28 = vpop.xlane.xlu0 %1825 }
 0x523   : > { %v3582_v54 = vpop.eup %3581  ;;  %v1904_v37 = vsub.f32 %v5320_v49, %v1826_v28  ;;  %v1905_v14 = vsub.f32 %v5322_v59, %v1826_v28  ;;  %v2100_v39 = vadd.f32 %v3580_v63, %v3578_v43 }
 0x524   : > { %v3584_v52 = vpop.eup %3583  ;;  %v1829_v0 = vpop.xlane.xlu1 %1828  ;;  %v2172_v60 = vpack.c.bf16 %v3582_v54, %v3578_v43  ;;  %v3520_v43 = vld [vmem:[#allocation14 + $0x8] sm:$0xff]  }
 0x525   : > { %v2000_v31 = vmul.f32 1.442695, %v1904_v37  ;;  %v2002_v26 = vmul.f32 1.442695, %v1905_v14  ;;  %v1906_v41 = vsub.f32 %v5324_v3, %v1829_v0  ;;  %v1907_v24 = vsub.f32 %v5328_v62, %v1829_v0  ;;  %2101 = vadd.xlane.f32.xlu0 %v2100_v39  ;;  %3283 = vmatprep.subr.bf16.mxu0 %v3520_v43 }
 0x526   : > { %v2173_v51 = vpack.c.bf16 %v3584_v52, %v3580_v63  ;;  %v2103_v17 = vadd.f32 %v3584_v52, %v3582_v54  ;;  %3354 = vmatprep.subr.bf16.mxu1 %v3520_v43  ;;  %3284 = vmatpush3.bf16.msra.mxu0 %v3520_v43 }
 0x527   : > { %3593 = vpow2.f32 %v2000_v31  ;;  %v2004_v61 = vmul.f32 1.442695, %v1906_v41  ;;  %v2006_v7 = vmul.f32 1.442695, %v1907_v24  ;;  %3362 = vmatpush3.bf16.msra.mxu1 %v3520_v43 }
 0x528   : > { %3595 = vpow2.f32 %v2002_v26  ;;  %2288 = vmatprep.mubr.bf16.mxu1 %v2173_v51  ;;  %2104 = vadd.xlane.f32.xlu1 %v2103_v17 }
 0x529   : > { %v3586_v49 = vpop.eup %3585  ;;  %3597 = vpow2.f32 %v2004_v61 }
 0x52a   : > { %v3588_v59 = vpop.eup %3587  ;;  %3599 = vpow2.f32 %v2006_v7  ;;  %2289 = vmatmul.mubr.bf16.gmra.mrb[88].mxu1 %v2172_v60  ;;  %v1832_v3 = vpop.xlane.xlu0 %1831 }
 0x52b   : > { %v3590_v62 = vpop.eup %3589  ;;  %v1908_v53 = vsub.f32 %v5332_v22, %v1832_v3  ;;  %v1909_v29 = vsub.f32 %v5334_v57, %v1832_v3  ;;  %v2106_v1 = vadd.f32 %v3588_v59, %v3586_v49 }
 0x52c   : > { %v3592_v25 = vpop.eup %3591  ;;  %v1835_v42 = vpop.xlane.xlu1 %1834  ;;  %v2174_v23 = vpack.c.bf16 %v3590_v62, %v3586_v49 }
 0x52d   : > { %v2008_v48 = vmul.f32 1.442695, %v1908_v53  ;;  %v2010_v6 = vmul.f32 1.442695, %v1909_v29  ;;  %v1910_v56 = vsub.f32 %v5336_v8, %v1835_v42  ;;  %v1911_v5 = vsub.f32 %v5340_v19, %v1835_v42  ;;  %2107 = vadd.xlane.f32.xlu0 %v2106_v1  ;;  %v5744_v1 = vld [vmem:[#allocation28_spill] sm:$0xff]  ;;  %v5745_v42 = vld [vmem:[#allocation29_spill] sm:$0xff] }
 0x52e   : > { %v2175_v11 = vpack.c.bf16 %v3592_v25, %v3588_v59  ;;  %v2109_v38 = vadd.f32 %v3592_v25, %v3590_v62 }
 0x52f   : > { %3601 = vpow2.f32 %v2008_v48  ;;  %v2012_v55 = vmul.f32 1.442695, %v1910_v56  ;;  %v2014_v12 = vmul.f32 1.442695, %v1911_v5  ;;  %v3521_v56 = vld [vmem:[#allocation14 + $0x10] sm:$0xff]  }
 0x530   : > { %3603 = vpow2.f32 %v2010_v6  ;;  %2296 = vmatprep.mubr.bf16.mxu1 %v2175_v11  ;;  %2110 = vadd.xlane.f32.xlu1 %v2109_v38 }
 0x531   : > { %v3594_v22 = vpop.eup %3593  ;;  %3605 = vpow2.f32 %v2012_v55  ;;  %3285 = vmatprep.subr.bf16.mxu0 %v3521_v56  ;;  %3355 = vmatprep.subr.bf16.mxu1 %v3521_v56 }
 0x532   : > { %v3596_v57 = vpop.eup %3595  ;;  %3607 = vpow2.f32 %v2014_v12  ;;  %2297 = vmatmul.mubr.bf16.gmra.mrb[92].mxu1 %v2174_v23  ;;  %v1838_v30 = vpop.xlane.xlu0 %1837  ;;  %3286 = vmatpush3.bf16.msra.mxu0 %v3521_v56  ;;  %v5746_v12 = vld [vmem:[#allocation30_spill] sm:$0xff] }
 0x533   : > { %v3598_v44 = vpop.eup %3597  ;;  %v1912_v8 = vsub.f32 %v5344_v33, %v1838_v30  ;;  %v1913_v19 = vsub.f32 %v5346_v27, %v1838_v30  ;;  %v2112_v4 = vadd.f32 %v3596_v57, %v3594_v22  ;;  %3363 = vmatpush3.bf16.msra.mxu1 %v3521_v56 }
 0x534   : > { %v3600_v58 = vpop.eup %3599  ;;  %v1841_v18 = vpop.xlane.xlu1 %1840  ;;  %v2176_v36 = vpack.c.bf16 %v3598_v44, %v3594_v22 }
 0x535   : > { %v2016_v9 = vmul.f32 1.442695, %v1912_v8  ;;  %v2018_v21 = vmul.f32 1.442695, %v1913_v19  ;;  %v1914_v45 = vsub.f32 %v5348_v40, %v1841_v18  ;;  %v1915_v47 = vsub.f32 %v5352_v32, %v1841_v18  ;;  %2113 = vadd.xlane.f32.xlu0 %v2112_v4  ;;  %v3522_v8 = vld [vmem:[#allocation14 + $0x18] sm:$0xff]  }
 0x536   : > { %v2177_v16 = vpack.c.bf16 %v3600_v58, %v3596_v57  ;;  %v2115_v15 = vadd.f32 %v3600_v58, %v3598_v44  ;;  %v5747_v57 = vld [vmem:[#allocation31_spill] sm:$0xff]  ;;  %3287 = vmatprep.subr.bf16.mxu0 %v3522_v8  ;;  %3356 = vmatprep.subr.bf16.mxu1 %v3522_v8 }
 0x537   : > { %3609 = vpow2.f32 %v2016_v9  ;;  %v2020_v63 = vmul.f32 1.442695, %v1914_v45  ;;  %v2022_v28 = vmul.f32 1.442695, %v1915_v47  ;;  %v5748_v9 = vld [vmem:[#allocation32_spill] sm:$0xff]  ;;  %v5749_v45 = vld [vmem:[#allocation33_spill] sm:$0xff]  ;;  %3288 = vmatpush3.bf16.msra.mxu0 %v3522_v8  ;;  %3364 = vmatpush3.bf16.msra.mxu1 %v3522_v8 }
 0x538   : > { %3611 = vpow2.f32 %v2018_v21  ;;  %2304 = vmatprep.mubr.bf16.mxu1 %v2177_v16  ;;  %2116 = vadd.xlane.f32.xlu1 %v2115_v15 }
 0x539   : > { %v3602_v33 = vpop.eup %3601  ;;  %3613 = vpow2.f32 %v2020_v63 }
 0x53a   : > { %v3604_v27 = vpop.eup %3603  ;;  %3615 = vpow2.f32 %v2022_v28  ;;  %2305 = vmatmul.mubr.bf16.gmra.mrb[96].mxu1 %v2176_v36  ;;  %v1844_v40 = vpop.xlane.xlu0 %1843 }
 0x53b   : > { %v3606_v32 = vpop.eup %3605  ;;  %v1916_v54 = vsub.f32 %v5356_v35, %v1844_v40  ;;  %v1917_v37 = vsub.f32 %v5358_v34, %v1844_v40  ;;  %v2118_v14 = vadd.f32 %v3604_v27, %v3602_v33 }
 0x53c   : > { %v3608_v39 = vpop.eup %3607  ;;  %v1847_v52 = vpop.xlane.xlu1 %1846  ;;  %v2178_v0 = vpack.c.bf16 %v3606_v32, %v3602_v33  ;;  %v3523_v33 = vld [vmem:[#allocation14 + $0x20] sm:$0xff]  }
 0x53d   : > { %v2024_v60 = vmul.f32 1.442695, %v1916_v54  ;;  %v2026_v31 = vmul.f32 1.442695, %v1917_v37  ;;  %v1918_v26 = vsub.f32 %v5360_v13, %v1847_v52  ;;  %v1919_v41 = vsub.f32 %v5364_v2, %v1847_v52  ;;  %2119 = vadd.xlane.f32.xlu0 %v2118_v14  ;;  %v5750_v54 = vld [vmem:[#allocation34_spill] sm:$0xff]  ;;  %v5751_v14 = vld [vmem:[#allocation35_spill] sm:$0xff]  ;;  %3289 = vmatprep.subr.bf16.mxu0 %v3523_v33 }
 0x53e   : > { %v2179_v24 = vpack.c.bf16 %v3608_v39, %v3604_v27  ;;  %v2121_v51 = vadd.f32 %v3608_v39, %v3606_v32  ;;  %3357 = vmatprep.subr.bf16.mxu1 %v3523_v33  ;;  %3290 = vmatpush3.bf16.msra.mxu0 %v3523_v33 }
 0x53f   : > { %3617 = vpow2.f32 %v2024_v60  ;;  %v2028_v17 = vmul.f32 1.442695, %v1918_v26  ;;  %v2030_v10 = vmul.f32 1.442695, %v1919_v41  ;;  %3365 = vmatpush3.bf16.msra.mxu1 %v3523_v33 }
 0x540   : > { %3619 = vpow2.f32 %v2026_v31  ;;  %2312 = vmatprep.mubr.bf16.mxu1 %v2179_v24  ;;  %2122 = vadd.xlane.f32.xlu1 %v2121_v51  ;;  %v5752_v51 = vld [vmem:[#allocation36_spill] sm:$0xff] }
 0x541   : > { %v3610_v35 = vpop.eup %3609  ;;  %3621 = vpow2.f32 %v2028_v17 }
 0x542   : > { %v3612_v34 = vpop.eup %3611  ;;  %3623 = vpow2.f32 %v2030_v10  ;;  %2313 = vmatmul.mubr.bf16.gmra.mrb[100].mxu1 %v2178_v0  ;;  %v1850_v61 = vpop.xlane.xlu0 %1849  ;;  %v3524_v0 = vld [vmem:[#allocation14 + $0x28] sm:$0xff]  }
 0x543   : > { %v3614_v7 = vpop.eup %3613  ;;  %v1920_v13 = vsub.f32 %v5368_v46, %v1850_v61  ;;  %v1921_v2 = vsub.f32 %v5370_v50, %v1850_v61  ;;  %v2124_v49 = vadd.f32 %v3612_v34, %v3610_v35  ;;  %v5753_v10 = vld [vmem:[#allocation37_spill] sm:$0xff]  ;;  %3291 = vmatprep.subr.bf16.mxu0 %v3524_v0  ;;  %3358 = vmatprep.subr.bf16.mxu1 %v3524_v0 }
 0x544   : > { %v3616_v59 = vpop.eup %3615  ;;  %v1853_v3 = vpop.xlane.xlu1 %1852  ;;  %v2180_v62 = vpack.c.bf16 %v3614_v7, %v3610_v35  ;;  %3292 = vmatpush3.bf16.msra.mxu0 %v3524_v0  ;;  %3366 = vmatpush3.bf16.msra.mxu1 %v3524_v0 }
 0x545   : > { %v2032_v53 = vmul.f32 1.442695, %v1920_v13  ;;  %v2034_v29 = vmul.f32 1.442695, %v1921_v2  ;;  %v1922_v25 = vsub.f32 %v5744_v1, %v1853_v3  ;;  %v1923_v23 = vsub.f32 %v5745_v42, %v1853_v3  ;;  %2125 = vadd.xlane.f32.xlu0 %v2124_v49  ;;  %v3525_v49 = vld [vmem:[#allocation14 + $0x30] sm:$0xff]   ;;  %v5755_v1 = vld [vmem:[#allocation39_spill] sm:$0xff] }
 0x546   : > { %v2181_v48 = vpack.c.bf16 %v3616_v59, %v3612_v34  ;;  %v2127_v6 = vadd.f32 %v3616_v59, %v3614_v7  ;;  %3293 = vmatprep.subr.bf16.mxu0 %v3525_v49  ;;  %3359 = vmatprep.subr.bf16.mxu1 %v3525_v49 }
 0x547   : > { %3625 = vpow2.f32 %v2032_v53  ;;  %v2036_v5 = vmul.f32 1.442695, %v1922_v25  ;;  %v2038_v11 = vmul.f32 1.442695, %v1923_v23  ;;  %v5754_v53 = vld [vmem:[#allocation38_spill] sm:$0xff] }
 0x548   : > { %3627 = vpow2.f32 %v2034_v29  ;;  %2320 = vmatprep.mubr.bf16.mxu1 %v2181_v48  ;;  %2128 = vadd.xlane.f32.xlu1 %v2127_v6 }
 0x549   : > { %v3618_v46 = vpop.eup %3617  ;;  %3629 = vpow2.f32 %v2036_v5  ;;  %3294 = vmatpush3.bf16.msra.mxu0 %v3525_v49  ;;  %3367 = vmatpush3.bf16.msra.mxu1 %v3525_v49 }
 0x54a   : > { %v3620_v50 = vpop.eup %3619  ;;  %3631 = vpow2.f32 %v2038_v11  ;;  %2321 = vmatmul.mubr.bf16.gmra.mrb[104].mxu1 %v2180_v62  ;;  %v1856_v38 = vpop.xlane.xlu0 %1855 }
 0x54b   : > { %v3622_v55 = vpop.eup %3621  ;;  %v1924_v22 = vsub.f32 %v5746_v12, %v1856_v38  ;;  %v1925_v30 = vsub.f32 %v5747_v57, %v1856_v38  ;;  %v2130_v44 = vadd.f32 %v3620_v50, %v3618_v46  ;;  %v3526_v38 = vld [vmem:[#allocation14 + $0x38] sm:$0xff]  }
 0x54c   : > { %v3624_v19 = vpop.eup %3623  ;;  %v1859_v4 = vpop.xlane.xlu1 %1858  ;;  %v2182_v58 = vpack.c.bf16 %v3622_v55, %v3618_v46  ;;  %v5756_v46 = vld [vmem:[#allocation40_spill] sm:$0xff]  ;;  %3295 = vmatprep.subr.bf16.mxu0 %v3526_v38  ;;  %3360 = vmatprep.subr.bf16.mxu1 %v3526_v38 }
 0x54d   : > { %v2040_v18 = vmul.f32 1.442695, %v1924_v22  ;;  %v2042_v36 = vmul.f32 1.442695, %v1925_v30  ;;  %v1926_v21 = vsub.f32 %v5748_v9, %v1859_v4  ;;  %v1927_v47 = vsub.f32 %v5749_v45, %v1859_v4  ;;  %2131 = vadd.xlane.f32.xlu0 %v2130_v44  ;;  %3296 = vmatpush3.bf16.msra.mxu0 %v3526_v38 }
 0x54e   : > { %v2183_v16 = vpack.c.bf16 %v3624_v19, %v3620_v50  ;;  %v2133_v15 = vadd.f32 %v3624_v19, %v3622_v55  ;;  %3368 = vmatpush3.bf16.msra.mxu1 %v3526_v38 }
 0x54f   : > { %3633 = vpow2.f32 %v2040_v18  ;;  %v2044_v43 = vmul.f32 1.442695, %v1926_v21  ;;  %v2046_v63 = vmul.f32 1.442695, %v1927_v47 }
 0x550   : > { %3635 = vpow2.f32 %v2042_v36  ;;  %2328 = vmatprep.mubr.bf16.mxu1 %v2183_v16  ;;  %2134 = vadd.xlane.f32.xlu1 %v2133_v15 }
 0x551   : > { %v3626_v28 = vpop.eup %3625  ;;  %3637 = vpow2.f32 %v2044_v43 }
 0x552   : > { %v3628_v27 = vpop.eup %3627  ;;  %3639 = vpow2.f32 %v2046_v63  ;;  %2329 = vmatmul.mubr.bf16.gmra.mrb[108].mxu1 %v2182_v58  ;;  %v1862_v40 = vpop.xlane.xlu0 %1861 }
 0x553   : > { %v3630_v32 = vpop.eup %3629  ;;  %v1928_v37 = vsub.f32 %v5750_v54, %v1862_v40  ;;  %v1929_v39 = vsub.f32 %v5751_v14, %v1862_v40  ;;  %v2136_v52 = vadd.f32 %v3628_v27, %v3626_v28 }
 0x554   : > { %v3632_v60 = vpop.eup %3631  ;;  %v1865_v31 = vpop.xlane.xlu1 %1864  ;;  %v2184_v26 = vpack.c.bf16 %v3630_v32, %v3626_v28 }
 0x555   : > { %v2048_v41 = vmul.f32 1.442695, %v1928_v37  ;;  %v2050_v24 = vmul.f32 1.442695, %v1929_v39  ;;  %v1930_v17 = vsub.f32 %v5752_v51, %v1865_v31  ;;  %v1931_v35 = vsub.f32 %v5753_v10, %v1865_v31  ;;  %2137 = vadd.xlane.f32.xlu0 %v2136_v52 }
 0x556   : > { %v2185_v34 = vpack.c.bf16 %v3632_v60, %v3628_v27  ;;  %v2139_v61 = vadd.f32 %v3632_v60, %v3630_v32 }
 0x557   : > { %3641 = vpow2.f32 %v2048_v41  ;;  %v2052_v7 = vmul.f32 1.442695, %v1930_v17  ;;  %v2054_v13 = vmul.f32 1.442695, %v1931_v35 }
 0x558   : > { %3643 = vpow2.f32 %v2050_v24  ;;  %2336 = vmatprep.mubr.bf16.mxu1 %v2185_v34  ;;  %2140 = vadd.xlane.f32.xlu1 %v2139_v61 }
 0x559   : > { %v3634_v2 = vpop.eup %3633  ;;  %3645 = vpow2.f32 %v2052_v7 }
 0x55a   : > { %v3636_v59 = vpop.eup %3635  ;;  %3647 = vpow2.f32 %v2054_v13  ;;  %2337 = vmatmul.mubr.bf16.gmra.mrb[112].mxu1 %v2184_v26  ;;  %v1868_v3 = vpop.xlane.xlu0 %1867 }
 0x55b   : > { %v3638_v62 = vpop.eup %3637  ;;  %v1932_v29 = vsub.f32 %v5754_v53, %v1868_v3  ;;  %v1933_v25 = vsub.f32 %v5755_v1, %v1868_v3  ;;  %v2142_v42 = vadd.f32 %v3636_v59, %v3634_v2 }
 0x55c   : > { %v3640_v23 = vpop.eup %3639  ;;  %v1871_v48 = vpop.xlane.xlu1 %1870  ;;  %v2186_v6 = vpack.c.bf16 %v3638_v62, %v3634_v2 }
 0x55d   : > { %v2056_v56 = vmul.f32 1.442695, %v1932_v29  ;;  %v2058_v5 = vmul.f32 1.442695, %v1933_v25  ;;  %2143 = vadd.xlane.f32.xlu0 %v2142_v42  ;;  %v1934_v11 = vsub.f32 %v5408_v20, %v1871_v48  ;;  %v1935_v50 = vsub.f32 %v5756_v46, %v1871_v48 }
 0x55e   : > { %v2187_v55 = vpack.c.bf16 %v3640_v23, %v3636_v59  ;;  %v2145_v12 = vadd.f32 %v3640_v23, %v3638_v62 }
 0x55f   : > { %3649 = vpow2.f32 %v2056_v56  ;;  %v2060_v22 = vmul.f32 1.442695, %v1934_v11  ;;  %v2062_v57 = vmul.f32 1.442695, %v1935_v50 }
 0x560   : > { %3651 = vpow2.f32 %v2058_v5  ;;  %2344 = vmatprep.mubr.bf16.mxu1 %v2187_v55  ;;  %2146 = vadd.xlane.f32.xlu1 %v2145_v12 }
 0x561   : > { %v3642_v30 = vpop.eup %3641  ;;  %3653 = vpow2.f32 %v2060_v22 }
 0x562   : > { %v3644_v44 = vpop.eup %3643  ;;  %3655 = vpow2.f32 %v2062_v57  ;;  %2345 = vmatmul.mubr.bf16.gmra.mrb[116].mxu1 %v2186_v6 }
 0x563   : > { %v3646_v20 = vpop.eup %3645  ;;  %v2148_v8 = vadd.f32 %v3644_v44, %v3642_v30 }
 0x564   : > { %v3648_v19 = vpop.eup %3647  ;;  %v2188_v4 = vpack.c.bf16 %v3646_v20, %v3642_v30 }
 0x565   : > { %2149 = vadd.xlane.f32.xlu0 %v2148_v8  ;;  %v2189_v58 = vpack.c.bf16 %v3648_v19, %v3644_v44  ;;  %v2151_v18 = vadd.f32 %v3648_v19, %v3646_v20 }
 0x567   : > { %2352 = vmatprep.mubr.bf16.mxu1 %v2189_v58  ;;  %2152 = vadd.xlane.f32.xlu1 %v2151_v18 }
 0x569   : > { %v3650_v36 = vpop.eup %3649 }
 0x56a   : > { %v3652_v9 = vpop.eup %3651  ;;  %2353 = vmatmul.mubr.bf16.gmra.mrb[120].mxu1 %v2188_v4 }
 0x56b   : > { %v3654_v21 = vpop.eup %3653  ;;  %v2154_v45 = vadd.f32 %v3652_v9, %v3650_v36 }
 0x56c   : > { %v3656_v47 = vpop.eup %3655  ;;  %v2190_v16 = vpack.c.bf16 %v3654_v21, %v3650_v36 }
 0x56d   : > { %2155 = vadd.xlane.f32.xlu0 %v2154_v45  ;;  %v2191_v15 = vpack.c.bf16 %v3656_v47, %v3652_v9  ;;  %v2157_v43 = vadd.f32 %v3656_v47, %v3654_v21 }
 0x56f   : > { %2360 = vmatprep.mubr.bf16.mxu1 %v2191_v15  ;;  %2158 = vadd.xlane.f32.xlu1 %v2157_v43 }
 0x572   : > { %2361 = vmatmul.mubr.bf16.gmra.mrb[124].mxu1 %v2190_v16 }
 0x582   : > { %v2066_v63 = vpop.xlane.xlu0 %2065 }
 0x583   : > { %3657 = vrcp.f32 %v2066_v63 }
 0x587   : > { %v2069_v28 = vpop.xlane.xlu1 %2068 }
 0x588   : > { %3659 = vrcp.f32 %v2069_v28 }
 0x58a   : > { %v2072_v33 = vpop.xlane.xlu0 %2071 }
 0x58b   : > { %3661 = vrcp.f32 %v2072_v33 }
 0x58d   : > { %v3658_v39 = vpop.eup %3657 }
 0x58f   : > { %v2075_v27 = vpop.xlane.xlu1 %2074 }
 0x590   : > { %3663 = vrcp.f32 %v2075_v27 }
 0x592   : > { %v3660_v0 = vpop.eup %3659  ;;  %v2078_v26 = vpop.xlane.xlu0 %2077 }
 0x593   : > { %3665 = vrcp.f32 %v2078_v26 }
 0x595   : > { %v2081_v41 = vpop.xlane.xlu1 %2080  ;;  %v3662_v61 = vpop.eup %3661 }
 0x596   : > { %3667 = vrcp.f32 %v2081_v41 }
 0x59a   : > { %v3664_v13 = vpop.eup %3663  ;;  %v2084_v59 = vpop.xlane.xlu0 %2083 }
 0x59b   : > { %3669 = vrcp.f32 %v2084_v59 }
 0x59d   : > { %v2087_v3 = vpop.xlane.xlu1 %2086  ;;  %v3666_v23 = vpop.eup %3665 }
 0x59e   : > { %3671 = vrcp.f32 %v2087_v3 }
 0x5a0   : > { %v3668_v6 = vpop.eup %3667 }
 0x5a2   : > { %v2090_v11 = vpop.xlane.xlu0 %2089 }
 0x5a3   : > { %3673 = vrcp.f32 %v2090_v11 }
 0x5a5   : > { %v2093_v46 = vpop.xlane.xlu1 %2092  ;;  %v3670_v30 = vpop.eup %3669 }
 0x5a6   : > { %3675 = vrcp.f32 %v2093_v46 }
 0x5a8   : > { %v3672_v20 = vpop.eup %3671 }
 0x5aa   : > { %v2096_v4 = vpop.xlane.xlu0 %2095 }
 0x5ab   : > { %3677 = vrcp.f32 %v2096_v4 }
 0x5ad   : > { %v2099_v58 = vpop.xlane.xlu1 %2098  ;;  %v3674_v16 = vpop.eup %3673 }
 0x5ae   : > { %3679 = vrcp.f32 %v2099_v58 }
 0x5b0   : > { %v3676_v43 = vpop.eup %3675 }
 0x5b2   : > { %v2102_v33 = vpop.xlane.xlu0 %2101 }
 0x5b3   : > { %3681 = vrcp.f32 %v2102_v33 }
 0x5b5   : > { %v2105_v27 = vpop.xlane.xlu1 %2104 }
 0x5b6   : > { %3683 = vrcp.f32 %v2105_v27 }
 0x5ba   : > { %v2108_v41 = vpop.xlane.xlu0 %2107 }
 0x5bb   : > { %3685 = vrcp.f32 %v2108_v41 }
 0x5c2   : > { %v2114_v3 = vpop.xlane.xlu0 %2113 }
 0x5ca   : > { %v2120_v46 = vpop.xlane.xlu0 %2119 }
 0x5cd   : > { %v3078_v40 = vpop.f32.mrb[64].mxu1 }
 0x5ce   : > { %v3079_v32 = vpop.f32.mrb[65].mxu1 }
 0x5cf   : > { %v3080_v54 = vadd.f32 %v3079_v32, %v3078_v40  ;;  %v3081_v37 = vpop.f32.mrb[66].mxu1 }
 0x5d0   : > { %v3082_v14 = vpop.f32.mrb[67].mxu1 }
 0x5d1   : > { %v3083_v52 = vadd.f32 %v3082_v14, %v3081_v37  ;;  %v2401_v60 = vmul.f32 %v3658_v39, %v3080_v54 }
 0x5d2   : > { %v2126_v58 = vpop.xlane.xlu0 %2125 }
 0x5d3   : > { %v2402_v31 = vmul.f32 %v3660_v0, %v3083_v52  ;;  %v3678_v52 = vpop.eup %3677 }
 0x5d5   : > { %v3084_v24 = vpop.f32.mrb[68].mxu1  ;;  %v2433_v51 = vpack.c.bf16 %v2402_v31, %v2401_v60  ;;  %v3680_v60 = vpop.eup %3679 }
 0x5d6   : > { %v3085_v17 = vpop.f32.mrb[69].mxu1 }
 0x5d7   : > { %v3086_v10 = vadd.f32 %v3085_v17, %v3084_v24  ;;  %v3087_v35 = vpop.f32.mrb[70].mxu1  ;;  %3297 = vmatprep.mubr.bf16.mxu0 %v2433_v51  ;;  %v2111_v24 = vpop.xlane.xlu1 %2110 }
 0x5d8   : > { %v3088_v34 = vpop.f32.mrb[71].mxu1  ;;  %3687 = vrcp.f32 %v2111_v24 }
 0x5d9   : > { %v3089_v7 = vadd.f32 %v3088_v34, %v3087_v35  ;;  %v2403_v2 = vmul.f32 %v3662_v61, %v3086_v10  ;;  %3689 = vrcp.f32 %v2114_v3 }
 0x5da   : > { %v2132_v27 = vpop.xlane.xlu0 %2131 }
 0x5db   : > { %v2404_v49 = vmul.f32 %v3664_v13, %v3089_v7  ;;  %v3682_v7 = vpop.eup %3681 }
 0x5dd   : > { %v2434_v62 = vpack.c.bf16 %v2404_v49, %v2403_v2  ;;  %v3090_v53 = vpop.f32.mrb[72].mxu1  ;;  %v3684_v2 = vpop.eup %3683 }
 0x5de   : > { %v3091_v29 = vpop.f32.mrb[73].mxu1 }
 0x5df   : > { %v3092_v1 = vadd.f32 %v3091_v29, %v3090_v53  ;;  %v3093_v25 = vpop.f32.mrb[74].mxu1  ;;  %3298 = vmatmul.mubr.bf16.vlgmr.msra.gmra.mrb[100].mxu0 %v2434_v62  ;;  %v2117_v62 = vpop.xlane.xlu1 %2116 }
 0x5e0   : > { %v3094_v42 = vpop.f32.mrb[75].mxu1  ;;  %3691 = vrcp.f32 %v2117_v62 }
 0x5e1   : > { %v3095_v48 = vadd.f32 %v3094_v42, %v3093_v25  ;;  %v2405_v56 = vmul.f32 %v3666_v23, %v3092_v1  ;;  %3693 = vrcp.f32 %v2120_v46 }
 0x5e2   : > { %v2138_v24 = vpop.xlane.xlu0 %2137 }
 0x5e3   : > { %v2406_v5 = vmul.f32 %v3668_v6, %v3095_v48  ;;  %v3686_v48 = vpop.eup %3685 }
 0x5e5   : > { %v3096_v50 = vpop.f32.mrb[76].mxu1  ;;  %v2435_v38 = vpack.c.bf16 %v2406_v5, %v2405_v56  ;;  %v3688_v56 = vpop.eup %3687 }
 0x5e6   : > { %v3097_v55 = vpop.f32.mrb[77].mxu1 }
 0x5e7   : > { %v3098_v12 = vadd.f32 %v3097_v55, %v3096_v50  ;;  %v3099_v22 = vpop.f32.mrb[78].mxu1  ;;  %3301 = vmatprep.mubr.bf16.mxu0 %v2435_v38  ;;  %v2123_v50 = vpop.xlane.xlu1 %2122 }
 0x5e8   : > { %v3100_v57 = vpop.f32.mrb[79].mxu1  ;;  %3695 = vrcp.f32 %v2123_v50 }
 0x5e9   : > { %v3101_v44 = vadd.f32 %v3100_v57, %v3099_v22  ;;  %v2407_v8 = vmul.f32 %v3670_v30, %v3098_v12  ;;  %3697 = vrcp.f32 %v2126_v58 }
 0x5ea   : > { %v2144_v62 = vpop.xlane.xlu0 %2143 }
 0x5eb   : > { %v2408_v19 = vmul.f32 %v3672_v20, %v3101_v44  ;;  %v3690_v44 = vpop.eup %3689 }
 0x5ed   : > { %v3102_v18 = vpop.f32.mrb[80].mxu1  ;;  %v2436_v36 = vpack.c.bf16 %v2408_v19, %v2407_v8  ;;  %v3692_v8 = vpop.eup %3691 }
 0x5ee   : > { %v3103_v9 = vpop.f32.mrb[81].mxu1 }
 0x5ef   : > { %v3104_v21 = vadd.f32 %v3103_v9, %v3102_v18  ;;  %v3105_v45 = vpop.f32.mrb[82].mxu1  ;;  %3302 = vmatmul.mubr.bf16.gmra.mrb[104].mxu0 %v2436_v36  ;;  %v2129_v18 = vpop.xlane.xlu1 %2128 }
 0x5f0   : > { %v3106_v47 = vpop.f32.mrb[83].mxu1  ;;  %3699 = vrcp.f32 %v2129_v18 }
 0x5f1   : > { %v3107_v15 = vadd.f32 %v3106_v47, %v3105_v45  ;;  %v2409_v63 = vmul.f32 %v3674_v16, %v3104_v21  ;;  %3701 = vrcp.f32 %v2132_v27 }
 0x5f2   : > { %v2150_v50 = vpop.xlane.xlu0 %2149 }
 0x5f3   : > { %v2410_v28 = vmul.f32 %v3676_v43, %v3107_v15  ;;  %v3694_v15 = vpop.eup %3693 }
 0x5f5   : > { %v3108_v40 = vpop.f32.mrb[84].mxu1  ;;  %v2437_v32 = vpack.c.bf16 %v2410_v28, %v2409_v63  ;;  %v3696_v63 = vpop.eup %3695 }
 0x5f6   : > { %v3109_v54 = vpop.f32.mrb[85].mxu1 }
 0x5f7   : > { %v3110_v37 = vadd.f32 %v3109_v54, %v3108_v40  ;;  %v3111_v14 = vpop.f32.mrb[86].mxu1  ;;  %3305 = vmatprep.mubr.bf16.mxu0 %v2437_v32  ;;  %v2135_v40 = vpop.xlane.xlu1 %2134 }
 0x5f8   : > { %v3112_v39 = vpop.f32.mrb[87].mxu1  ;;  %3703 = vrcp.f32 %v2135_v40 }
 0x5f9   : > { %v3113_v0 = vadd.f32 %v3112_v39, %v3111_v14  ;;  %v2411_v31 = vmul.f32 %v3678_v52, %v3110_v37  ;;  %3705 = vrcp.f32 %v2138_v24  ;;  %v5483_v24 = vld [vmem:[%s5648_s8] ss:$0 sm:$0xff] }
 0x5fa   : > { %v2156_v18 = vpop.xlane.xlu0 %2155 }
 0x5fb   : > { %v2412_v26 = vmul.f32 %v3680_v60, %v3113_v0  ;;  %v3698_v0 = vpop.eup %3697 }
 0x5fd   : > { %v3114_v51 = vpop.f32.mrb[88].mxu1  ;;  %v2438_v17 = vpack.c.bf16 %v2412_v26, %v2411_v31  ;;  %v3700_v31 = vpop.eup %3699 }
 0x5fe   : > { %v3115_v10 = vpop.f32.mrb[89].mxu1 }
 0x5ff   : > { %v3116_v35 = vadd.f32 %v3115_v10, %v3114_v51  ;;  %v3117_v34 = vpop.f32.mrb[90].mxu1  ;;  %3306 = vmatmul.mubr.bf16.gmra.mrb[108].mxu0 %v2438_v17  ;;  %v2141_v51 = vpop.xlane.xlu1 %2140 }
 0x600   : > { %v3118_v61 = vpop.f32.mrb[91].mxu1  ;;  %3707 = vrcp.f32 %v2141_v51 }
 0x601   : > { %v3119_v13 = vadd.f32 %v3118_v61, %v3117_v34  ;;  %v2413_v49 = vmul.f32 %v3682_v7, %v3116_v35  ;;  %3709 = vrcp.f32 %v2144_v62  ;;  %v3723_v62 = vld [vmem:[%s4390_s27 + $0x18] sm:$0xff] }
 0x603   : > { %v2414_v59 = vmul.f32 %v3684_v2, %v3119_v13  ;;  %v3702_v13 = vpop.eup %3701 }
 0x605   : > { %v3120_v53 = vpop.f32.mrb[92].mxu1  ;;  %v2439_v29 = vpack.c.bf16 %v2414_v59, %v2413_v49  ;;  %v3704_v49 = vpop.eup %3703 }
 0x606   : > { %v3121_v1 = vpop.f32.mrb[93].mxu1 }
 0x607   : > { %v3122_v25 = vadd.f32 %v3121_v1, %v3120_v53  ;;  %v3123_v42 = vpop.f32.mrb[94].mxu1  ;;  %3309 = vmatprep.mubr.bf16.mxu0 %v2439_v29  ;;  %v2147_v53 = vpop.xlane.xlu1 %2146 }
 0x608   : > { %v3124_v23 = vpop.f32.mrb[95].mxu1  ;;  %3711 = vrcp.f32 %v2147_v53 }
 0x609   : > { %v3125_v6 = vadd.f32 %v3124_v23, %v3123_v42  ;;  %v2415_v5 = vmul.f32 %v3686_v48, %v3122_v25  ;;  %3713 = vrcp.f32 %v2150_v50  ;;  %v3726_v50 = vld [vmem:[%s4390_s27 + $0x20] sm:$0xff] }
 0x60b   : > { %v2416_v11 = vmul.f32 %v3688_v56, %v3125_v6  ;;  %v3706_v6 = vpop.eup %3705 }
 0x60d   : > { %v3126_v38 = vpop.f32.mrb[96].mxu1  ;;  %v2440_v55 = vpack.c.bf16 %v2416_v11, %v2415_v5  ;;  %v3708_v5 = vpop.eup %3707 }
 0x60e   : > { %v3127_v12 = vpop.f32.mrb[97].mxu1 }
 0x60f   : > { %v3128_v22 = vadd.f32 %v3127_v12, %v3126_v38  ;;  %v3129_v57 = vpop.f32.mrb[98].mxu1  ;;  %3310 = vmatmul.mubr.bf16.gmra.mrb[112].mxu0 %v2440_v55  ;;  %v2153_v38 = vpop.xlane.xlu1 %2152 }
 0x610   : > { %v3130_v30 = vpop.f32.mrb[99].mxu1  ;;  %3715 = vrcp.f32 %v2153_v38 }
 0x611   : > { %v3131_v20 = vadd.f32 %v3130_v30, %v3129_v57  ;;  %v2417_v19 = vmul.f32 %v3690_v44, %v3128_v22  ;;  %3717 = vrcp.f32 %v2156_v18 }
 0x613   : > { %v2418_v4 = vmul.f32 %v3692_v8, %v3131_v20  ;;  %v3710_v20 = vpop.eup %3709 }
 0x615   : > { %v3132_v36 = vpop.f32.mrb[100].mxu1  ;;  %v2441_v9 = vpack.c.bf16 %v2418_v4, %v2417_v19  ;;  %v3712_v19 = vpop.eup %3711 }
 0x616   : > { %v3133_v21 = vpop.f32.mrb[101].mxu1 }
 0x617   : > { %v3134_v45 = vadd.f32 %v3133_v21, %v3132_v36  ;;  %v3135_v47 = vpop.f32.mrb[102].mxu1  ;;  %3313 = vmatprep.mubr.bf16.mxu0 %v2441_v9  ;;  %v2159_v36 = vpop.xlane.xlu1 %2158 }
 0x618   : > { %v3136_v16 = vpop.f32.mrb[103].mxu1  ;;  %3719 = vrcp.f32 %v2159_v36 }
 0x619   : > { %v3137_v43 = vadd.f32 %v3136_v16, %v3135_v47  ;;  %v2419_v28 = vmul.f32 %v3694_v15, %v3134_v45 }
 0x61b   : > { %v2420_v33 = vmul.f32 %v3696_v63, %v3137_v43  ;;  %v3714_v43 = vpop.eup %3713 }
 0x61d   : > { %v3138_v32 = vpop.f32.mrb[104].mxu1  ;;  %v2442_v54 = vpack.c.bf16 %v2420_v33, %v2419_v28  ;;  %v3716_v28 = vpop.eup %3715 }
 0x61e   : > { %v3139_v37 = vpop.f32.mrb[105].mxu1 }
 0x61f   : > { %v3140_v14 = vadd.f32 %v3139_v37, %v3138_v32  ;;  %v3141_v39 = vpop.f32.mrb[106].mxu1  ;;  %3314 = vmatmul.mubr.bf16.gmra.mrb[116].mxu0 %v2442_v54 }
 0x620   : > { %v3142_v52 = vpop.f32.mrb[107].mxu1 }
 0x621   : > { %v3143_v60 = vadd.f32 %v3142_v52, %v3141_v39  ;;  %v2421_v26 = vmul.f32 %v3698_v0, %v3140_v14  ;;  %v3718_v52 = vpop.eup %3717 }
 0x623   : > { %v2422_v41 = vmul.f32 %v3700_v31, %v3143_v60  ;;  %v3720_v60 = vpop.eup %3719 }
 0x625   : > { %v3144_v17 = vpop.f32.mrb[108].mxu1  ;;  %v2443_v10 = vpack.c.bf16 %v2422_v41, %v2421_v26 }
 0x626   : > { %v3145_v35 = vpop.f32.mrb[109].mxu1 }
 0x627   : > { %v3146_v34 = vadd.f32 %v3145_v35, %v3144_v17  ;;  %v3147_v61 = vpop.f32.mrb[110].mxu1  ;;  %3317 = vmatprep.mubr.bf16.mxu0 %v2443_v10 }
 0x628   : > { %v3148_v7 = vpop.f32.mrb[111].mxu1 }
 0x629   : > { %v3149_v2 = vadd.f32 %v3148_v7, %v3147_v61  ;;  %v2423_v59 = vmul.f32 %v3702_v13, %v3146_v34  ;;  %v3721_v61 = vld [vmem:[%s4390_s27 + $0x10] sm:$0xff] }
 0x62b   : > { %v2424_v3 = vmul.f32 %v3704_v49, %v3149_v2  ;;  %v3722_v49 = vld [vmem:[%s4390_s27] sm:$0xff] }
 0x62d   : > { %v3150_v29 = vpop.f32.mrb[112].mxu1  ;;  %v2444_v1 = vpack.c.bf16 %v2424_v3, %v2423_v59 }
 0x62e   : > { %v3151_v25 = vpop.f32.mrb[113].mxu1 }
 0x62f   : > { %v3152_v42 = vadd.f32 %v3151_v25, %v3150_v29  ;;  %v3153_v23 = vpop.f32.mrb[114].mxu1  ;;  %3318 = vmatmul.mubr.bf16.gmra.mrb[120].mxu0 %v2444_v1  ;;  %v3724_v29 = vld [vmem:[%s4390_s27 + $0x8] sm:$0xff] }
 0x630   : > { %v3154_v48 = vpop.f32.mrb[115].mxu1 }
 0x631   : > { %v3155_v56 = vadd.f32 %v3154_v48, %v3153_v23  ;;  %v2425_v11 = vmul.f32 %v3706_v6, %v3152_v42 }
 0x633   : > { %v2426_v46 = vmul.f32 %v3708_v5, %v3155_v56  ;;  %v3725_v56 = vld [vmem:[%s4390_s27 + $0x30] sm:$0xff] }
 0x635   : > { %v3156_v55 = vpop.f32.mrb[116].mxu1  ;;  %v2445_v12 = vpack.c.bf16 %v2426_v46, %v2425_v11 }
 0x636   : > { %v3157_v22 = vpop.f32.mrb[117].mxu1 }
 0x637   : > { %v3158_v57 = vadd.f32 %v3157_v22, %v3156_v55  ;;  %v3159_v30 = vpop.f32.mrb[118].mxu1  ;;  %3321 = vmatprep.mubr.bf16.mxu1 %v2445_v12  ;;  %v3727_v12 = vld [vmem:[%s4390_s27 + $0x38] sm:$0xff] }
 0x638   : > { %v3160_v44 = vpop.f32.mrb[119].mxu1 }
 0x639   : > { %v3161_v8 = vadd.f32 %v3160_v44, %v3159_v30  ;;  %v2427_v4 = vmul.f32 %v3710_v20, %v3158_v57  ;;  %v3728_v57 = vld [vmem:[%s4390_s27 + $0x28] sm:$0xff] }
 0x63b   : > { %v2428_v58 = vmul.f32 %v3712_v19, %v3161_v8 }
 0x63d   : > { %v2446_v9 = vpack.c.bf16 %v2428_v58, %v2427_v4  ;;  %v3162_v21 = vpop.f32.mrb[120].mxu1  ;;  %v3729_v58 = vld [vmem:[%s4390_s27 + $0x50] sm:$0xff] }
 0x63e   : > { %v3163_v45 = vpop.f32.mrb[121].mxu1 }
 0x63f   : > { %v3164_v47 = vadd.f32 %v3163_v45, %v3162_v21  ;;  %v3165_v16 = vpop.f32.mrb[122].mxu1  ;;  %3322 = vmatmul.mubr.bf16.vlgmr.msra.gmra.mrb[128].mxu1 %v2446_v9  ;;  %v3730_v21 = vld [vmem:[%s4390_s27 + $0x40] sm:$0xff] }
 0x640   : > { %v3166_v15 = vpop.f32.mrb[123].mxu1 }
 0x641   : > { %v3167_v63 = vadd.f32 %v3166_v15, %v3165_v16  ;;  %v2429_v33 = vmul.f32 %v3714_v43, %v3164_v47  ;;  %v3731_v16 = vld [vmem:[%s4390_s27 + $0x58] sm:$0xff]  ;;  %v3732_v43 = vld [vmem:[%s4390_s27 + $0x48] sm:$0xff] }
 0x643   : > { %v2430_v27 = vmul.f32 %v3716_v28, %v3167_v63 }
 0x645   : > { %v3168_v40 = vpop.f32.mrb[124].mxu1  ;;  %v2447_v32 = vpack.c.bf16 %v2430_v27, %v2429_v33 }
 0x646   : > { %v3169_v54 = vpop.f32.mrb[125].mxu1 }
 0x647   : > { %v3170_v37 = vadd.f32 %v3169_v54, %v3168_v40  ;;  %v3171_v14 = vpop.f32.mrb[126].mxu1  ;;  %3325 = vmatprep.mubr.bf16.mxu1 %v2447_v32  ;;  %v3733_v54 = vld [vmem:[%s4390_s27 + $0x70] sm:$0xff] }
 0x648   : > { %v3172_v39 = vpop.f32.mrb[127].mxu1 }
 0x649   : > { %v3173_v0 = vadd.f32 %v3172_v39, %v3171_v14  ;;  %v2431_v31 = vmul.f32 %v3718_v52, %v3170_v37  ;;  %v3734_v52 = vld [vmem:[%s4390_s27 + $0x60] sm:$0xff] }
 0x64b   : > { %v2432_v26 = vmul.f32 %v3720_v60, %v3173_v0 }
 0x64d   : > { %v2448_v41 = vpack.c.bf16 %v2432_v26, %v2431_v31  ;;  %v3735_v31 = vld [vmem:[%s4390_s27 + $0x78] sm:$0xff] }
 0x64f   : > { %3326 = vmatmul.mubr.bf16.gmra.mrb[132].mxu1 %v2448_v41  ;;  %v3736_v41 = vld [vmem:[%s4390_s27 + $0x68] sm:$0xff] }
 0x6b2   : > { %v3299_v51 = vpop.f32.mrb[100].mxu0 }
 0x6b3   : > { %v2563_v17 = vadd.f32 %v3299_v51, %v5483_v24  ;;  %v2554_v10 = vpop.f32.mrb[101].mxu0 }
 0x6b4   : > { %v2555_v35 = vadd.f32 %v5483_v24, %v2554_v10  ;;  %v3300_v34 = vpop.f32.mrb[102].mxu0 }
 0x6b5   : > { %v2683_v7 = vadd.f32 %v3721_v61, %v2563_v17  ;;  %v2566_v13 = vadd.f32 %v3300_v34, %v5483_v24  ;;  %v2557_v2 = vpop.f32.mrb[103].mxu0 }
 0x6b6   : > { %v2681_v59 = vadd.f32 %v3722_v49, %v2555_v35  ;;  %v2558_v3 = vadd.f32 %v5483_v24, %v2557_v2 }
 0x6b7   : > { %2715 = vst [vmem:[%s5492_s21 + $0x10] sm:$0xff] %v2683_v7  ;;  %v2684_v53 = vadd.f32 %v3723_v62, %v2566_v13  ;;  %v3737_v7 = vld [vmem:[%s4390_s27 + $0x90] sm:$0xff] }
 0x6b8   : > { %2713 = vst [vmem:[%s5492_s21] sm:$0xff] %v2681_v59  ;;  %v2682_v1 = vadd.f32 %v3724_v29, %v2558_v3  ;;  %v3738_v59 = vld [vmem:[%s4390_s27 + $0x80] sm:$0xff] }
 0x6b9   : > { %2716 = vst [vmem:[%s5492_s21 + $0x18] sm:$0xff] %v2684_v53  ;;  %v3739_v53 = vld [vmem:[%s4390_s27 + $0x98] sm:$0xff] }
 0x6ba   : > { %2714 = vst [vmem:[%s5492_s21 + $0x8] sm:$0xff] %v2682_v1  ;;  %v3740_v1 = vld [vmem:[%s4390_s27 + $0x88] sm:$0xff] }
 0x6c2   : > { %v3303_v25 = vpop.f32.mrb[104].mxu0 }
 0x6c3   : > { %v2579_v42 = vadd.f32 %v3303_v25, %v5483_v24  ;;  %v2570_v23 = vpop.f32.mrb[105].mxu0 }
 0x6c4   : > { %v2571_v48 = vadd.f32 %v5483_v24, %v2570_v23  ;;  %v3304_v6 = vpop.f32.mrb[106].mxu0 }
 0x6c5   : > { %v2687_v5 = vadd.f32 %v3725_v56, %v2579_v42  ;;  %v2582_v11 = vadd.f32 %v3304_v6, %v5483_v24  ;;  %v2573_v46 = vpop.f32.mrb[107].mxu0 }
 0x6c6   : > { %v2685_v38 = vadd.f32 %v3726_v50, %v2571_v48  ;;  %v2574_v55 = vadd.f32 %v5483_v24, %v2573_v46 }
 0x6c7   : > { %2719 = vst [vmem:[%s5492_s21 + $0x30] sm:$0xff] %v2687_v5  ;;  %v2688_v22 = vadd.f32 %v3727_v12, %v2582_v11  ;;  %v3741_v5 = vld [vmem:[%s4390_s27 + $0xb0] sm:$0xff] }
 0x6c8   : > { %2717 = vst [vmem:[%s5492_s21 + $0x20] sm:$0xff] %v2685_v38  ;;  %v2686_v30 = vadd.f32 %v3728_v57, %v2574_v55  ;;  %v3742_v38 = vld [vmem:[%s4390_s27 + $0xa0] sm:$0xff] }
 0x6c9   : > { %2720 = vst [vmem:[%s5492_s21 + $0x38] sm:$0xff] %v2688_v22  ;;  %v3743_v22 = vld [vmem:[%s4390_s27 + $0xb8] sm:$0xff] }
 0x6ca   : > { %2718 = vst [vmem:[%s5492_s21 + $0x28] sm:$0xff] %v2686_v30  ;;  %v3744_v30 = vld [vmem:[%s4390_s27 + $0xa8] sm:$0xff] }
 0x6d2   : > { %v3307_v44 = vpop.f32.mrb[108].mxu0 }
 0x6d3   : > { %v2595_v20 = vadd.f32 %v3307_v44, %v5483_v24  ;;  %v2586_v8 = vpop.f32.mrb[109].mxu0 }
 0x6d4   : > { %v2587_v19 = vadd.f32 %v5483_v24, %v2586_v8  ;;  %v3308_v4 = vpop.f32.mrb[110].mxu0 }
 0x6d5   : > { %v2691_v18 = vadd.f32 %v3729_v58, %v2595_v20  ;;  %v2598_v36 = vadd.f32 %v3308_v4, %v5483_v24  ;;  %v2589_v9 = vpop.f32.mrb[111].mxu0 }
 0x6d6   : > { %v2689_v45 = vadd.f32 %v3730_v21, %v2587_v19  ;;  %v2590_v47 = vadd.f32 %v5483_v24, %v2589_v9 }
 0x6d7   : > { %2723 = vst [vmem:[%s5492_s21 + $0x50] sm:$0xff] %v2691_v18  ;;  %v2692_v15 = vadd.f32 %v3731_v16, %v2598_v36  ;;  %v3745_v18 = vld [vmem:[%s4390_s27 + $0xd0] sm:$0xff] }
 0x6d8   : > { %2721 = vst [vmem:[%s5492_s21 + $0x40] sm:$0xff] %v2689_v45  ;;  %v2690_v63 = vadd.f32 %v3732_v43, %v2590_v47  ;;  %v3746_v45 = vld [vmem:[%s4390_s27 + $0xc0] sm:$0xff] }
 0x6d9   : > { %2724 = vst [vmem:[%s5492_s21 + $0x58] sm:$0xff] %v2692_v15  ;;  %v3747_v15 = vld [vmem:[%s4390_s27 + $0xd8] sm:$0xff] }
 0x6da   : > { %2722 = vst [vmem:[%s5492_s21 + $0x48] sm:$0xff] %v2690_v63  ;;  %v3748_v63 = vld [vmem:[%s4390_s27 + $0xc8] sm:$0xff] }
 0x6e2   : > { %v3311_v28 = vpop.f32.mrb[112].mxu0 }
 0x6e3   : > { %v2611_v33 = vadd.f32 %v3311_v28, %v5483_v24  ;;  %v2602_v27 = vpop.f32.mrb[113].mxu0 }
 0x6e4   : > { %v2603_v40 = vadd.f32 %v5483_v24, %v2602_v27  ;;  %v3312_v32 = vpop.f32.mrb[114].mxu0 }
 0x6e5   : > { %v2695_v37 = vadd.f32 %v3733_v54, %v2611_v33  ;;  %v2614_v14 = vadd.f32 %v3312_v32, %v5483_v24  ;;  %v2605_v39 = vpop.f32.mrb[115].mxu0 }
 0x6e6   : > { %v2693_v0 = vadd.f32 %v3734_v52, %v2603_v40  ;;  %v2606_v60 = vadd.f32 %v5483_v24, %v2605_v39 }
 0x6e7   : > { %2727 = vst [vmem:[%s5492_s21 + $0x70] sm:$0xff] %v2695_v37  ;;  %v2696_v26 = vadd.f32 %v3735_v31, %v2614_v14  ;;  %v3749_v37 = vld [vmem:[%s4390_s27 + $0xf0] sm:$0xff] }
 0x6e8   : > { %2725 = vst [vmem:[%s5492_s21 + $0x60] sm:$0xff] %v2693_v0  ;;  %v2694_v51 = vadd.f32 %v3736_v41, %v2606_v60  ;;  %v3750_v0 = vld [vmem:[%s4390_s27 + $0xe0] sm:$0xff] }
 0x6e9   : > { %2728 = vst [vmem:[%s5492_s21 + $0x78] sm:$0xff] %v2696_v26  ;;  %v3751_v26 = vld [vmem:[%s4390_s27 + $0xf8] sm:$0xff] }
 0x6ea   : > { %2726 = vst [vmem:[%s5492_s21 + $0x68] sm:$0xff] %v2694_v51  ;;  %v3752_v51 = vld [vmem:[%s4390_s27 + $0xe8] sm:$0xff] }
 0x6f2   : > { %v3315_v17 = vpop.f32.mrb[116].mxu0 }
 0x6f3   : > { %v2627_v10 = vadd.f32 %v3315_v17, %v5483_v24  ;;  %v2618_v35 = vpop.f32.mrb[117].mxu0 }
 0x6f4   : > { %v2619_v34 = vadd.f32 %v5483_v24, %v2618_v35  ;;  %v3316_v61 = vpop.f32.mrb[118].mxu0 }
 0x6f5   : > { %v2699_v13 = vadd.f32 %v3737_v7, %v2627_v10  ;;  %v2630_v2 = vadd.f32 %v3316_v61, %v5483_v24  ;;  %v2621_v49 = vpop.f32.mrb[119].mxu0 }
 0x6f6   : > { %v2697_v3 = vadd.f32 %v3738_v59, %v2619_v34  ;;  %v2622_v62 = vadd.f32 %v5483_v24, %v2621_v49 }
 0x6f7   : > { %2731 = vst [vmem:[%s5492_s21 + $0x90] sm:$0xff] %v2699_v13  ;;  %v2700_v29 = vadd.f32 %v3739_v53, %v2630_v2 }
 0x6f8   : > { %2729 = vst [vmem:[%s5492_s21 + $0x80] sm:$0xff] %v2697_v3  ;;  %v2698_v25 = vadd.f32 %v3740_v1, %v2622_v62 }
 0x6f9   : > { %2732 = vst [vmem:[%s5492_s21 + $0x98] sm:$0xff] %v2700_v29 }
 0x6fa   : > { %2730 = vst [vmem:[%s5492_s21 + $0x88] sm:$0xff] %v2698_v25 }
 0x702   : > { %v3319_v42 = vpop.f32.mrb[120].mxu0 }
 0x703   : > { %v2643_v23 = vadd.f32 %v3319_v42, %v5483_v24  ;;  %v2634_v48 = vpop.f32.mrb[121].mxu0 }
 0x704   : > { %v2635_v6 = vadd.f32 %v5483_v24, %v2634_v48  ;;  %v3320_v56 = vpop.f32.mrb[122].mxu0 }
 0x705   : > { %v2703_v11 = vadd.f32 %v3741_v5, %v2643_v23  ;;  %v2646_v46 = vadd.f32 %v3320_v56, %v5483_v24  ;;  %v2637_v50 = vpop.f32.mrb[123].mxu0 }
 0x706   : > { %v2701_v55 = vadd.f32 %v3742_v38, %v2635_v6  ;;  %v2638_v12 = vadd.f32 %v5483_v24, %v2637_v50 }
 0x707   : > { %2735 = vst [vmem:[%s5492_s21 + $0xb0] sm:$0xff] %v2703_v11  ;;  %v2704_v57 = vadd.f32 %v3743_v22, %v2646_v46 }
 0x708   : > { %2733 = vst [vmem:[%s5492_s21 + $0xa0] sm:$0xff] %v2701_v55  ;;  %v2702_v44 = vadd.f32 %v3744_v30, %v2638_v12 }
 0x709   : > { %2736 = vst [vmem:[%s5492_s21 + $0xb8] sm:$0xff] %v2704_v57 }
 0x70a   : > { %2734 = vst [vmem:[%s5492_s21 + $0xa8] sm:$0xff] %v2702_v44 }
 0x712   : > { %v3323_v20 = vpop.f32.mrb[128].mxu1 }
 0x713   : > { %v2659_v8 = vadd.f32 %v3323_v20, %v5483_v24  ;;  %v2650_v19 = vpop.f32.mrb[129].mxu1 }
 0x714   : > { %v2651_v4 = vadd.f32 %v5483_v24, %v2650_v19  ;;  %v3324_v58 = vpop.f32.mrb[130].mxu1 }
 0x715   : > { %v2707_v36 = vadd.f32 %v3745_v18, %v2659_v8  ;;  %v2662_v9 = vadd.f32 %v3324_v58, %v5483_v24  ;;  %v2653_v21 = vpop.f32.mrb[131].mxu1 }
 0x716   : > { %v2705_v47 = vadd.f32 %v3746_v45, %v2651_v4  ;;  %v2654_v16 = vadd.f32 %v5483_v24, %v2653_v21 }
 0x717   : > { %2739 = vst [vmem:[%s5492_s21 + $0xd0] sm:$0xff] %v2707_v36  ;;  %v2708_v43 = vadd.f32 %v3747_v15, %v2662_v9 }
 0x718   : > { %2737 = vst [vmem:[%s5492_s21 + $0xc0] sm:$0xff] %v2705_v47  ;;  %v2706_v28 = vadd.f32 %v3748_v63, %v2654_v16 }
 0x719   : > { %2740 = vst [vmem:[%s5492_s21 + $0xd8] sm:$0xff] %v2708_v43 }
 0x71a   : > { %2738 = vst [vmem:[%s5492_s21 + $0xc8] sm:$0xff] %v2706_v28 }
 0x722   : > { %v3327_v33 = vpop.f32.mrb[132].mxu1 }
 0x723   : > { %v2675_v27 = vadd.f32 %v3327_v33, %v5483_v24  ;;  %v2666_v40 = vpop.f32.mrb[133].mxu1 }
 0x724   : > { %v2667_v32 = vadd.f32 %v5483_v24, %v2666_v40  ;;  %v3328_v54 = vpop.f32.mrb[134].mxu1 }
 0x725   : > { %v2711_v14 = vadd.f32 %v3749_v37, %v2675_v27  ;;  %v2678_v39 = vadd.f32 %v3328_v54, %v5483_v24  ;;  %v2669_v52 = vpop.f32.mrb[135].mxu1 }
 0x726   : > { %v2709_v60 = vadd.f32 %v3750_v0, %v2667_v32  ;;  %v2670_v31 = vadd.f32 %v5483_v24, %v2669_v52 }
 0x727   : > { %2743 = vst [vmem:[%s5492_s21 + $0xf0] sm:$0xff] %v2711_v14  ;;  %v2712_v41 = vadd.f32 %v3751_v26, %v2678_v39 }
 0x728   : > { %2741 = vst [vmem:[%s5492_s21 + $0xe0] sm:$0xff] %v2709_v60  ;;  %v2710_v17 = vadd.f32 %v3752_v51, %v2670_v31 }
 0x729   : > { %2744 = vst [vmem:[%s5492_s21 + $0xf8] sm:$0xff] %v2712_v41 }
 0x72a   : > { %2742 = vst [vmem:[%s5492_s21 + $0xe8] sm:$0xff] %v2710_v17 }
 0x72b   : > { %3938 = shalt.err (!%p3935_p8)
}
 0x72c   : > { %s3939_s27 = scalar_lea.hbm %s5585_s18, 4096  ;;  %s3943_s24 = scalar_lea.hbm %s5758_s28, 8192 }
 0x72d   : > { %p3940_p11 = scmp.ne.s32.totalorder %s5585_s18, %s3939_s27  ;;  %p3944_p2 = scmp.lt.u32.totalorder %s5585_s18, %s5758_s28 }
 0x72e   : > { %p3945_p13 = scmp.lt.u32.totalorder %s3943_s24, %s3939_s27  ;;  %p3947_p1 = scmp.lt.u32.totalorder %s3939_s27, %s5585_s18 }
 0x72f   : > { %p3941_p9 = pnand %p3940_p11, %p4276_p5 }
 0x730   : > { %p3946_p6 = por %p3945_p13, %p3944_p2 }
 0x731   : > { %p3942_p0 = pneg %p3941_p9 }
 0x732   : > { %p3948_p4 = por %p3947_p1, %p3946_p6 }
 0x734   : > { %p3949_p10 = pnand %p3948_p4, %p3942_p0 }
 0x736   : > { %3952 = shalt.err (!%p3949_p10)
}
 0x737   : > { %s4040_s30 = smov 128   ;;  %s4041_s21 = smov 8  }
 0x738   : > { %3389 = dma.vmem_to_hbm [thread:$0]  (%p4276_p5), %s5587_s13, 4096, %s5585_s18, %s2746_s22, %s4040_s30, %s4040_s30, %s4041_s21  }
 0x739 PF: > { %s5759_s5 = sld [smem:[#allocation23_spill]]  ;;  %s5760_s23 = sld [smem:[#allocation26_spill]] }
 0x73a   : > { %p5762_p7 = scmp.ge.s32.totalorder %s4023_s14, 2 }
 0x73f   : > { %s2776_s9 = sand.u32 1, %s5759_s5   ;;  %p5761_p3 = scmp.ne.s32.totalorder %s5760_s23, 0 }
 0x740   : > { %s2777_s29 = scalar_lea.sflag [#allocation7], %s2776_s9 }
 0x741   : > { %p3412_p12 = pnand %p5762_p7, %p5761_p3 }
 0x743   : > { %3998 = dma.done.wait (!%p3412_p12), %s2777_s29, 4096  }
 0x744   : > { %4000 = vsyncadd (!%p3412_p12), %s2777_s29, 4294963200  ;;  %s30_s14 = sadd.s32 1, %s4023_s14   ;;  %s5763_s20 = sld [smem:[#allocation25_spill]] }
 0x745   : > { %p27_p8 = scmp.ge.s32.totalorder %s30_s14, 4   ;;  %s5764_s13 = sld [smem:[#allocation27_spill]] }
 0x746   : > { %s5765_s30 = smov %s4007_s10  ;;  %s5766_s10 = smov %s4011_s11 }
 0x747   : > { %s5767_s11 = smov %s4287_s12  ;;  %29 = sbr.rel (!%p27_p8) target bundleno = 16 (0x10), region = 134 }
 0x74a   : > { %s5768_s12 = smov %s5763_s20 }
 0x74e   :  { %2782 = vsyncpa [#allocation6], 1 }
 0x74f   :  { %2784 = vsyncpa [#allocation6 + $0x1], 1 }
 0x750   :  { %2785 = vsyncpa [#allocation9], 1 }
 0x751   :  { %2787 = vsyncpa [#allocation9 + $0x1], 1 }
 0x752   :  { %2788 = vsyncpa [#allocation12], 1 }
 0x753   :  { %2789 = vsyncpa [#allocation15], 1 }
 0x754   :  { %2790 = vsyncpa [#allocation7], 1 }
 0x755   :  { %2792 = vsyncpa [#allocation7 + $0x1], 1 }

</bundles_post_ra>
